<compile_context>
chip_gen: v5e
topology: v5e:2x2
jax: 0.10.0
libtpu: 0.0.40
codegen_flags: <defaults>
</compile_context>

<pallas_src>
import math
import numpy as np

import jax
import jax.numpy as jnp
from jax import lax
from jax.experimental import pallas as pl
from jax.experimental.pallas import tpu as pltpu

# ---------------------------------------------------------------------------
# Small synthetic configuration (stand-ins for CLIP ViT-L/14 + LLaMA)
# ---------------------------------------------------------------------------
B = 2            # batch
C_IN = 3         # image channels
IMG = 16         # image spatial size
PATCH = 8        # conv1 kernel/stride  -> 2x2 = 4 patches (+1 cls = 5 tokens)
W_CLIP = 32      # clip visual transformer width
CLIP_HEADS = 4
CLIP_DEPTH = 2
CLIP_DIM = 32    # clip.visual.proj.shape[1]

V_EMBED = 32     # v_embed_dim
V_DEPTH = 2      # v_depth
V_HEADS = 4      # v_num_heads
V_MLP_RATIO = 4.0
QUERY_LEN = 4    # query_len
QUERY_LAYER = 2  # query_layer (number of adapter-injected llama layers)

HIDDEN = 32      # llama hidden_size
N_LAYERS = 4     # total llama decoder layers (N_LAYERS - QUERY_LAYER plain ones)
N_HEADS = 4
HEAD_DIM = HIDDEN // N_HEADS
FFN = 64         # llama intermediate_size
VOCAB = 64
SEQ = 8


# ---------------------------------------------------------------------------
# Pallas kernels
# ---------------------------------------------------------------------------
def _apply_act(y, act):
    if act == "gelu":            # exact GELU (torch.nn.GELU default)
        return 0.5 * y * (1.0 + lax.erf(y * (1.0 / math.sqrt(2.0))))
    if act == "quick_gelu":      # CLIP QuickGELU
        return y * jax.nn.sigmoid(1.702 * y)
    if act == "silu":            # LLaMA MLP activation
        return y * jax.nn.sigmoid(y)
    return y


def _layer_norm(x, g, b, eps=1e-5):
    mean = jnp.mean(x, axis=-1, keepdims=True)
    var = jnp.mean((x - mean) ** 2, axis=-1, keepdims=True)
    return (x - mean) * lax.rsqrt(var + eps) * g + b


def _make_linear_kernel(pre_norm, act, has_bias, has_residual, post_norm, out_dtype):
    """Fused [pre-norm] -> matmul(bf16) -> [+bias] -> [act] -> [+residual] -> [post-LN]."""
    def kernel(*refs):
        idx = 0
        x = refs[idx][...].astype(jnp.float32)
        idx += 1
        if pre_norm == "layer":
            g = refs[idx][...]
            b = refs[idx + 1][...]
            idx += 2
            x = _layer_norm(x, g, b)
        elif pre_norm == "rms":
            g = refs[idx][...]
            idx += 1
            var = jnp.mean(x * x, axis=-1, keepdims=True)
            x = x * lax.rsqrt(var + 1e-6) * g
        w = refs[idx][...]                       # stored bf16 in params
        idx += 1
        y = jnp.dot(x.astype(jnp.bfloat16), w, preferred_element_type=jnp.float32)
        if has_bias:
            y = y + refs[idx][...]
            idx += 1
        y = _apply_act(y, act)
        if has_residual:
            y = y + refs[idx][...].astype(jnp.float32)
            idx += 1
        if post_norm == "layer":
            g = refs[idx][...]
            b = refs[idx + 1][...]
            idx += 2
            y = _layer_norm(y, g, b)
        refs[-1][...] = y.astype(out_dtype)
    return kernel


def linear_fused(x, w, b=None, *, act=None, norm=None, norm_g=None, norm_b=None,
                 residual=None, out_norm=None, out_g=None, out_b=None,
                 out_dtype=jnp.float32):
    """x: (..., K) @ w: (K, N) with optional fused norms/bias/act/residual."""
    orig_shape = x.shape
    K = orig_shape[-1]
    M = int(np.prod(orig_shape[:-1]))
    N = w.shape[1]
    if w.dtype != jnp.bfloat16:          # weights are pre-stored bf16; no runtime cast
        w = w.astype(jnp.bfloat16)

    inputs = [x.reshape(M, K)]
    in_specs = [pl.BlockSpec((M, K), lambda i: (0, 0))]
    if norm == "layer":
        inputs += [norm_g.reshape(1, K), norm_b.reshape(1, K)]
        in_specs += [pl.BlockSpec((1, K), lambda i: (0, 0)),
                     pl.BlockSpec((1, K), lambda i: (0, 0))]
    elif norm == "rms":
        inputs += [norm_g.reshape(1, K)]
        in_specs += [pl.BlockSpec((1, K), lambda i: (0, 0))]

    inputs.append(w)
    in_specs.append(pl.BlockSpec((K, N), lambda i: (0, 0)))

    has_bias = b is not None
    if has_bias:
        inputs.append(b.reshape(1, N))
        in_specs.append(pl.BlockSpec((1, N), lambda i: (0, 0)))

    has_res = residual is not None
    if has_res:
        inputs.append(residual.reshape(M, N))
        in_specs.append(pl.BlockSpec((M, N), lambda i: (0, 0)))

    if out_norm == "layer":
        inputs += [out_g.reshape(1, N), out_b.reshape(1, N)]
        in_specs += [pl.BlockSpec((1, N), lambda i: (0, 0)),
                     pl.BlockSpec((1, N), lambda i: (0, 0))]

    # TODO(synk): tile with (M/tm, N/tn, K/tk) grid + VMEM accumulator at real sizes.
    out = pl.pallas_call(
        _make_linear_kernel(norm, act, has_bias, has_res, out_norm, out_dtype),
        out_shape=jax.ShapeDtypeStruct((M, N), out_dtype),
        grid=(1,),
        in_specs=in_specs,
        out_specs=pl.BlockSpec((M, N), lambda i: (0, 0)),
    )(*inputs)
    return out.reshape(orig_shape[:-1] + (N,))


def _add_ln_kernel(x_ref, p_ref, g_ref, b_ref, o_ref):
    """out = LayerNorm(x + pos) — fuses CLIP's positional add with ln_pre."""
    x = x_ref[...].astype(jnp.float32) + p_ref[...]
    o_ref[...] = _layer_norm(x, g_ref[...], b_ref[...])


def add_layernorm(x, pos, g, b):
    Bx, T, E = x.shape
    return pl.pallas_call(
        _add_ln_kernel,
        out_shape=jax.ShapeDtypeStruct((Bx, T, E), jnp.float32),
        grid=(1,),
        in_specs=[
            pl.BlockSpec((Bx, T, E), lambda i: (0, 0, 0)),
            pl.BlockSpec((T, E), lambda i: (0, 0)),
            pl.BlockSpec((1, E), lambda i: (0, 0)),
            pl.BlockSpec((1, E), lambda i: (0, 0)),
        ],
        out_specs=pl.BlockSpec((Bx, T, E), lambda i: (0, 0, 0)),
    )(x, pos, g.reshape(1, E), b.reshape(1, E))


def _make_vit_mlp_kernel(act):
    """out = x + fc2(act(fc1(LN(x)))) — the whole ViT/CLIP MLP sublayer."""
    def kernel(x_ref, g_ref, b_ref, w1_ref, b1_ref, w2_ref, b2_ref, o_ref):
        x = x_ref[...].astype(jnp.float32)
        h = _layer_norm(x, g_ref[...], b_ref[...])
        y = jnp.dot(h.astype(jnp.bfloat16), w1_ref[...],
                    preferred_element_type=jnp.float32) + b1_ref[...]
        y = _apply_act(y, act)
        o = jnp.dot(y.astype(jnp.bfloat16), w2_ref[...],
                    preferred_element_type=jnp.float32) + b2_ref[...]
        o_ref[...] = x + o
    return kernel


def vit_mlp(x, p, act):
    shape = x.shape
    E = shape[-1]
    M = int(np.prod(shape[:-1]))
    Fh = p["fc1_w"].shape[1]
    out = pl.pallas_call(
        _make_vit_mlp_kernel(act),
        out_shape=jax.ShapeDtypeStruct((M, E), jnp.float32),
        grid=(1,),
        in_specs=[
            pl.BlockSpec((M, E), lambda i: (0, 0)),
            pl.BlockSpec((1, E), lambda i: (0, 0)),
            pl.BlockSpec((1, E), lambda i: (0, 0)),
            pl.BlockSpec((E, Fh), lambda i: (0, 0)),
            pl.BlockSpec((1, Fh), lambda i: (0, 0)),
            pl.BlockSpec((Fh, E), lambda i: (0, 0)),
            pl.BlockSpec((1, E), lambda i: (0, 0)),
        ],
        out_specs=pl.BlockSpec((M, E), lambda i: (0, 0)),
    )(x.reshape(M, E), p["ln2_g"].reshape(1, E), p["ln2_b"].reshape(1, E),
      p["fc1_w"], p["fc1_b"].reshape(1, Fh),
      p["fc2_w"], p["fc2_b"].reshape(1, E))
    return out.reshape(shape)


def _llama_mlp_kernel(x_ref, g_ref, wg_ref, wu_ref, wd_ref, o_ref):
    """out = x + down(silu(gate(RMS(x))) * up(RMS(x))) — the whole LLaMA MLP."""
    x = x_ref[...].astype(jnp.float32)
    var = jnp.mean(x * x, axis=-1, keepdims=True)
    h = (x * lax.rsqrt(var + 1e-6) * g_ref[...]).astype(jnp.bfloat16)
    g = jnp.dot(h, wg_ref[...], preferred_element_type=jnp.float32)
    u = jnp.dot(h, wu_ref[...], preferred_element_type=jnp.float32)
    g = g * jax.nn.sigmoid(g)
    o = jnp.dot((g * u).astype(jnp.bfloat16), wd_ref[...],
                preferred_element_type=jnp.float32)
    o_ref[...] = x + o


def llama_mlp(x, p):
    shape = x.shape
    H = shape[-1]
    M = int(np.prod(shape[:-1]))
    Fh = p["w_gate"].shape[1]
    out = pl.pallas_call(
        _llama_mlp_kernel,
        out_shape=jax.ShapeDtypeStruct((M, H), jnp.float32),
        grid=(1,),
        in_specs=[
            pl.BlockSpec((M, H), lambda i: (0, 0)),
            pl.BlockSpec((1, H), lambda i: (0, 0)),
            pl.BlockSpec((H, Fh), lambda i: (0, 0)),
            pl.BlockSpec((H, Fh), lambda i: (0, 0)),
            pl.BlockSpec((Fh, H), lambda i: (0, 0)),
        ],
        out_specs=pl.BlockSpec((M, H), lambda i: (0, 0)),
    )(x.reshape(M, H), p["post_norm"].reshape(1, H),
      p["w_gate"], p["w_up"], p["w_down"])
    return out.reshape(shape)


def _rope_rotate_half(x):
    """rotate_half(x) = [-x2, x1] via an XLU roll + iota sign mask (no MXU)."""
    d = x.shape[-1]
    half = d // 2
    rolled = pltpu.roll(x, shift=half, axis=x.ndim - 1)
    lane = lax.broadcasted_iota(jnp.int32, x.shape, x.ndim - 1)
    return jnp.where(lane < half, -rolled, rolled)


def _make_attn_kernel(causal, has_rope, has_adapter, n_main, scale, out_dtype):
    """One (batch*head) slice per grid step: RoPE + QK^T + segment softmax + PV.

    For adapter layers, k/v arrive with the L adapter tokens concatenated after
    the n_main sequence tokens; the adapter key rows of the cos/sin tables hold
    the identity rotation, so a single einsum covers both segments.  The two
    softmaxes (causal main segment, tanh-gated adapter segment) are computed on
    the shared score block with iota masks — identical math to the reference.
    """
    def kernel(*refs):
        idx = 0
        q = refs[idx][...].astype(jnp.float32)       # (1, Sq, D)
        k = refs[idx + 1][...].astype(jnp.float32)   # (1, Skt, D)
        v = refs[idx + 2][...]
        idx += 3
        if has_rope:
            cos_q = refs[idx][...]
            sin_q = refs[idx + 1][...]
            cos_k = refs[idx + 2][...]
            sin_k = refs[idx + 3][...]
            idx += 4
            q = q * cos_q + _rope_rotate_half(q) * sin_q
            k = k * cos_k + _rope_rotate_half(k) * sin_k
        s = jnp.einsum("bqd,bkd->bqk", q.astype(jnp.bfloat16), k.astype(jnp.bfloat16),
                       preferred_element_type=jnp.float32) * scale
        _, Sq, Skt = s.shape
        col = lax.broadcasted_iota(jnp.int32, (1, Sq, Skt), 2)
        row = lax.broadcasted_iota(jnp.int32, (1, Sq, Skt), 1)
        neg = jnp.float32(-1e30)
        if causal:
            s = jnp.where((col < n_main) & (col > row), neg, s)
        if has_adapter:
            gate = refs[idx][...]                    # (1, 1, 1), already tanh'd
            idx += 1
            main = col < n_main
            s_m = jnp.where(main, s, neg)
            s_a = jnp.where(main, neg, s)
            e_m = jnp.exp(s_m - jnp.max(s_m, axis=-1, keepdims=True))
            e_a = jnp.exp(s_a - jnp.max(s_a, axis=-1, keepdims=True))
            p = (e_m / jnp.sum(e_m, axis=-1, keepdims=True)
                 + gate * (e_a / jnp.sum(e_a, axis=-1, keepdims=True)))
        else:
            e = jnp.exp(s - jnp.max(s, axis=-1, keepdims=True))
            p = e / jnp.sum(e, axis=-1, keepdims=True)
        o = jnp.einsum("bqk,bkd->bqd", p.astype(jnp.bfloat16), v.astype(jnp.bfloat16),
                       preferred_element_type=jnp.float32)
        refs[-1][...] = o.astype(out_dtype)
    return kernel


def fused_attention(q, k, v, *, causal=False, rope=None, adapter_gate=None,
                    n_main=None, out_dtype=jnp.bfloat16):
    """q: (BH, Sq, D); k/v: (BH, Skt, D) with adapter tokens (if any) appended."""
    BH, Sq, D = q.shape
    Skt = k.shape[1]
    if n_main is None:
        n_main = Skt
    scale = 1.0 / math.sqrt(D)

    inputs = [q, k, v]
    in_specs = [
        pl.BlockSpec((1, Sq, D), lambda b: (b, 0, 0)),
        pl.BlockSpec((1, Skt, D), lambda b: (b, 0, 0)),
        pl.BlockSpec((1, Skt, D), lambda b: (b, 0, 0)),
    ]
    has_rope = rope is not None
    if has_rope:
        cos_q, sin_q, cos_k, sin_k = rope
        inputs += [cos_q, sin_q, cos_k, sin_k]
        in_specs += [
            pl.BlockSpec((Sq, D), lambda b: (0, 0)),
            pl.BlockSpec((Sq, D), lambda b: (0, 0)),
            pl.BlockSpec((Skt, D), lambda b: (0, 0)),
            pl.BlockSpec((Skt, D), lambda b: (0, 0)),
        ]
    has_adapter = adapter_gate is not None
    if has_adapter:
        inputs.append(adapter_gate)
        in_specs.append(pl.BlockSpec((1, 1, 1), lambda b: (b, 0, 0)))

    # TODO(synk): at real SEQ this needs flash-style (q-tile, kv-tile) blocking with
    # running max/sum/acc VMEM scratch instead of the full (Sq, Skt) score block.
    return pl.pallas_call(
        _make_attn_kernel(causal, has_rope, has_adapter, n_main, scale, out_dtype),
        out_shape=jax.ShapeDtypeStruct((BH, Sq, D), out_dtype),
        grid=(BH,),
        in_specs=in_specs,
        out_specs=pl.BlockSpec((1, Sq, D), lambda b: (b, 0, 0)),
        compiler_params=pltpu.CompilerParams(
            dimension_semantics=("parallel",)),
    )(*inputs)


def _ce_kernel(logits_ref, lbl_ref, loss_ref, cnt_ref):
    logits = logits_ref[...]
    lbl = lbl_ref[...]                                   # (M, 1) int32
    M, V = logits.shape
    m = jnp.max(logits, axis=-1, keepdims=True)
    lse = jnp.log(jnp.sum(jnp.exp(logits - m), axis=-1, keepdims=True)) + m
    vocab_ids = lax.broadcasted_iota(jnp.int32, (M, V), 1)
    onehot = (vocab_ids == lbl).astype(jnp.float32)      # in-kernel one-hot
    picked = jnp.sum(onehot * logits, axis=-1, keepdims=True)
    valid = (lbl != 0).astype(jnp.float32)               # ignore_index=0 (reference)
    per = (lse - picked) * valid
    loss_ref[0, 0] = jnp.sum(per)                        # scalar outputs in SMEM
    cnt_ref[0, 0] = jnp.sum(valid)


def ce_loss_sums(logits, labels_col):
    M, V = logits.shape
    # TODO(synk): at real vocab (32k+) tile over the vocab axis with an online
    # max/LSE accumulator (and tile M); a single (M, VOCAB) block won't fit VMEM.
    return pl.pallas_call(
        _ce_kernel,
        out_shape=(jax.ShapeDtypeStruct((1, 1), jnp.float32),
                   jax.ShapeDtypeStruct((1, 1), jnp.float32)),
        grid=(1,),
        in_specs=[
            pl.BlockSpec((M, V), lambda i: (0, 0)),
            pl.BlockSpec((M, 1), lambda i: (0, 0)),
        ],
        out_specs=(pl.BlockSpec(memory_space=pltpu.MemorySpace.SMEM),
                   pl.BlockSpec(memory_space=pltpu.MemorySpace.SMEM)),
    )(logits, labels_col)


# ---------------------------------------------------------------------------
# Model glue built on the Pallas kernels
# ---------------------------------------------------------------------------
def vit_attention(x, p, n_heads):
    """Pre-LN qkv-packed multi-head attention (CLIP / timm ViT blocks)."""
    Bx, S, E = x.shape
    hd = E // n_heads
    qkv = linear_fused(x, p["attn"]["qkv_w"], p["attn"]["qkv_b"],
                       norm="layer", norm_g=p["ln1_g"], norm_b=p["ln1_b"],
                       out_dtype=jnp.bfloat16)
    q, k, v = jnp.split(qkv, 3, axis=-1)

    # TODO(synk): emit head-major layout directly from the QKV kernel's out_spec
    # at real sizes instead of these XLA reshapes/transposes between kernels.
    def heads(t):
        return t.reshape(Bx, S, n_heads, hd).transpose(0, 2, 1, 3).reshape(
            Bx * n_heads, S, hd)

    o = fused_attention(heads(q), heads(k), heads(v), out_dtype=jnp.bfloat16)
    o = o.reshape(Bx, n_heads, S, hd).transpose(0, 2, 1, 3).reshape(Bx, S, E)
    return linear_fused(o, p["attn"]["proj_w"], p["attn"]["proj_b"], residual=x)


def transformer_block(x, p, n_heads, act):
    x = vit_attention(x, p, n_heads)
    return vit_mlp(x, p, act)


def clip_encode_image(params, imgs):
    cp = params["clip"]
    Bx = imgs.shape[0]
    gh = gw = IMG // PATCH
    # conv1 (stride == kernel, no bias) as a Pallas matmul on extracted patches
    patches = imgs.reshape(Bx, C_IN, gh, PATCH, gw, PATCH)
    patches = patches.transpose(0, 2, 4, 1, 3, 5).reshape(
        Bx * gh * gw, C_IN * PATCH * PATCH)
    x = linear_fused(patches, cp["conv_w_flat"]).reshape(Bx, gh * gw, W_CLIP)
    cls = jnp.broadcast_to(cp["class_emb"][None, None, :], (Bx, 1, W_CLIP))
    x = jnp.concatenate([cls, x], axis=1)
    # fused: + positional_embedding -> ln_pre (single kernel)
    x = add_layernorm(x, cp["pos_emb"], cp["ln_pre_g"], cp["ln_pre_b"])
    for blk in cp["blocks"]:
        x = transformer_block(x, blk, CLIP_HEADS, act="quick_gelu")
    # ln_post fused into the visual projection (x @ visual.proj, no bias)
    return linear_fused(x, cp["proj"], norm="layer",
                        norm_g=cp["ln_post_g"], norm_b=cp["ln_post_b"],
                        out_dtype=jnp.bfloat16)


def forward_visual(params, imgs):
    clip_feats = clip_encode_image(params, imgs)
    # clip_proj -> clip_proj_norm fused (LayerNorm epilogue)
    x = linear_fused(clip_feats, params["clip_proj_w"], params["clip_proj_b"],
                     out_norm="layer", out_g=params["clip_proj_norm_g"],
                     out_b=params["clip_proj_norm_b"])
    Bx = imgs.shape[0]
    vq = jnp.broadcast_to(params["visual_query"][None], (Bx, QUERY_LEN, V_EMBED))
    x = jnp.concatenate([vq, x], axis=1)
    for blk in params["visual_blocks"]:
        x = transformer_block(x, blk, V_HEADS, act="gelu")
    x = x[:, :QUERY_LEN, :]
    # visual_proj -> visual_proj_norm fused (LayerNorm epilogue)
    return linear_fused(x, params["visual_proj_w"], params["visual_proj_b"],
                        out_norm="layer", out_g=params["visual_proj_norm_g"],
                        out_b=params["visual_proj_norm_b"])


def build_rope_tables(S, adapter_len):
    """HF-LLaMA cos/sin tables of shape (S, head_dim) plus key tables padded with
    adapter_len trailing identity rows (cos=1, sin=0: adapter keys get no RoPE)."""
    hd = HEAD_DIM
    inv_freq = 1.0 / (10000.0 ** (np.arange(0, hd, 2, dtype=np.float32) / hd))
    t = np.arange(S, dtype=np.float32)
    freqs = np.outer(t, inv_freq)
    emb = np.concatenate([freqs, freqs], axis=-1)          # (S, hd)
    cos = np.cos(emb).astype(np.float32)
    sin = np.sin(emb).astype(np.float32)
    cos_ka = np.concatenate([cos, np.ones((adapter_len, hd), np.float32)], axis=0)
    sin_ka = np.concatenate([sin, np.zeros((adapter_len, hd), np.float32)], axis=0)
    return (jnp.asarray(cos), jnp.asarray(sin),
            jnp.asarray(cos_ka), jnp.asarray(sin_ka))


def llama_layer(h, p, rope_tabs, adapter=None):
    Bx, S, H = h.shape
    nH, hd = N_HEADS, HEAD_DIM
    cos_q, sin_q, cos_ka, sin_ka = rope_tabs
    # fused: RMSNorm prologue + packed QKV matmul + bias (bf16 out)
    qkv = linear_fused(h, p["wqkv"], p["bqkv"], norm="rms", norm_g=p["in_norm"],
                       out_dtype=jnp.bfloat16)
    q, k, v = jnp.split(qkv, 3, axis=-1)

    def heads(t, L):
        return t.reshape(Bx, L, nH, hd).transpose(0, 2, 1, 3).reshape(Bx * nH, L, hd)

    qf, kf, vf = heads(q, S), heads(k, S), heads(v, S)

    if adapter is not None:
        # TODO(synk): the exact modified HF LlamaDecoderLayer adapter semantics are
        # not in the reference source; this is standard LLaMA-Adapter gated prefix
        # attention (no RoPE on adapter keys, per-head tanh gate on adapter probs).
        L = adapter.shape[1]
        w_kv = p["wqkv"][:, H:]          # packed (H, 2H) = [wk | wv]
        b_kv = p["bqkv"][H:]
        akv = linear_fused(adapter, w_kv, b_kv, out_dtype=jnp.bfloat16)
        ak, av = jnp.split(akv, 2, axis=-1)
        kf = jnp.concatenate([kf, heads(ak, L)], axis=1)   # adapter keys appended
        vf = jnp.concatenate([vf, heads(av, L)], axis=1)
        gate = jnp.tile(jnp.tanh(p["gate"]), (Bx,)).reshape(Bx * nH, 1, 1)
        rope = (cos_q, sin_q, cos_ka, sin_ka)
    else:
        gate = None
        rope = (cos_q, sin_q, cos_q, sin_q)

    attn = fused_attention(qf, kf, vf, causal=True, rope=rope,
                           adapter_gate=gate, n_main=S, out_dtype=jnp.bfloat16)
    attn = attn.reshape(Bx, nH, S, hd).transpose(0, 2, 1, 3).reshape(Bx, S, H)
    h = linear_fused(attn, p["wo"], p["bo"], residual=h)   # o-proj + residual fused
    return llama_mlp(h, p)                                 # norm+SwiGLU+down+residual


def hf_adapter_forward(params, input_ids, labels, imgs):
    """Matches HF_adapter.forward(input_ids, labels, imgs) -> (c_loss, c_loss)."""
    visual_query = forward_visual(params, imgs)            # (B, QUERY_LEN, HIDDEN)

    Bx, S = input_ids.shape
    rope_tabs = build_rope_tables(S, QUERY_LEN)

    h = params["embed_tokens"][input_ids]                  # (B, S, HIDDEN)

    layers = params["llama_layers"]
    n_plain = N_LAYERS - QUERY_LAYER
    for p in layers[:n_plain]:
        h = llama_layer(h, p, rope_tabs)

    adapter = params["adapter_query"].reshape(QUERY_LAYER, QUERY_LEN, HIDDEN)
    for p in layers[n_plain:]:
        # NOTE: the reference never increments adapter_index; adapter[0] is
        # reused for every adapter layer — preserved here for exact semantics.
        dyn = adapter[0][None] + visual_query              # (B, QUERY_LEN, HIDDEN)
        h = llama_layer(h, p, rope_tabs, adapter=dyn)

    # final RMSNorm fused into the lm_head projection (no bias)
    logits = linear_fused(h, params["lm_head"], norm="rms",
                          norm_g=params["final_norm"])     # (B, S, VOCAB) f32
    logits = logits[:, :-1, :]
    lbl = labels[:, 1:]

    flat_logits = logits.reshape(-1, VOCAB)
    flat_lbl = lbl.reshape(-1, 1).astype(jnp.int32)
    loss_sum, cnt = ce_loss_sums(flat_logits, flat_lbl)
    ce = loss_sum[0, 0] / jnp.maximum(cnt[0, 0], 1.0)
    c_loss = jnp.where(jnp.sum(labels) == 0, jnp.mean(logits) * 0.0, ce)
    return c_loss, c_loss


# ---------------------------------------------------------------------------
# Deterministic synthetic parameters (matmul weights stored in bf16)
# ---------------------------------------------------------------------------
def build_params():
    key = jax.random.PRNGKey(0)
    ks = list(jax.random.split(key, 512))
    ctr = [0]

    def nxt():
        k = ks[ctr[0]]
        ctr[0] += 1
        return k

    def randn(shape, scale=0.02):
        return (scale * jax.random.normal(nxt(), shape)).astype(jnp.float32)

    def randn_bf(shape, scale=0.02):
        # weights live in bf16 so kernels never re-cast / re-DMA f32 copies
        return randn(shape, scale).astype(jnp.bfloat16)

    def zeros(shape):
        return jnp.zeros(shape, jnp.float32)

    def ones(shape):
        return jnp.ones(shape, jnp.float32)

    def attn_block(width, mlp_hidden):
        return dict(
            ln1_g=ones((width,)), ln1_b=zeros((width,)),
            attn=dict(qkv_w=randn_bf((width, 3 * width)), qkv_b=zeros((3 * width,)),
                      proj_w=randn_bf((width, width)), proj_b=zeros((width,))),
            ln2_g=ones((width,)), ln2_b=zeros((width,)),
            fc1_w=randn_bf((width, mlp_hidden)), fc1_b=zeros((mlp_hidden,)),
            fc2_w=randn_bf((mlp_hidden, width)), fc2_b=zeros((width,)),
        )

    clip = dict(
        conv_w_flat=randn_bf((C_IN * PATCH * PATCH, W_CLIP)),   # conv1 as matmul weight
        class_emb=randn((W_CLIP,)),
        pos_emb=randn((1 + (IMG // PATCH) ** 2, W_CLIP)),
        ln_pre_g=ones((W_CLIP,)), ln_pre_b=zeros((W_CLIP,)),
        blocks=[attn_block(W_CLIP, 4 * W_CLIP) for _ in range(CLIP_DEPTH)],
        ln_post_g=ones((W_CLIP,)), ln_post_b=zeros((W_CLIP,)),
        proj=randn_bf((W_CLIP, CLIP_DIM)),
    )

    def llama_layer_params(with_gate):
        wq = randn((HIDDEN, HIDDEN))
        wk = randn((HIDDEN, HIDDEN))
        wv = randn((HIDDEN, HIDDEN))
        p = dict(
            in_norm=ones((HIDDEN,)),
            wqkv=jnp.concatenate([wq, wk, wv], axis=1).astype(jnp.bfloat16),
            bqkv=zeros((3 * HIDDEN,)),
            wo=randn_bf((HIDDEN, HIDDEN)), bo=zeros((HIDDEN,)),
            post_norm=ones((HIDDEN,)),
            w_gate=randn_bf((HIDDEN, FFN)),
            w_up=randn_bf((HIDDEN, FFN)),
            w_down=randn_bf((FFN, HIDDEN)),
        )
        if with_gate:
            p["gate"] = randn((N_HEADS,), scale=0.1)
        return p

    return dict(
        clip=clip,
        clip_proj_w=randn_bf((CLIP_DIM, V_EMBED)), clip_proj_b=zeros((V_EMBED,)),
        clip_proj_norm_g=ones((V_EMBED,)), clip_proj_norm_b=zeros((V_EMBED,)),
        visual_query=randn((QUERY_LEN, V_EMBED)),
        visual_blocks=[attn_block(V_EMBED, int(V_EMBED * V_MLP_RATIO))
                       for _ in range(V_DEPTH)],
        visual_proj_w=randn_bf((V_EMBED, HIDDEN)), visual_proj_b=zeros((HIDDEN,)),
        visual_proj_norm_g=ones((HIDDEN,)), visual_proj_norm_b=zeros((HIDDEN,)),
        adapter_query=randn((QUERY_LEN * QUERY_LAYER, HIDDEN)),
        embed_tokens=randn((VOCAB, HIDDEN)),
        llama_layers=[llama_layer_params(i >= N_LAYERS - QUERY_LAYER)
                      for i in range(N_LAYERS)],
        final_norm=ones((HIDDEN,)),
        lm_head=randn_bf((HIDDEN, VOCAB)),
    )


if __name__ == "__main__":
    params = build_params()

    key = jax.random.PRNGKey(0)
    k_img, k_ids, k_lbl = jax.random.split(key, 3)
    imgs = jax.random.normal(k_img, (B, C_IN, IMG, IMG), dtype=jnp.float32)   # NCHW
    input_ids = jax.random.randint(k_ids, (B, SEQ), 0, VOCAB, dtype=jnp.int32)
    labels = jax.random.randint(k_lbl, (B, SEQ), 0, VOCAB, dtype=jnp.int32)

    fwd = jax.jit(hf_adapter_forward)
    c_loss, c_loss2 = fwd(params, input_ids, labels, imgs)
    jax.block_until_ready((c_loss, c_loss2))

    assert c_loss.shape == () and jnp.isfinite(c_loss), "bad loss"
    print("KERNEL_OK")
</pallas_src>

<mosaic_0001>
module attributes {stable_mosaic.version = 11 : i64} {
  func.func @kernel(%arg0: i32, %arg1: memref<16x32xf32, #tpu.memory_space<vmem>>, %arg2: memref<1x32xf32, #tpu.memory_space<vmem>>, %arg3: memref<32x96xbf16, #tpu.memory_space<vmem>>, %arg4: memref<1x96xf32, #tpu.memory_space<vmem>>, %arg5: memref<16x96xbf16, #tpu.memory_space<vmem>>) attributes {dimension_semantics = [#tpu.dimension_semantics<arbitrary>], iteration_bounds = array<i64: 1>, scalar_prefetch = 0 : i64, scratch_operands = 0 : i64, tpu.core_type = #tpu.core_type<tc>, window_params = [{pipeline_mode = #tpu.pipeline_mode<synchronous>, transform_indices = @transform_0, window_bounds = array<i64: 16, 32>}, {pipeline_mode = #tpu.pipeline_mode<synchronous>, transform_indices = @transform_1, window_bounds = array<i64: 1, 32>}, {pipeline_mode = #tpu.pipeline_mode<synchronous>, transform_indices = @transform_2, window_bounds = array<i64: 32, 96>}, {pipeline_mode = #tpu.pipeline_mode<synchronous>, transform_indices = @transform_3, window_bounds = array<i64: 1, 96>}, {pipeline_mode = #tpu.pipeline_mode<synchronous>, transform_indices = @transform_4, window_bounds = array<i64: 16, 96>}]} {
    %c0 = arith.constant 0 : index
    %c0_0 = arith.constant 0 : index
    %0 = vector.load %arg1[%c0, %c0_0] : memref<16x32xf32, #tpu.memory_space<vmem>>, vector<16x32xf32>
    %c0_1 = arith.constant 0 : index
    %c0_2 = arith.constant 0 : index
    %1 = vector.load %arg2[%c0_1, %c0_2] : memref<1x32xf32, #tpu.memory_space<vmem>>, vector<1x32xf32>
    %2 = arith.mulf %0, %0 : vector<16x32xf32>
    %cst = arith.constant dense<0.000000e+00> : vector<16xf32>
    %3 = vector.multi_reduction <add>, %2, %cst [1] : vector<16x32xf32> to vector<16xf32>
    %4 = vector.shape_cast %3 : vector<16xf32> to vector<16x1xf32>
    %cst_3 = arith.constant 3.200000e+01 : f32
    %5 = vector.broadcast %cst_3 : f32 to vector<16x1xf32>
    %6 = arith.divf %4, %5 : vector<16x1xf32>
    %cst_4 = arith.constant 9.99999997E-7 : f32
    %7 = vector.broadcast %cst_4 : f32 to vector<16x1xf32>
    %8 = arith.addf %6, %7 : vector<16x1xf32>
    %9 = math.rsqrt %8 : vector<16x1xf32>
    %10 = vector.broadcast %9 : vector<16x1xf32> to vector<16x32xf32>
    %11 = arith.mulf %0, %10 : vector<16x32xf32>
    %12 = vector.broadcast %1 : vector<1x32xf32> to vector<16x32xf32>
    %13 = arith.mulf %11, %12 : vector<16x32xf32>
    %c0_5 = arith.constant 0 : index
    %c0_6 = arith.constant 0 : index
    %14 = vector.load %arg3[%c0_5, %c0_6] : memref<32x96xbf16, #tpu.memory_space<vmem>>, vector<32x96xbf16>
    %15 = arith.truncf %13 : vector<16x32xf32> to vector<16x32xbf16>
    %cst_7 = arith.constant dense<0.000000e+00> : vector<16x96xf32>
    %16 = tpu.matmul %15, %14, %cst_7 {dimension_numbers = #tpu.dot_dimension_numbers<[1], [0], [0], [1], [0, 0, 1, 1], [], []>} : vector<16x32xbf16>, vector<32x96xbf16>, vector<16x96xf32> -> vector<16x96xf32>
    %c0_8 = arith.constant 0 : index
    %c0_9 = arith.constant 0 : index
    %17 = vector.load %arg4[%c0_8, %c0_9] : memref<1x96xf32, #tpu.memory_space<vmem>>, vector<1x96xf32>
    %18 = vector.broadcast %17 : vector<1x96xf32> to vector<16x96xf32>
    %19 = arith.addf %16, %18 : vector<16x96xf32>
    %20 = arith.truncf %19 : vector<16x96xf32> to vector<16x96xbf16>
    %c0_10 = arith.constant 0 : index
    %c0_11 = arith.constant 0 : index
    %21 = vector.load %arg5[%c0_10, %c0_11] : memref<16x96xbf16, #tpu.memory_space<vmem>>, vector<16x96xbf16>
    tpu.vector_store %arg5[%c0_10, %c0_11], %20 {strides = array<i32>} : memref<16x96xbf16, #tpu.memory_space<vmem>>, vector<16x96xbf16>,
    return
  }
  func.func @transform_0(%arg0: i32) -> (i32, i32) {
    %c0_i32 = arith.constant 0 : i32
    %c0_i32_0 = arith.constant 0 : i32
    %c0_i32_1 = arith.constant 0 : i32
    return %c0_i32, %c0_i32_0 : i32, i32
  }
  func.func @transform_1(%arg0: i32) -> (i32, i32) {
    %c0_i32 = arith.constant 0 : i32
    %c0_i32_0 = arith.constant 0 : i32
    %c0_i32_1 = arith.constant 0 : i32
    return %c0_i32, %c0_i32_0 : i32, i32
  }
  func.func @transform_2(%arg0: i32) -> (i32, i32) {
    %c0_i32 = arith.constant 0 : i32
    %c0_i32_0 = arith.constant 0 : i32
    %c0_i32_1 = arith.constant 0 : i32
    return %c0_i32, %c0_i32_0 : i32, i32
  }
  func.func @transform_3(%arg0: i32) -> (i32, i32) {
    %c0_i32 = arith.constant 0 : i32
    %c0_i32_0 = arith.constant 0 : i32
    %c0_i32_1 = arith.constant 0 : i32
    return %c0_i32, %c0_i32_0 : i32, i32
  }
  func.func @transform_4(%arg0: i32) -> (i32, i32) {
    %c0_i32 = arith.constant 0 : i32
    %c0_i32_0 = arith.constant 0 : i32
    %c0_i32_1 = arith.constant 0 : i32
    return %c0_i32, %c0_i32_0 : i32, i32
  }
}

module attributes {stable_mosaic.version = 11 : i64} {
  func.func @kernel(%arg0: i32, %arg1: memref<1x8x8xbf16, #tpu.memory_space<vmem>>, %arg2: memref<1x8x8xbf16, #tpu.memory_space<vmem>>, %arg3: memref<1x8x8xbf16, #tpu.memory_space<vmem>>, %arg4: memref<8x8xf32, #tpu.memory_space<vmem>>, %arg5: memref<8x8xf32, #tpu.memory_space<vmem>>, %arg6: memref<8x8xf32, #tpu.memory_space<vmem>>, %arg7: memref<8x8xf32, #tpu.memory_space<vmem>>, %arg8: memref<1x8x8xbf16, #tpu.memory_space<vmem>>) attributes {dimension_semantics = [#tpu.dimension_semantics<parallel>], iteration_bounds = array<i64: 8>, scalar_prefetch = 0 : i64, scratch_operands = 0 : i64, tpu.core_type = #tpu.core_type<tc>, window_params = [{transform_indices = @transform_0, window_bounds = array<i64: 1, 8, 8>}, {transform_indices = @transform_1, window_bounds = array<i64: 1, 8, 8>}, {transform_indices = @transform_2, window_bounds = array<i64: 1, 8, 8>}, {pipeline_mode = #tpu.pipeline_mode<synchronous>, transform_indices = @transform_3, window_bounds = array<i64: 8, 8>}, {pipeline_mode = #tpu.pipeline_mode<synchronous>, transform_indices = @transform_4, window_bounds = array<i64: 8, 8>}, {pipeline_mode = #tpu.pipeline_mode<synchronous>, transform_indices = @transform_5, window_bounds = array<i64: 8, 8>}, {pipeline_mode = #tpu.pipeline_mode<synchronous>, transform_indices = @transform_6, window_bounds = array<i64: 8, 8>}, {transform_indices = @transform_7, window_bounds = array<i64: 1, 8, 8>}]} {
    %c0 = arith.constant 0 : index
    %c0_0 = arith.constant 0 : index
    %c0_1 = arith.constant 0 : index
    %0 = vector.load %arg1[%c0, %c0_0, %c0_1] : memref<1x8x8xbf16, #tpu.memory_space<vmem>>, vector<1x8x8xbf16>
    %1 = arith.extf %0 : vector<1x8x8xbf16> to vector<1x8x8xf32>
    %c0_2 = arith.constant 0 : index
    %c0_3 = arith.constant 0 : index
    %c0_4 = arith.constant 0 : index
    %2 = vector.load %arg2[%c0_2, %c0_3, %c0_4] : memref<1x8x8xbf16, #tpu.memory_space<vmem>>, vector<1x8x8xbf16>
    %3 = arith.extf %2 : vector<1x8x8xbf16> to vector<1x8x8xf32>
    %c0_5 = arith.constant 0 : index
    %c0_6 = arith.constant 0 : index
    %c0_7 = arith.constant 0 : index
    %4 = vector.load %arg3[%c0_5, %c0_6, %c0_7] : memref<1x8x8xbf16, #tpu.memory_space<vmem>>, vector<1x8x8xbf16>
    %c0_8 = arith.constant 0 : index
    %c0_9 = arith.constant 0 : index
    %5 = vector.load %arg4[%c0_8, %c0_9] : memref<8x8xf32, #tpu.memory_space<vmem>>, vector<8x8xf32>
    %c0_10 = arith.constant 0 : index
    %c0_11 = arith.constant 0 : index
    %6 = vector.load %arg5[%c0_10, %c0_11] : memref<8x8xf32, #tpu.memory_space<vmem>>, vector<8x8xf32>
    %c0_12 = arith.constant 0 : index
    %c0_13 = arith.constant 0 : index
    %7 = vector.load %arg6[%c0_12, %c0_13] : memref<8x8xf32, #tpu.memory_space<vmem>>, vector<8x8xf32>
    %c0_14 = arith.constant 0 : index
    %c0_15 = arith.constant 0 : index
    %8 = vector.load %arg7[%c0_14, %c0_15] : memref<8x8xf32, #tpu.memory_space<vmem>>, vector<8x8xf32>
    %9 = vector.shape_cast %5 : vector<8x8xf32> to vector<1x8x8xf32>
    %10 = arith.mulf %1, %9 : vector<1x8x8xf32>
    %c4_i32 = arith.constant 4 : i32
    %11 = tpu.dynamic_rotate %1 by %c4_i32 dim 2 : vector<1x8x8xf32>, i32 -> vector<1x8x8xf32>
    %12 = tpu.iota {dimensions = array<i32: 2>} : vector<1x8x8xi32>
    %c4_i32_16 = arith.constant 4 : i32
    %13 = vector.broadcast %c4_i32_16 : i32 to vector<1x8x8xi32>
    %14 = arith.cmpi slt, %12, %13 : vector<1x8x8xi32>
    %cst = arith.constant 0.000000e+00 : f32
    %15 = vector.broadcast %cst : f32 to vector<1x8x8xf32>
    %16 = arith.subf %15, %11 : vector<1x8x8xf32>
    %17 = arith.select %14, %16, %11 : vector<1x8x8xi1>, vector<1x8x8xf32>
    %18 = vector.shape_cast %6 : vector<8x8xf32> to vector<1x8x8xf32>
    %19 = arith.mulf %17, %18 : vector<1x8x8xf32>
    %20 = arith.addf %10, %19 : vector<1x8x8xf32>
    %21 = vector.shape_cast %7 : vector<8x8xf32> to vector<1x8x8xf32>
    %22 = arith.mulf %3, %21 : vector<1x8x8xf32>
    %c4_i32_17 = arith.constant 4 : i32
    %23 = tpu.dynamic_rotate %3 by %c4_i32_17 dim 2 : vector<1x8x8xf32>, i32 -> vector<1x8x8xf32>
    %24 = tpu.iota {dimensions = array<i32: 2>} : vector<1x8x8xi32>
    %c4_i32_18 = arith.constant 4 : i32
    %25 = vector.broadcast %c4_i32_18 : i32 to vector<1x8x8xi32>
    %26 = arith.cmpi slt, %24, %25 : vector<1x8x8xi32>
    %cst_19 = arith.constant 0.000000e+00 : f32
    %27 = vector.broadcast %cst_19 : f32 to vector<1x8x8xf32>
    %28 = arith.subf %27, %23 : vector<1x8x8xf32>
    %29 = arith.select %26, %28, %23 : vector<1x8x8xi1>, vector<1x8x8xf32>
    %30 = vector.shape_cast %8 : vector<8x8xf32> to vector<1x8x8xf32>
    %31 = arith.mulf %29, %30 : vector<1x8x8xf32>
    %32 = arith.addf %22, %31 : vector<1x8x8xf32>
    %33 = arith.truncf %20 : vector<1x8x8xf32> to vector<1x8x8xbf16>
    %34 = arith.truncf %32 : vector<1x8x8xf32> to vector<1x8x8xbf16>
    "tpu.trace_start"() <{level = 10 : i32, message = "bqd,bkd->bqk"}> : () -> ()
    %cst_20 = arith.constant dense<0.000000e+00> : vector<1x8x8xf32>
    %35 = tpu.matmul %33, %34, %cst_20 {dimension_numbers = #tpu.dot_dimension_numbers<[2], [2], [1], [1], [0, 0, 0, 1, 1, 1], [0], [0]>} : vector<1x8x8xbf16>, vector<1x8x8xbf16>, vector<1x8x8xf32> -> vector<1x8x8xf32>
    "tpu.trace_stop"() : () -> ()
    %cst_21 = arith.constant 0.353553385 : f32
    %36 = vector.broadcast %cst_21 : f32 to vector<1x8x8xf32>
    %37 = arith.mulf %35, %36 : vector<1x8x8xf32>
    %38 = tpu.iota {dimensions = array<i32: 2>} : vector<1x8x8xi32>
    %39 = tpu.iota {dimensions = array<i32: 1>} : vector<1x8x8xi32>
    %c8_i32 = arith.constant 8 : i32
    %40 = vector.broadcast %c8_i32 : i32 to vector<1x8x8xi32>
    %41 = arith.cmpi slt, %38, %40 : vector<1x8x8xi32>
    %42 = arith.cmpi sgt, %38, %39 : vector<1x8x8xi32>
    %43 = arith.andi %41, %42 : vector<1x8x8xi1>
    %cst_22 = arith.constant -1.000000e+30 : f32
    %44 = vector.broadcast %cst_22 : f32 to vector<1x8x8xf32>
    %45 = arith.select %43, %44, %37 : vector<1x8x8xi1>, vector<1x8x8xf32>
    %cst_23 = arith.constant dense<0xFF800000> : vector<1x8xf32>
    %46 = vector.multi_reduction <maximumf>, %45, %cst_23 [2] : vector<1x8x8xf32> to vector<1x8xf32>
    %47 = vector.shape_cast %46 : vector<1x8xf32> to vector<1x8x1xf32>
    %48 = vector.broadcast %47 : vector<1x8x1xf32> to vector<1x8x8xf32>
    %49 = arith.subf %45, %48 : vector<1x8x8xf32>
    %50 = math.exp %49 : vector<1x8x8xf32>
    %cst_24 = arith.constant dense<0.000000e+00> : vector<1x8xf32>
    %51 = vector.multi_reduction <add>, %50, %cst_24 [2] : vector<1x8x8xf32> to vector<1x8xf32>
    %52 = vector.shape_cast %51 : vector<1x8xf32> to vector<1x8x1xf32>
    %53 = vector.broadcast %52 : vector<1x8x1xf32> to vector<1x8x8xf32>
    %54 = arith.divf %50, %53 : vector<1x8x8xf32>
    %55 = arith.truncf %54 : vector<1x8x8xf32> to vector<1x8x8xbf16>
    "tpu.trace_start"() <{level = 10 : i32, message = "bqk,bkd->bqd"}> : () -> ()
    %cst_25 = arith.constant dense<0.000000e+00> : vector<1x8x8xf32>
    %56 = tpu.matmul %55, %4, %cst_25 {dimension_numbers = #tpu.dot_dimension_numbers<[2], [1], [1], [2], [0, 0, 0, 1, 1, 2], [0], [0]>} : vector<1x8x8xbf16>, vector<1x8x8xbf16>, vector<1x8x8xf32> -> vector<1x8x8xf32>
    "tpu.trace_stop"() : () -> ()
    %57 = arith.truncf %56 : vector<1x8x8xf32> to vector<1x8x8xbf16>
    %c0_26 = arith.constant 0 : index
    %c0_27 = arith.constant 0 : index
    %c0_28 = arith.constant 0 : index
    %58 = vector.load %arg8[%c0_26, %c0_27, %c0_28] : memref<1x8x8xbf16, #tpu.memory_space<vmem>>, vector<1x8x8xbf16>
    tpu.vector_store %arg8[%c0_26, %c0_27, %c0_28], %57 {strides = array<i32>} : memref<1x8x8xbf16, #tpu.memory_space<vmem>>, vector<1x8x8xbf16>,
    return
  }
  func.func @transform_0(%arg0: i32) -> (i32, i32, i32) {
    %c0_i32 = arith.constant 0 : i32
    %c0_i32_0 = arith.constant 0 : i32
    %c0_i32_1 = arith.constant 0 : i32
    return %arg0, %c0_i32, %c0_i32_0 : i32, i32, i32
  }
  func.func @transform_1(%arg0: i32) -> (i32, i32, i32) {
    %c0_i32 = arith.constant 0 : i32
    %c0_i32_0 = arith.constant 0 : i32
    %c0_i32_1 = arith.constant 0 : i32
    return %arg0, %c0_i32, %c0_i32_0 : i32, i32, i32
  }
  func.func @transform_2(%arg0: i32) -> (i32, i32, i32) {
    %c0_i32 = arith.constant 0 : i32
    %c0_i32_0 = arith.constant 0 : i32
    %c0_i32_1 = arith.constant 0 : i32
    return %arg0, %c0_i32, %c0_i32_0 : i32, i32, i32
  }
  func.func @transform_3(%arg0: i32) -> (i32, i32) {
    %c0_i32 = arith.constant 0 : i32
    %c0_i32_0 = arith.constant 0 : i32
    %c0_i32_1 = arith.constant 0 : i32
    return %c0_i32, %c0_i32_0 : i32, i32
  }
  func.func @transform_4(%arg0: i32) -> (i32, i32) {
    %c0_i32 = arith.constant 0 : i32
    %c0_i32_0 = arith.constant 0 : i32
    %c0_i32_1 = arith.constant 0 : i32
    return %c0_i32, %c0_i32_0 : i32, i32
  }
  func.func @transform_5(%arg0: i32) -> (i32, i32) {
    %c0_i32 = arith.constant 0 : i32
    %c0_i32_0 = arith.constant 0 : i32
    %c0_i32_1 = arith.constant 0 : i32
    return %c0_i32, %c0_i32_0 : i32, i32
  }
  func.func @transform_6(%arg0: i32) -> (i32, i32) {
    %c0_i32 = arith.constant 0 : i32
    %c0_i32_0 = arith.constant 0 : i32
    %c0_i32_1 = arith.constant 0 : i32
    return %c0_i32, %c0_i32_0 : i32, i32
  }
  func.func @transform_7(%arg0: i32) -> (i32, i32, i32) {
    %c0_i32 = arith.constant 0 : i32
    %c0_i32_0 = arith.constant 0 : i32
    %c0_i32_1 = arith.constant 0 : i32
    return %arg0, %c0_i32, %c0_i32_0 : i32, i32, i32
  }
}

module attributes {stable_mosaic.version = 11 : i64} {
  func.func @kernel(%arg0: i32, %arg1: memref<16x32xbf16, #tpu.memory_space<vmem>>, %arg2: memref<32x32xbf16, #tpu.memory_space<vmem>>, %arg3: memref<1x32xf32, #tpu.memory_space<vmem>>, %arg4: memref<16x32xf32, #tpu.memory_space<vmem>>, %arg5: memref<16x32xf32, #tpu.memory_space<vmem>>) attributes {dimension_semantics = [#tpu.dimension_semantics<arbitrary>], iteration_bounds = array<i64: 1>, scalar_prefetch = 0 : i64, scratch_operands = 0 : i64, tpu.core_type = #tpu.core_type<tc>, window_params = [{pipeline_mode = #tpu.pipeline_mode<synchronous>, transform_indices = @transform_0, window_bounds = array<i64: 16, 32>}, {pipeline_mode = #tpu.pipeline_mode<synchronous>, transform_indices = @transform_1, window_bounds = array<i64: 32, 32>}, {pipeline_mode = #tpu.pipeline_mode<synchronous>, transform_indices = @transform_2, window_bounds = array<i64: 1, 32>}, {pipeline_mode = #tpu.pipeline_mode<synchronous>, transform_indices = @transform_3, window_bounds = array<i64: 16, 32>}, {pipeline_mode = #tpu.pipeline_mode<synchronous>, transform_indices = @transform_4, window_bounds = array<i64: 16, 32>}]} {
    %c0 = arith.constant 0 : index
    %c0_0 = arith.constant 0 : index
    %0 = vector.load %arg1[%c0, %c0_0] : memref<16x32xbf16, #tpu.memory_space<vmem>>, vector<16x32xbf16>
    %1 = arith.extf %0 : vector<16x32xbf16> to vector<16x32xf32>
    %c0_1 = arith.constant 0 : index
    %c0_2 = arith.constant 0 : index
    %2 = vector.load %arg2[%c0_1, %c0_2] : memref<32x32xbf16, #tpu.memory_space<vmem>>, vector<32x32xbf16>
    %3 = arith.truncf %1 : vector<16x32xf32> to vector<16x32xbf16>
    %cst = arith.constant dense<0.000000e+00> : vector<16x32xf32>
    %4 = tpu.matmul %3, %2, %cst {dimension_numbers = #tpu.dot_dimension_numbers<[1], [0], [0], [1], [0, 0, 1, 1], [], []>} : vector<16x32xbf16>, vector<32x32xbf16>, vector<16x32xf32> -> vector<16x32xf32>
    %c0_3 = arith.constant 0 : index
    %c0_4 = arith.constant 0 : index
    %5 = vector.load %arg3[%c0_3, %c0_4] : memref<1x32xf32, #tpu.memory_space<vmem>>, vector<1x32xf32>
    %6 = vector.broadcast %5 : vector<1x32xf32> to vector<16x32xf32>
    %7 = arith.addf %4, %6 : vector<16x32xf32>
    %c0_5 = arith.constant 0 : index
    %c0_6 = arith.constant 0 : index
    %8 = vector.load %arg4[%c0_5, %c0_6] : memref<16x32xf32, #tpu.memory_space<vmem>>, vector<16x32xf32>
    %9 = arith.addf %7, %8 : vector<16x32xf32>
    %c0_7 = arith.constant 0 : index
    %c0_8 = arith.constant 0 : index
    %10 = vector.load %arg5[%c0_7, %c0_8] : memref<16x32xf32, #tpu.memory_space<vmem>>, vector<16x32xf32>
    tpu.vector_store %arg5[%c0_7, %c0_8], %9 {strides = array<i32>} : memref<16x32xf32, #tpu.memory_space<vmem>>, vector<16x32xf32>,
    return
  }
  func.func @transform_0(%arg0: i32) -> (i32, i32) {
    %c0_i32 = arith.constant 0 : i32
    %c0_i32_0 = arith.constant 0 : i32
    %c0_i32_1 = arith.constant 0 : i32
    return %c0_i32, %c0_i32_0 : i32, i32
  }
  func.func @transform_1(%arg0: i32) -> (i32, i32) {
    %c0_i32 = arith.constant 0 : i32
    %c0_i32_0 = arith.constant 0 : i32
    %c0_i32_1 = arith.constant 0 : i32
    return %c0_i32, %c0_i32_0 : i32, i32
  }
  func.func @transform_2(%arg0: i32) -> (i32, i32) {
    %c0_i32 = arith.constant 0 : i32
    %c0_i32_0 = arith.constant 0 : i32
    %c0_i32_1 = arith.constant 0 : i32
    return %c0_i32, %c0_i32_0 : i32, i32
  }
  func.func @transform_3(%arg0: i32) -> (i32, i32) {
    %c0_i32 = arith.constant 0 : i32
    %c0_i32_0 = arith.constant 0 : i32
    %c0_i32_1 = arith.constant 0 : i32
    return %c0_i32, %c0_i32_0 : i32, i32
  }
  func.func @transform_4(%arg0: i32) -> (i32, i32) {
    %c0_i32 = arith.constant 0 : i32
    %c0_i32_0 = arith.constant 0 : i32
    %c0_i32_1 = arith.constant 0 : i32
    return %c0_i32, %c0_i32_0 : i32, i32
  }
}

module attributes {stable_mosaic.version = 11 : i64} {
  func.func @_llama_mlp_kernel(%arg0: i32, %arg1: memref<16x32xf32, #tpu.memory_space<vmem>>, %arg2: memref<1x32xf32, #tpu.memory_space<vmem>>, %arg3: memref<32x64xbf16, #tpu.memory_space<vmem>>, %arg4: memref<32x64xbf16, #tpu.memory_space<vmem>>, %arg5: memref<64x32xbf16, #tpu.memory_space<vmem>>, %arg6: memref<16x32xf32, #tpu.memory_space<vmem>>) attributes {dimension_semantics = [#tpu.dimension_semantics<arbitrary>], iteration_bounds = array<i64: 1>, scalar_prefetch = 0 : i64, scratch_operands = 0 : i64, tpu.core_type = #tpu.core_type<tc>, window_params = [{pipeline_mode = #tpu.pipeline_mode<synchronous>, transform_indices = @transform_0, window_bounds = array<i64: 16, 32>}, {pipeline_mode = #tpu.pipeline_mode<synchronous>, transform_indices = @transform_1, window_bounds = array<i64: 1, 32>}, {pipeline_mode = #tpu.pipeline_mode<synchronous>, transform_indices = @transform_2, window_bounds = array<i64: 32, 64>}, {pipeline_mode = #tpu.pipeline_mode<synchronous>, transform_indices = @transform_3, window_bounds = array<i64: 32, 64>}, {pipeline_mode = #tpu.pipeline_mode<synchronous>, transform_indices = @transform_4, window_bounds = array<i64: 64, 32>}, {pipeline_mode = #tpu.pipeline_mode<synchronous>, transform_indices = @transform_5, window_bounds = array<i64: 16, 32>}]} {
    %c0 = arith.constant 0 : index
    %c0_0 = arith.constant 0 : index
    %0 = vector.load %arg1[%c0, %c0_0] : memref<16x32xf32, #tpu.memory_space<vmem>>, vector<16x32xf32>
    %1 = arith.mulf %0, %0 : vector<16x32xf32>
    %cst = arith.constant dense<0.000000e+00> : vector<16xf32>
    %2 = vector.multi_reduction <add>, %1, %cst [1] : vector<16x32xf32> to vector<16xf32>
    %3 = vector.shape_cast %2 : vector<16xf32> to vector<16x1xf32>
    %cst_1 = arith.constant 3.200000e+01 : f32
    %4 = vector.broadcast %cst_1 : f32 to vector<16x1xf32>
    %5 = arith.divf %3, %4 : vector<16x1xf32>
    %cst_2 = arith.constant 9.99999997E-7 : f32
    %6 = vector.broadcast %cst_2 : f32 to vector<16x1xf32>
    %7 = arith.addf %5, %6 : vector<16x1xf32>
    %8 = math.rsqrt %7 : vector<16x1xf32>
    %9 = vector.broadcast %8 : vector<16x1xf32> to vector<16x32xf32>
    %10 = arith.mulf %0, %9 : vector<16x32xf32>
    %c0_3 = arith.constant 0 : index
    %c0_4 = arith.constant 0 : index
    %11 = vector.load %arg2[%c0_3, %c0_4] : memref<1x32xf32, #tpu.memory_space<vmem>>, vector<1x32xf32>
    %12 = vector.broadcast %11 : vector<1x32xf32> to vector<16x32xf32>
    %13 = arith.mulf %10, %12 : vector<16x32xf32>
    %14 = arith.truncf %13 : vector<16x32xf32> to vector<16x32xbf16>
    %c0_5 = arith.constant 0 : index
    %c0_6 = arith.constant 0 : index
    %15 = vector.load %arg3[%c0_5, %c0_6] : memref<32x64xbf16, #tpu.memory_space<vmem>>, vector<32x64xbf16>
    %cst_7 = arith.constant dense<0.000000e+00> : vector<16x64xf32>
    %16 = tpu.matmul %14, %15, %cst_7 {dimension_numbers = #tpu.dot_dimension_numbers<[1], [0], [0], [1], [0, 0, 1, 1], [], []>} : vector<16x32xbf16>, vector<32x64xbf16>, vector<16x64xf32> -> vector<16x64xf32>
    %c0_8 = arith.constant 0 : index
    %c0_9 = arith.constant 0 : index
    %17 = vector.load %arg4[%c0_8, %c0_9] : memref<32x64xbf16, #tpu.memory_space<vmem>>, vector<32x64xbf16>
    %cst_10 = arith.constant dense<0.000000e+00> : vector<16x64xf32>
    %18 = tpu.matmul %14, %17, %cst_10 {dimension_numbers = #tpu.dot_dimension_numbers<[1], [0], [0], [1], [0, 0, 1, 1], [], []>} : vector<16x32xbf16>, vector<32x64xbf16>, vector<16x64xf32> -> vector<16x64xf32>
    %19 = arith.negf %16 : vector<16x64xf32>
    %20 = math.exp %19 : vector<16x64xf32>
    %cst_11 = arith.constant 1.000000e+00 : f32
    %21 = vector.broadcast %cst_11 : f32 to vector<16x64xf32>
    %22 = arith.addf %21, %20 : vector<16x64xf32>
    %23 = arith.divf %21, %22 : vector<16x64xf32>
    %24 = arith.mulf %16, %23 : vector<16x64xf32>
    %25 = arith.mulf %24, %18 : vector<16x64xf32>
    %26 = arith.truncf %25 : vector<16x64xf32> to vector<16x64xbf16>
    %c0_12 = arith.constant 0 : index
    %c0_13 = arith.constant 0 : index
    %27 = vector.load %arg5[%c0_12, %c0_13] : memref<64x32xbf16, #tpu.memory_space<vmem>>, vector<64x32xbf16>
    %cst_14 = arith.constant dense<0.000000e+00> : vector<16x32xf32>
    %28 = tpu.matmul %26, %27, %cst_14 {dimension_numbers = #tpu.dot_dimension_numbers<[1], [0], [0], [1], [0, 0, 1, 1], [], []>} : vector<16x64xbf16>, vector<64x32xbf16>, vector<16x32xf32> -> vector<16x32xf32>
    %29 = arith.addf %0, %28 : vector<16x32xf32>
    %c0_15 = arith.constant 0 : index
    %c0_16 = arith.constant 0 : index
    %30 = vector.load %arg6[%c0_15, %c0_16] : memref<16x32xf32, #tpu.memory_space<vmem>>, vector<16x32xf32>
    tpu.vector_store %arg6[%c0_15, %c0_16], %29 {strides = array<i32>} : memref<16x32xf32, #tpu.memory_space<vmem>>, vector<16x32xf32>,
    return
  }
  func.func @transform_0(%arg0: i32) -> (i32, i32) {
    %c0_i32 = arith.constant 0 : i32
    %c0_i32_0 = arith.constant 0 : i32
    %c0_i32_1 = arith.constant 0 : i32
    return %c0_i32, %c0_i32_0 : i32, i32
  }
  func.func @transform_1(%arg0: i32) -> (i32, i32) {
    %c0_i32 = arith.constant 0 : i32
    %c0_i32_0 = arith.constant 0 : i32
    %c0_i32_1 = arith.constant 0 : i32
    return %c0_i32, %c0_i32_0 : i32, i32
  }
  func.func @transform_2(%arg0: i32) -> (i32, i32) {
    %c0_i32 = arith.constant 0 : i32
    %c0_i32_0 = arith.constant 0 : i32
    %c0_i32_1 = arith.constant 0 : i32
    return %c0_i32, %c0_i32_0 : i32, i32
  }
  func.func @transform_3(%arg0: i32) -> (i32, i32) {
    %c0_i32 = arith.constant 0 : i32
    %c0_i32_0 = arith.constant 0 : i32
    %c0_i32_1 = arith.constant 0 : i32
    return %c0_i32, %c0_i32_0 : i32, i32
  }
  func.func @transform_4(%arg0: i32) -> (i32, i32) {
    %c0_i32 = arith.constant 0 : i32
    %c0_i32_0 = arith.constant 0 : i32
    %c0_i32_1 = arith.constant 0 : i32
    return %c0_i32, %c0_i32_0 : i32, i32
  }
  func.func @transform_5(%arg0: i32) -> (i32, i32) {
    %c0_i32 = arith.constant 0 : i32
    %c0_i32_0 = arith.constant 0 : i32
    %c0_i32_1 = arith.constant 0 : i32
    return %c0_i32, %c0_i32_0 : i32, i32
  }
}

module attributes {stable_mosaic.version = 11 : i64} {
  func.func @kernel(%arg0: i32, %arg1: memref<8x192xf32, #tpu.memory_space<vmem>>, %arg2: memref<192x32xbf16, #tpu.memory_space<vmem>>, %arg3: memref<8x32xf32, #tpu.memory_space<vmem>>) attributes {dimension_semantics = [#tpu.dimension_semantics<arbitrary>], iteration_bounds = array<i64: 1>, scalar_prefetch = 0 : i64, scratch_operands = 0 : i64, tpu.core_type = #tpu.core_type<tc>, window_params = [{pipeline_mode = #tpu.pipeline_mode<synchronous>, transform_indices = @transform_0, window_bounds = array<i64: 8, 192>}, {pipeline_mode = #tpu.pipeline_mode<synchronous>, transform_indices = @transform_1, window_bounds = array<i64: 192, 32>}, {pipeline_mode = #tpu.pipeline_mode<synchronous>, transform_indices = @transform_2, window_bounds = array<i64: 8, 32>}]} {
    %c0 = arith.constant 0 : index
    %c0_0 = arith.constant 0 : index
    %0 = vector.load %arg1[%c0, %c0_0] : memref<8x192xf32, #tpu.memory_space<vmem>>, vector<8x192xf32>
    %c0_1 = arith.constant 0 : index
    %c0_2 = arith.constant 0 : index
    %1 = vector.load %arg2[%c0_1, %c0_2] : memref<192x32xbf16, #tpu.memory_space<vmem>>, vector<192x32xbf16>
    %2 = arith.truncf %0 : vector<8x192xf32> to vector<8x192xbf16>
    %cst = arith.constant dense<0.000000e+00> : vector<8x32xf32>
    %3 = tpu.matmul %2, %1, %cst {dimension_numbers = #tpu.dot_dimension_numbers<[1], [0], [0], [1], [0, 0, 1, 1], [], []>} : vector<8x192xbf16>, vector<192x32xbf16>, vector<8x32xf32> -> vector<8x32xf32>
    %c0_3 = arith.constant 0 : index
    %c0_4 = arith.constant 0 : index
    %4 = vector.load %arg3[%c0_3, %c0_4] : memref<8x32xf32, #tpu.memory_space<vmem>>, vector<8x32xf32>
    tpu.vector_store %arg3[%c0_3, %c0_4], %3 {strides = array<i32>} : memref<8x32xf32, #tpu.memory_space<vmem>>, vector<8x32xf32>,
    return
  }
  func.func @transform_0(%arg0: i32) -> (i32, i32) {
    %c0_i32 = arith.constant 0 : i32
    %c0_i32_0 = arith.constant 0 : i32
    %c0_i32_1 = arith.constant 0 : i32
    return %c0_i32, %c0_i32_0 : i32, i32
  }
  func.func @transform_1(%arg0: i32) -> (i32, i32) {
    %c0_i32 = arith.constant 0 : i32
    %c0_i32_0 = arith.constant 0 : i32
    %c0_i32_1 = arith.constant 0 : i32
    return %c0_i32, %c0_i32_0 : i32, i32
  }
  func.func @transform_2(%arg0: i32) -> (i32, i32) {
    %c0_i32 = arith.constant 0 : i32
    %c0_i32_0 = arith.constant 0 : i32
    %c0_i32_1 = arith.constant 0 : i32
    return %c0_i32, %c0_i32_0 : i32, i32
  }
}

module attributes {stable_mosaic.version = 11 : i64} {
  func.func @_add_ln_kernel(%arg0: i32, %arg1: memref<2x5x32xf32, #tpu.memory_space<vmem>>, %arg2: memref<5x32xf32, #tpu.memory_space<vmem>>, %arg3: memref<1x32xf32, #tpu.memory_space<vmem>>, %arg4: memref<1x32xf32, #tpu.memory_space<vmem>>, %arg5: memref<2x5x32xf32, #tpu.memory_space<vmem>>) attributes {dimension_semantics = [#tpu.dimension_semantics<arbitrary>], iteration_bounds = array<i64: 1>, scalar_prefetch = 0 : i64, scratch_operands = 0 : i64, tpu.core_type = #tpu.core_type<tc>, window_params = [{pipeline_mode = #tpu.pipeline_mode<synchronous>, transform_indices = @transform_0, window_bounds = array<i64: 2, 5, 32>}, {pipeline_mode = #tpu.pipeline_mode<synchronous>, transform_indices = @transform_1, window_bounds = array<i64: 5, 32>}, {pipeline_mode = #tpu.pipeline_mode<synchronous>, transform_indices = @transform_2, window_bounds = array<i64: 1, 32>}, {pipeline_mode = #tpu.pipeline_mode<synchronous>, transform_indices = @transform_3, window_bounds = array<i64: 1, 32>}, {pipeline_mode = #tpu.pipeline_mode<synchronous>, transform_indices = @transform_4, window_bounds = array<i64: 2, 5, 32>}]} {
    %c0 = arith.constant 0 : index
    %c0_0 = arith.constant 0 : index
    %c0_1 = arith.constant 0 : index
    %0 = vector.load %arg1[%c0, %c0_0, %c0_1] : memref<2x5x32xf32, #tpu.memory_space<vmem>>, vector<2x5x32xf32>
    %c0_2 = arith.constant 0 : index
    %c0_3 = arith.constant 0 : index
    %1 = vector.load %arg2[%c0_2, %c0_3] : memref<5x32xf32, #tpu.memory_space<vmem>>, vector<5x32xf32>
    %2 = vector.shape_cast %1 : vector<5x32xf32> to vector<1x5x32xf32>
    %3 = vector.broadcast %2 : vector<1x5x32xf32> to vector<2x5x32xf32>
    %4 = arith.addf %0, %3 : vector<2x5x32xf32>
    %c0_4 = arith.constant 0 : index
    %c0_5 = arith.constant 0 : index
    %5 = vector.load %arg3[%c0_4, %c0_5] : memref<1x32xf32, #tpu.memory_space<vmem>>, vector<1x32xf32>
    %c0_6 = arith.constant 0 : index
    %c0_7 = arith.constant 0 : index
    %6 = vector.load %arg4[%c0_6, %c0_7] : memref<1x32xf32, #tpu.memory_space<vmem>>, vector<1x32xf32>
    %cst = arith.constant dense<0.000000e+00> : vector<2x5xf32>
    %7 = vector.multi_reduction <add>, %4, %cst [2] : vector<2x5x32xf32> to vector<2x5xf32>
    %8 = vector.shape_cast %7 : vector<2x5xf32> to vector<2x5x1xf32>
    %cst_8 = arith.constant 3.200000e+01 : f32
    %9 = vector.broadcast %cst_8 : f32 to vector<2x5x1xf32>
    %10 = arith.divf %8, %9 : vector<2x5x1xf32>
    %11 = vector.broadcast %10 : vector<2x5x1xf32> to vector<2x5x32xf32>
    %12 = arith.subf %4, %11 : vector<2x5x32xf32>
    %13 = arith.mulf %12, %12 : vector<2x5x32xf32>
    %cst_9 = arith.constant dense<0.000000e+00> : vector<2x5xf32>
    %14 = vector.multi_reduction <add>, %13, %cst_9 [2] : vector<2x5x32xf32> to vector<2x5xf32>
    %15 = vector.shape_cast %14 : vector<2x5xf32> to vector<2x5x1xf32>
    %cst_10 = arith.constant 3.200000e+01 : f32
    %16 = vector.broadcast %cst_10 : f32 to vector<2x5x1xf32>
    %17 = arith.divf %15, %16 : vector<2x5x1xf32>
    %18 = vector.broadcast %10 : vector<2x5x1xf32> to vector<2x5x32xf32>
    %19 = arith.subf %4, %18 : vector<2x5x32xf32>
    %cst_11 = arith.constant 9.99999974E-6 : f32
    %20 = vector.broadcast %cst_11 : f32 to vector<2x5x1xf32>
    %21 = arith.addf %17, %20 : vector<2x5x1xf32>
    %22 = math.rsqrt %21 : vector<2x5x1xf32>
    %23 = vector.broadcast %22 : vector<2x5x1xf32> to vector<2x5x32xf32>
    %24 = arith.mulf %19, %23 : vector<2x5x32xf32>
    %25 = vector.shape_cast %5 : vector<1x32xf32> to vector<1x1x32xf32>
    %26 = vector.broadcast %25 : vector<1x1x32xf32> to vector<2x5x32xf32>
    %27 = arith.mulf %24, %26 : vector<2x5x32xf32>
    %28 = vector.shape_cast %6 : vector<1x32xf32> to vector<1x1x32xf32>
    %29 = vector.broadcast %28 : vector<1x1x32xf32> to vector<2x5x32xf32>
    %30 = arith.addf %27, %29 : vector<2x5x32xf32>
    %c0_12 = arith.constant 0 : index
    %c0_13 = arith.constant 0 : index
    %c0_14 = arith.constant 0 : index
    %31 = vector.load %arg5[%c0_12, %c0_13, %c0_14] : memref<2x5x32xf32, #tpu.memory_space<vmem>>, vector<2x5x32xf32>
    tpu.vector_store %arg5[%c0_12, %c0_13, %c0_14], %30 {strides = array<i32>} : memref<2x5x32xf32, #tpu.memory_space<vmem>>, vector<2x5x32xf32>,
    return
  }
  func.func @transform_0(%arg0: i32) -> (i32, i32, i32) {
    %c0_i32 = arith.constant 0 : i32
    %c0_i32_0 = arith.constant 0 : i32
    %c0_i32_1 = arith.constant 0 : i32
    %c0_i32_2 = arith.constant 0 : i32
    return %c0_i32, %c0_i32_0, %c0_i32_1 : i32, i32, i32
  }
  func.func @transform_1(%arg0: i32) -> (i32, i32) {
    %c0_i32 = arith.constant 0 : i32
    %c0_i32_0 = arith.constant 0 : i32
    %c0_i32_1 = arith.constant 0 : i32
    return %c0_i32, %c0_i32_0 : i32, i32
  }
  func.func @transform_2(%arg0: i32) -> (i32, i32) {
    %c0_i32 = arith.constant 0 : i32
    %c0_i32_0 = arith.constant 0 : i32
    %c0_i32_1 = arith.constant 0 : i32
    return %c0_i32, %c0_i32_0 : i32, i32
  }
  func.func @transform_3(%arg0: i32) -> (i32, i32) {
    %c0_i32 = arith.constant 0 : i32
    %c0_i32_0 = arith.constant 0 : i32
    %c0_i32_1 = arith.constant 0 : i32
    return %c0_i32, %c0_i32_0 : i32, i32
  }
  func.func @transform_4(%arg0: i32) -> (i32, i32, i32) {
    %c0_i32 = arith.constant 0 : i32
    %c0_i32_0 = arith.constant 0 : i32
    %c0_i32_1 = arith.constant 0 : i32
    %c0_i32_2 = arith.constant 0 : i32
    return %c0_i32, %c0_i32_0, %c0_i32_1 : i32, i32, i32
  }
}

module attributes {stable_mosaic.version = 11 : i64} {
  func.func @kernel(%arg0: i32, %arg1: memref<10x32xf32, #tpu.memory_space<vmem>>, %arg2: memref<1x32xf32, #tpu.memory_space<vmem>>, %arg3: memref<1x32xf32, #tpu.memory_space<vmem>>, %arg4: memref<32x96xbf16, #tpu.memory_space<vmem>>, %arg5: memref<1x96xf32, #tpu.memory_space<vmem>>, %arg6: memref<10x96xbf16, #tpu.memory_space<vmem>>) attributes {dimension_semantics = [#tpu.dimension_semantics<arbitrary>], iteration_bounds = array<i64: 1>, scalar_prefetch = 0 : i64, scratch_operands = 0 : i64, tpu.core_type = #tpu.core_type<tc>, window_params = [{pipeline_mode = #tpu.pipeline_mode<synchronous>, transform_indices = @transform_0, window_bounds = array<i64: 10, 32>}, {pipeline_mode = #tpu.pipeline_mode<synchronous>, transform_indices = @transform_1, window_bounds = array<i64: 1, 32>}, {pipeline_mode = #tpu.pipeline_mode<synchronous>, transform_indices = @transform_2, window_bounds = array<i64: 1, 32>}, {pipeline_mode = #tpu.pipeline_mode<synchronous>, transform_indices = @transform_3, window_bounds = array<i64: 32, 96>}, {pipeline_mode = #tpu.pipeline_mode<synchronous>, transform_indices = @transform_4, window_bounds = array<i64: 1, 96>}, {pipeline_mode = #tpu.pipeline_mode<synchronous>, transform_indices = @transform_5, window_bounds = array<i64: 10, 96>}]} {
    %c0 = arith.constant 0 : index
    %c0_0 = arith.constant 0 : index
    %0 = vector.load %arg1[%c0, %c0_0] : memref<10x32xf32, #tpu.memory_space<vmem>>, vector<10x32xf32>
    %c0_1 = arith.constant 0 : index
    %c0_2 = arith.constant 0 : index
    %1 = vector.load %arg2[%c0_1, %c0_2] : memref<1x32xf32, #tpu.memory_space<vmem>>, vector<1x32xf32>
    %c0_3 = arith.constant 0 : index
    %c0_4 = arith.constant 0 : index
    %2 = vector.load %arg3[%c0_3, %c0_4] : memref<1x32xf32, #tpu.memory_space<vmem>>, vector<1x32xf32>
    %cst = arith.constant dense<0.000000e+00> : vector<10xf32>
    %3 = vector.multi_reduction <add>, %0, %cst [1] : vector<10x32xf32> to vector<10xf32>
    %4 = vector.shape_cast %3 : vector<10xf32> to vector<10x1xf32>
    %cst_5 = arith.constant 3.200000e+01 : f32
    %5 = vector.broadcast %cst_5 : f32 to vector<10x1xf32>
    %6 = arith.divf %4, %5 : vector<10x1xf32>
    %7 = vector.broadcast %6 : vector<10x1xf32> to vector<10x32xf32>
    %8 = arith.subf %0, %7 : vector<10x32xf32>
    %9 = arith.mulf %8, %8 : vector<10x32xf32>
    %cst_6 = arith.constant dense<0.000000e+00> : vector<10xf32>
    %10 = vector.multi_reduction <add>, %9, %cst_6 [1] : vector<10x32xf32> to vector<10xf32>
    %11 = vector.shape_cast %10 : vector<10xf32> to vector<10x1xf32>
    %cst_7 = arith.constant 3.200000e+01 : f32
    %12 = vector.broadcast %cst_7 : f32 to vector<10x1xf32>
    %13 = arith.divf %11, %12 : vector<10x1xf32>
    %14 = vector.broadcast %6 : vector<10x1xf32> to vector<10x32xf32>
    %15 = arith.subf %0, %14 : vector<10x32xf32>
    %cst_8 = arith.constant 9.99999974E-6 : f32
    %16 = vector.broadcast %cst_8 : f32 to vector<10x1xf32>
    %17 = arith.addf %13, %16 : vector<10x1xf32>
    %18 = math.rsqrt %17 : vector<10x1xf32>
    %19 = vector.broadcast %18 : vector<10x1xf32> to vector<10x32xf32>
    %20 = arith.mulf %15, %19 : vector<10x32xf32>
    %21 = vector.broadcast %1 : vector<1x32xf32> to vector<10x32xf32>
    %22 = arith.mulf %20, %21 : vector<10x32xf32>
    %23 = vector.broadcast %2 : vector<1x32xf32> to vector<10x32xf32>
    %24 = arith.addf %22, %23 : vector<10x32xf32>
    %c0_9 = arith.constant 0 : index
    %c0_10 = arith.constant 0 : index
    %25 = vector.load %arg4[%c0_9, %c0_10] : memref<32x96xbf16, #tpu.memory_space<vmem>>, vector<32x96xbf16>
    %26 = arith.truncf %24 : vector<10x32xf32> to vector<10x32xbf16>
    %cst_11 = arith.constant dense<0.000000e+00> : vector<10x96xf32>
    %27 = tpu.matmul %26, %25, %cst_11 {dimension_numbers = #tpu.dot_dimension_numbers<[1], [0], [0], [1], [0, 0, 1, 1], [], []>} : vector<10x32xbf16>, vector<32x96xbf16>, vector<10x96xf32> -> vector<10x96xf32>
    %c0_12 = arith.constant 0 : index
    %c0_13 = arith.constant 0 : index
    %28 = vector.load %arg5[%c0_12, %c0_13] : memref<1x96xf32, #tpu.memory_space<vmem>>, vector<1x96xf32>
    %29 = vector.broadcast %28 : vector<1x96xf32> to vector<10x96xf32>
    %30 = arith.addf %27, %29 : vector<10x96xf32>
    %31 = arith.truncf %30 : vector<10x96xf32> to vector<10x96xbf16>
    %c0_14 = arith.constant 0 : index
    %c0_15 = arith.constant 0 : index
    %32 = vector.load %arg6[%c0_14, %c0_15] : memref<10x96xbf16, #tpu.memory_space<vmem>>, vector<10x96xbf16>
    tpu.vector_store %arg6[%c0_14, %c0_15], %31 {strides = array<i32>} : memref<10x96xbf16, #tpu.memory_space<vmem>>, vector<10x96xbf16>,
    return
  }
  func.func @transform_0(%arg0: i32) -> (i32, i32) {
    %c0_i32 = arith.constant 0 : i32
    %c0_i32_0 = arith.constant 0 : i32
    %c0_i32_1 = arith.constant 0 : i32
    return %c0_i32, %c0_i32_0 : i32, i32
  }
  func.func @transform_1(%arg0: i32) -> (i32, i32) {
    %c0_i32 = arith.constant 0 : i32
    %c0_i32_0 = arith.constant 0 : i32
    %c0_i32_1 = arith.constant 0 : i32
    return %c0_i32, %c0_i32_0 : i32, i32
  }
  func.func @transform_2(%arg0: i32) -> (i32, i32) {
    %c0_i32 = arith.constant 0 : i32
    %c0_i32_0 = arith.constant 0 : i32
    %c0_i32_1 = arith.constant 0 : i32
    return %c0_i32, %c0_i32_0 : i32, i32
  }
  func.func @transform_3(%arg0: i32) -> (i32, i32) {
    %c0_i32 = arith.constant 0 : i32
    %c0_i32_0 = arith.constant 0 : i32
    %c0_i32_1 = arith.constant 0 : i32
    return %c0_i32, %c0_i32_0 : i32, i32
  }
  func.func @transform_4(%arg0: i32) -> (i32, i32) {
    %c0_i32 = arith.constant 0 : i32
    %c0_i32_0 = arith.constant 0 : i32
    %c0_i32_1 = arith.constant 0 : i32
    return %c0_i32, %c0_i32_0 : i32, i32
  }
  func.func @transform_5(%arg0: i32) -> (i32, i32) {
    %c0_i32 = arith.constant 0 : i32
    %c0_i32_0 = arith.constant 0 : i32
    %c0_i32_1 = arith.constant 0 : i32
    return %c0_i32, %c0_i32_0 : i32, i32
  }
}

module attributes {stable_mosaic.version = 11 : i64} {
  func.func @kernel(%arg0: i32, %arg1: memref<1x5x8xbf16, #tpu.memory_space<vmem>>, %arg2: memref<1x5x8xbf16, #tpu.memory_space<vmem>>, %arg3: memref<1x5x8xbf16, #tpu.memory_space<vmem>>, %arg4: memref<1x5x8xbf16, #tpu.memory_space<vmem>>) attributes {dimension_semantics = [#tpu.dimension_semantics<parallel>], iteration_bounds = array<i64: 8>, scalar_prefetch = 0 : i64, scratch_operands = 0 : i64, tpu.core_type = #tpu.core_type<tc>, window_params = [{transform_indices = @transform_0, window_bounds = array<i64: 1, 5, 8>}, {transform_indices = @transform_1, window_bounds = array<i64: 1, 5, 8>}, {transform_indices = @transform_2, window_bounds = array<i64: 1, 5, 8>}, {transform_indices = @transform_3, window_bounds = array<i64: 1, 5, 8>}]} {
    %c0 = arith.constant 0 : index
    %c0_0 = arith.constant 0 : index
    %c0_1 = arith.constant 0 : index
    %0 = vector.load %arg1[%c0, %c0_0, %c0_1] : memref<1x5x8xbf16, #tpu.memory_space<vmem>>, vector<1x5x8xbf16>
    %1 = arith.extf %0 : vector<1x5x8xbf16> to vector<1x5x8xf32>
    %c0_2 = arith.constant 0 : index
    %c0_3 = arith.constant 0 : index
    %c0_4 = arith.constant 0 : index
    %2 = vector.load %arg2[%c0_2, %c0_3, %c0_4] : memref<1x5x8xbf16, #tpu.memory_space<vmem>>, vector<1x5x8xbf16>
    %3 = arith.extf %2 : vector<1x5x8xbf16> to vector<1x5x8xf32>
    %c0_5 = arith.constant 0 : index
    %c0_6 = arith.constant 0 : index
    %c0_7 = arith.constant 0 : index
    %4 = vector.load %arg3[%c0_5, %c0_6, %c0_7] : memref<1x5x8xbf16, #tpu.memory_space<vmem>>, vector<1x5x8xbf16>
    %5 = arith.truncf %1 : vector<1x5x8xf32> to vector<1x5x8xbf16>
    %6 = arith.truncf %3 : vector<1x5x8xf32> to vector<1x5x8xbf16>
    "tpu.trace_start"() <{level = 10 : i32, message = "bqd,bkd->bqk"}> : () -> ()
    %cst = arith.constant dense<0.000000e+00> : vector<1x5x5xf32>
    %7 = tpu.matmul %5, %6, %cst {dimension_numbers = #tpu.dot_dimension_numbers<[2], [2], [1], [1], [0, 0, 0, 1, 1, 1], [0], [0]>} : vector<1x5x8xbf16>, vector<1x5x8xbf16>, vector<1x5x5xf32> -> vector<1x5x5xf32>
    "tpu.trace_stop"() : () -> ()
    %cst_8 = arith.constant 0.353553385 : f32
    %8 = vector.broadcast %cst_8 : f32 to vector<1x5x5xf32>
    %9 = arith.mulf %7, %8 : vector<1x5x5xf32>
    %cst_9 = arith.constant dense<0xFF800000> : vector<1x5xf32>
    %10 = vector.multi_reduction <maximumf>, %9, %cst_9 [2] : vector<1x5x5xf32> to vector<1x5xf32>
    %11 = vector.shape_cast %10 : vector<1x5xf32> to vector<1x5x1xf32>
    %12 = vector.broadcast %11 : vector<1x5x1xf32> to vector<1x5x5xf32>
    %13 = arith.subf %9, %12 : vector<1x5x5xf32>
    %14 = math.exp %13 : vector<1x5x5xf32>
    %cst_10 = arith.constant dense<0.000000e+00> : vector<1x5xf32>
    %15 = vector.multi_reduction <add>, %14, %cst_10 [2] : vector<1x5x5xf32> to vector<1x5xf32>
    %16 = vector.shape_cast %15 : vector<1x5xf32> to vector<1x5x1xf32>
    %17 = vector.broadcast %16 : vector<1x5x1xf32> to vector<1x5x5xf32>
    %18 = arith.divf %14, %17 : vector<1x5x5xf32>
    %19 = arith.truncf %18 : vector<1x5x5xf32> to vector<1x5x5xbf16>
    "tpu.trace_start"() <{level = 10 : i32, message = "bqk,bkd->bqd"}> : () -> ()
    %cst_11 = arith.constant dense<0.000000e+00> : vector<1x5x8xf32>
    %20 = tpu.matmul %19, %4, %cst_11 {dimension_numbers = #tpu.dot_dimension_numbers<[2], [1], [1], [2], [0, 0, 0, 1, 1, 2], [0], [0]>} : vector<1x5x5xbf16>, vector<1x5x8xbf16>, vector<1x5x8xf32> -> vector<1x5x8xf32>
    "tpu.trace_stop"() : () -> ()
    %21 = arith.truncf %20 : vector<1x5x8xf32> to vector<1x5x8xbf16>
    %c0_12 = arith.constant 0 : index
    %c0_13 = arith.constant 0 : index
    %c0_14 = arith.constant 0 : index
    %22 = vector.load %arg4[%c0_12, %c0_13, %c0_14] : memref<1x5x8xbf16, #tpu.memory_space<vmem>>, vector<1x5x8xbf16>
    tpu.vector_store %arg4[%c0_12, %c0_13, %c0_14], %21 {strides = array<i32>} : memref<1x5x8xbf16, #tpu.memory_space<vmem>>, vector<1x5x8xbf16>,
    return
  }
  func.func @transform_0(%arg0: i32) -> (i32, i32, i32) {
    %c0_i32 = arith.constant 0 : i32
    %c0_i32_0 = arith.constant 0 : i32
    %c0_i32_1 = arith.constant 0 : i32
    return %arg0, %c0_i32, %c0_i32_0 : i32, i32, i32
  }
  func.func @transform_1(%arg0: i32) -> (i32, i32, i32) {
    %c0_i32 = arith.constant 0 : i32
    %c0_i32_0 = arith.constant 0 : i32
    %c0_i32_1 = arith.constant 0 : i32
    return %arg0, %c0_i32, %c0_i32_0 : i32, i32, i32
  }
  func.func @transform_2(%arg0: i32) -> (i32, i32, i32) {
    %c0_i32 = arith.constant 0 : i32
    %c0_i32_0 = arith.constant 0 : i32
    %c0_i32_1 = arith.constant 0 : i32
    return %arg0, %c0_i32, %c0_i32_0 : i32, i32, i32
  }
  func.func @transform_3(%arg0: i32) -> (i32, i32, i32) {
    %c0_i32 = arith.constant 0 : i32
    %c0_i32_0 = arith.constant 0 : i32
    %c0_i32_1 = arith.constant 0 : i32
    return %arg0, %c0_i32, %c0_i32_0 : i32, i32, i32
  }
}

module attributes {stable_mosaic.version = 11 : i64} {
  func.func @kernel(%arg0: i32, %arg1: memref<10x32xbf16, #tpu.memory_space<vmem>>, %arg2: memref<32x32xbf16, #tpu.memory_space<vmem>>, %arg3: memref<1x32xf32, #tpu.memory_space<vmem>>, %arg4: memref<10x32xf32, #tpu.memory_space<vmem>>, %arg5: memref<10x32xf32, #tpu.memory_space<vmem>>) attributes {dimension_semantics = [#tpu.dimension_semantics<arbitrary>], iteration_bounds = array<i64: 1>, scalar_prefetch = 0 : i64, scratch_operands = 0 : i64, tpu.core_type = #tpu.core_type<tc>, window_params = [{pipeline_mode = #tpu.pipeline_mode<synchronous>, transform_indices = @transform_0, window_bounds = array<i64: 10, 32>}, {pipeline_mode = #tpu.pipeline_mode<synchronous>, transform_indices = @transform_1, window_bounds = array<i64: 32, 32>}, {pipeline_mode = #tpu.pipeline_mode<synchronous>, transform_indices = @transform_2, window_bounds = array<i64: 1, 32>}, {pipeline_mode = #tpu.pipeline_mode<synchronous>, transform_indices = @transform_3, window_bounds = array<i64: 10, 32>}, {pipeline_mode = #tpu.pipeline_mode<synchronous>, transform_indices = @transform_4, window_bounds = array<i64: 10, 32>}]} {
    %c0 = arith.constant 0 : index
    %c0_0 = arith.constant 0 : index
    %0 = vector.load %arg1[%c0, %c0_0] : memref<10x32xbf16, #tpu.memory_space<vmem>>, vector<10x32xbf16>
    %1 = arith.extf %0 : vector<10x32xbf16> to vector<10x32xf32>
    %c0_1 = arith.constant 0 : index
    %c0_2 = arith.constant 0 : index
    %2 = vector.load %arg2[%c0_1, %c0_2] : memref<32x32xbf16, #tpu.memory_space<vmem>>, vector<32x32xbf16>
    %3 = arith.truncf %1 : vector<10x32xf32> to vector<10x32xbf16>
    %cst = arith.constant dense<0.000000e+00> : vector<10x32xf32>
    %4 = tpu.matmul %3, %2, %cst {dimension_numbers = #tpu.dot_dimension_numbers<[1], [0], [0], [1], [0, 0, 1, 1], [], []>} : vector<10x32xbf16>, vector<32x32xbf16>, vector<10x32xf32> -> vector<10x32xf32>
    %c0_3 = arith.constant 0 : index
    %c0_4 = arith.constant 0 : index
    %5 = vector.load %arg3[%c0_3, %c0_4] : memref<1x32xf32, #tpu.memory_space<vmem>>, vector<1x32xf32>
    %6 = vector.broadcast %5 : vector<1x32xf32> to vector<10x32xf32>
    %7 = arith.addf %4, %6 : vector<10x32xf32>
    %c0_5 = arith.constant 0 : index
    %c0_6 = arith.constant 0 : index
    %8 = vector.load %arg4[%c0_5, %c0_6] : memref<10x32xf32, #tpu.memory_space<vmem>>, vector<10x32xf32>
    %9 = arith.addf %7, %8 : vector<10x32xf32>
    %c0_7 = arith.constant 0 : index
    %c0_8 = arith.constant 0 : index
    %10 = vector.load %arg5[%c0_7, %c0_8] : memref<10x32xf32, #tpu.memory_space<vmem>>, vector<10x32xf32>
    tpu.vector_store %arg5[%c0_7, %c0_8], %9 {strides = array<i32>} : memref<10x32xf32, #tpu.memory_space<vmem>>, vector<10x32xf32>,
    return
  }
  func.func @transform_0(%arg0: i32) -> (i32, i32) {
    %c0_i32 = arith.constant 0 : i32
    %c0_i32_0 = arith.constant 0 : i32
    %c0_i32_1 = arith.constant 0 : i32
    return %c0_i32, %c0_i32_0 : i32, i32
  }
  func.func @transform_1(%arg0: i32) -> (i32, i32) {
    %c0_i32 = arith.constant 0 : i32
    %c0_i32_0 = arith.constant 0 : i32
    %c0_i32_1 = arith.constant 0 : i32
    return %c0_i32, %c0_i32_0 : i32, i32
  }
  func.func @transform_2(%arg0: i32) -> (i32, i32) {
    %c0_i32 = arith.constant 0 : i32
    %c0_i32_0 = arith.constant 0 : i32
    %c0_i32_1 = arith.constant 0 : i32
    return %c0_i32, %c0_i32_0 : i32, i32
  }
  func.func @transform_3(%arg0: i32) -> (i32, i32) {
    %c0_i32 = arith.constant 0 : i32
    %c0_i32_0 = arith.constant 0 : i32
    %c0_i32_1 = arith.constant 0 : i32
    return %c0_i32, %c0_i32_0 : i32, i32
  }
  func.func @transform_4(%arg0: i32) -> (i32, i32) {
    %c0_i32 = arith.constant 0 : i32
    %c0_i32_0 = arith.constant 0 : i32
    %c0_i32_1 = arith.constant 0 : i32
    return %c0_i32, %c0_i32_0 : i32, i32
  }
}

module attributes {stable_mosaic.version = 11 : i64} {
  func.func @kernel(%arg0: i32, %arg1: memref<10x32xf32, #tpu.memory_space<vmem>>, %arg2: memref<1x32xf32, #tpu.memory_space<vmem>>, %arg3: memref<1x32xf32, #tpu.memory_space<vmem>>, %arg4: memref<32x128xbf16, #tpu.memory_space<vmem>>, %arg5: memref<1x128xf32, #tpu.memory_space<vmem>>, %arg6: memref<128x32xbf16, #tpu.memory_space<vmem>>, %arg7: memref<1x32xf32, #tpu.memory_space<vmem>>, %arg8: memref<10x32xf32, #tpu.memory_space<vmem>>) attributes {dimension_semantics = [#tpu.dimension_semantics<arbitrary>], iteration_bounds = array<i64: 1>, scalar_prefetch = 0 : i64, scratch_operands = 0 : i64, tpu.core_type = #tpu.core_type<tc>, window_params = [{pipeline_mode = #tpu.pipeline_mode<synchronous>, transform_indices = @transform_0, window_bounds = array<i64: 10, 32>}, {pipeline_mode = #tpu.pipeline_mode<synchronous>, transform_indices = @transform_1, window_bounds = array<i64: 1, 32>}, {pipeline_mode = #tpu.pipeline_mode<synchronous>, transform_indices = @transform_2, window_bounds = array<i64: 1, 32>}, {pipeline_mode = #tpu.pipeline_mode<synchronous>, transform_indices = @transform_3, window_bounds = array<i64: 32, 128>}, {pipeline_mode = #tpu.pipeline_mode<synchronous>, transform_indices = @transform_4, window_bounds = array<i64: 1, 128>}, {pipeline_mode = #tpu.pipeline_mode<synchronous>, transform_indices = @transform_5, window_bounds = array<i64: 128, 32>}, {pipeline_mode = #tpu.pipeline_mode<synchronous>, transform_indices = @transform_6, window_bounds = array<i64: 1, 32>}, {pipeline_mode = #tpu.pipeline_mode<synchronous>, transform_indices = @transform_7, window_bounds = array<i64: 10, 32>}]} {
    %c0 = arith.constant 0 : index
    %c0_0 = arith.constant 0 : index
    %0 = vector.load %arg1[%c0, %c0_0] : memref<10x32xf32, #tpu.memory_space<vmem>>, vector<10x32xf32>
    %c0_1 = arith.constant 0 : index
    %c0_2 = arith.constant 0 : index
    %1 = vector.load %arg2[%c0_1, %c0_2] : memref<1x32xf32, #tpu.memory_space<vmem>>, vector<1x32xf32>
    %c0_3 = arith.constant 0 : index
    %c0_4 = arith.constant 0 : index
    %2 = vector.load %arg3[%c0_3, %c0_4] : memref<1x32xf32, #tpu.memory_space<vmem>>, vector<1x32xf32>
    %cst = arith.constant dense<0.000000e+00> : vector<10xf32>
    %3 = vector.multi_reduction <add>, %0, %cst [1] : vector<10x32xf32> to vector<10xf32>
    %4 = vector.shape_cast %3 : vector<10xf32> to vector<10x1xf32>
    %cst_5 = arith.constant 3.200000e+01 : f32
    %5 = vector.broadcast %cst_5 : f32 to vector<10x1xf32>
    %6 = arith.divf %4, %5 : vector<10x1xf32>
    %7 = vector.broadcast %6 : vector<10x1xf32> to vector<10x32xf32>
    %8 = arith.subf %0, %7 : vector<10x32xf32>
    %9 = arith.mulf %8, %8 : vector<10x32xf32>
    %cst_6 = arith.constant dense<0.000000e+00> : vector<10xf32>
    %10 = vector.multi_reduction <add>, %9, %cst_6 [1] : vector<10x32xf32> to vector<10xf32>
    %11 = vector.shape_cast %10 : vector<10xf32> to vector<10x1xf32>
    %cst_7 = arith.constant 3.200000e+01 : f32
    %12 = vector.broadcast %cst_7 : f32 to vector<10x1xf32>
    %13 = arith.divf %11, %12 : vector<10x1xf32>
    %14 = vector.broadcast %6 : vector<10x1xf32> to vector<10x32xf32>
    %15 = arith.subf %0, %14 : vector<10x32xf32>
    %cst_8 = arith.constant 9.99999974E-6 : f32
    %16 = vector.broadcast %cst_8 : f32 to vector<10x1xf32>
    %17 = arith.addf %13, %16 : vector<10x1xf32>
    %18 = math.rsqrt %17 : vector<10x1xf32>
    %19 = vector.broadcast %18 : vector<10x1xf32> to vector<10x32xf32>
    %20 = arith.mulf %15, %19 : vector<10x32xf32>
    %21 = vector.broadcast %1 : vector<1x32xf32> to vector<10x32xf32>
    %22 = arith.mulf %20, %21 : vector<10x32xf32>
    %23 = vector.broadcast %2 : vector<1x32xf32> to vector<10x32xf32>
    %24 = arith.addf %22, %23 : vector<10x32xf32>
    %25 = arith.truncf %24 : vector<10x32xf32> to vector<10x32xbf16>
    %c0_9 = arith.constant 0 : index
    %c0_10 = arith.constant 0 : index
    %26 = vector.load %arg4[%c0_9, %c0_10] : memref<32x128xbf16, #tpu.memory_space<vmem>>, vector<32x128xbf16>
    %cst_11 = arith.constant dense<0.000000e+00> : vector<10x128xf32>
    %27 = tpu.matmul %25, %26, %cst_11 {dimension_numbers = #tpu.dot_dimension_numbers<[1], [0], [0], [1], [0, 0, 1, 1], [], []>} : vector<10x32xbf16>, vector<32x128xbf16>, vector<10x128xf32> -> vector<10x128xf32>
    %c0_12 = arith.constant 0 : index
    %c0_13 = arith.constant 0 : index
    %28 = vector.load %arg5[%c0_12, %c0_13] : memref<1x128xf32, #tpu.memory_space<vmem>>, vector<1x128xf32>
    %29 = vector.broadcast %28 : vector<1x128xf32> to vector<10x128xf32>
    %30 = arith.addf %27, %29 : vector<10x128xf32>
    %cst_14 = arith.constant 1.702000e+00 : f32
    %31 = vector.broadcast %cst_14 : f32 to vector<10x128xf32>
    %32 = arith.mulf %31, %30 : vector<10x128xf32>
    %33 = arith.negf %32 : vector<10x128xf32>
    %34 = math.exp %33 : vector<10x128xf32>
    %cst_15 = arith.constant 1.000000e+00 : f32
    %35 = vector.broadcast %cst_15 : f32 to vector<10x128xf32>
    %36 = arith.addf %35, %34 : vector<10x128xf32>
    %37 = arith.divf %35, %36 : vector<10x128xf32>
    %38 = arith.mulf %30, %37 : vector<10x128xf32>
    %39 = arith.truncf %38 : vector<10x128xf32> to vector<10x128xbf16>
    %c0_16 = arith.constant 0 : index
    %c0_17 = arith.constant 0 : index
    %40 = vector.load %arg6[%c0_16, %c0_17] : memref<128x32xbf16, #tpu.memory_space<vmem>>, vector<128x32xbf16>
    %cst_18 = arith.constant dense<0.000000e+00> : vector<10x32xf32>
    %41 = tpu.matmul %39, %40, %cst_18 {dimension_numbers = #tpu.dot_dimension_numbers<[1], [0], [0], [1], [0, 0, 1, 1], [], []>} : vector<10x128xbf16>, vector<128x32xbf16>, vector<10x32xf32> -> vector<10x32xf32>
    %c0_19 = arith.constant 0 : index
    %c0_20 = arith.constant 0 : index
    %42 = vector.load %arg7[%c0_19, %c0_20] : memref<1x32xf32, #tpu.memory_space<vmem>>, vector<1x32xf32>
    %43 = vector.broadcast %42 : vector<1x32xf32> to vector<10x32xf32>
    %44 = arith.addf %41, %43 : vector<10x32xf32>
    %45 = arith.addf %0, %44 : vector<10x32xf32>
    %c0_21 = arith.constant 0 : index
    %c0_22 = arith.constant 0 : index
    %46 = vector.load %arg8[%c0_21, %c0_22] : memref<10x32xf32, #tpu.memory_space<vmem>>, vector<10x32xf32>
    tpu.vector_store %arg8[%c0_21, %c0_22], %45 {strides = array<i32>} : memref<10x32xf32, #tpu.memory_space<vmem>>, vector<10x32xf32>,
    return
  }
  func.func @transform_0(%arg0: i32) -> (i32, i32) {
    %c0_i32 = arith.constant 0 : i32
    %c0_i32_0 = arith.constant 0 : i32
    %c0_i32_1 = arith.constant 0 : i32
    return %c0_i32, %c0_i32_0 : i32, i32
  }
  func.func @transform_1(%arg0: i32) -> (i32, i32) {
    %c0_i32 = arith.constant 0 : i32
    %c0_i32_0 = arith.constant 0 : i32
    %c0_i32_1 = arith.constant 0 : i32
    return %c0_i32, %c0_i32_0 : i32, i32
  }
  func.func @transform_2(%arg0: i32) -> (i32, i32) {
    %c0_i32 = arith.constant 0 : i32
    %c0_i32_0 = arith.constant 0 : i32
    %c0_i32_1 = arith.constant 0 : i32
    return %c0_i32, %c0_i32_0 : i32, i32
  }
  func.func @transform_3(%arg0: i32) -> (i32, i32) {
    %c0_i32 = arith.constant 0 : i32
    %c0_i32_0 = arith.constant 0 : i32
    %c0_i32_1 = arith.constant 0 : i32
    return %c0_i32, %c0_i32_0 : i32, i32
  }
  func.func @transform_4(%arg0: i32) -> (i32, i32) {
    %c0_i32 = arith.constant 0 : i32
    %c0_i32_0 = arith.constant 0 : i32
    %c0_i32_1 = arith.constant 0 : i32
    return %c0_i32, %c0_i32_0 : i32, i32
  }
  func.func @transform_5(%arg0: i32) -> (i32, i32) {
    %c0_i32 = arith.constant 0 : i32
    %c0_i32_0 = arith.constant 0 : i32
    %c0_i32_1 = arith.constant 0 : i32
    return %c0_i32, %c0_i32_0 : i32, i32
  }
  func.func @transform_6(%arg0: i32) -> (i32, i32) {
    %c0_i32 = arith.constant 0 : i32
    %c0_i32_0 = arith.constant 0 : i32
    %c0_i32_1 = arith.constant 0 : i32
    return %c0_i32, %c0_i32_0 : i32, i32
  }
  func.func @transform_7(%arg0: i32) -> (i32, i32) {
    %c0_i32 = arith.constant 0 : i32
    %c0_i32_0 = arith.constant 0 : i32
    %c0_i32_1 = arith.constant 0 : i32
    return %c0_i32, %c0_i32_0 : i32, i32
  }
}

module attributes {stable_mosaic.version = 11 : i64} {
  func.func @kernel(%arg0: i32, %arg1: memref<10x32xf32, #tpu.memory_space<vmem>>, %arg2: memref<1x32xf32, #tpu.memory_space<vmem>>, %arg3: memref<1x32xf32, #tpu.memory_space<vmem>>, %arg4: memref<32x32xbf16, #tpu.memory_space<vmem>>, %arg5: memref<10x32xbf16, #tpu.memory_space<vmem>>) attributes {dimension_semantics = [#tpu.dimension_semantics<arbitrary>], iteration_bounds = array<i64: 1>, scalar_prefetch = 0 : i64, scratch_operands = 0 : i64, tpu.core_type = #tpu.core_type<tc>, window_params = [{pipeline_mode = #tpu.pipeline_mode<synchronous>, transform_indices = @transform_0, window_bounds = array<i64: 10, 32>}, {pipeline_mode = #tpu.pipeline_mode<synchronous>, transform_indices = @transform_1, window_bounds = array<i64: 1, 32>}, {pipeline_mode = #tpu.pipeline_mode<synchronous>, transform_indices = @transform_2, window_bounds = array<i64: 1, 32>}, {pipeline_mode = #tpu.pipeline_mode<synchronous>, transform_indices = @transform_3, window_bounds = array<i64: 32, 32>}, {pipeline_mode = #tpu.pipeline_mode<synchronous>, transform_indices = @transform_4, window_bounds = array<i64: 10, 32>}]} {
    %c0 = arith.constant 0 : index
    %c0_0 = arith.constant 0 : index
    %0 = vector.load %arg1[%c0, %c0_0] : memref<10x32xf32, #tpu.memory_space<vmem>>, vector<10x32xf32>
    %c0_1 = arith.constant 0 : index
    %c0_2 = arith.constant 0 : index
    %1 = vector.load %arg2[%c0_1, %c0_2] : memref<1x32xf32, #tpu.memory_space<vmem>>, vector<1x32xf32>
    %c0_3 = arith.constant 0 : index
    %c0_4 = arith.constant 0 : index
    %2 = vector.load %arg3[%c0_3, %c0_4] : memref<1x32xf32, #tpu.memory_space<vmem>>, vector<1x32xf32>
    %cst = arith.constant dense<0.000000e+00> : vector<10xf32>
    %3 = vector.multi_reduction <add>, %0, %cst [1] : vector<10x32xf32> to vector<10xf32>
    %4 = vector.shape_cast %3 : vector<10xf32> to vector<10x1xf32>
    %cst_5 = arith.constant 3.200000e+01 : f32
    %5 = vector.broadcast %cst_5 : f32 to vector<10x1xf32>
    %6 = arith.divf %4, %5 : vector<10x1xf32>
    %7 = vector.broadcast %6 : vector<10x1xf32> to vector<10x32xf32>
    %8 = arith.subf %0, %7 : vector<10x32xf32>
    %9 = arith.mulf %8, %8 : vector<10x32xf32>
    %cst_6 = arith.constant dense<0.000000e+00> : vector<10xf32>
    %10 = vector.multi_reduction <add>, %9, %cst_6 [1] : vector<10x32xf32> to vector<10xf32>
    %11 = vector.shape_cast %10 : vector<10xf32> to vector<10x1xf32>
    %cst_7 = arith.constant 3.200000e+01 : f32
    %12 = vector.broadcast %cst_7 : f32 to vector<10x1xf32>
    %13 = arith.divf %11, %12 : vector<10x1xf32>
    %14 = vector.broadcast %6 : vector<10x1xf32> to vector<10x32xf32>
    %15 = arith.subf %0, %14 : vector<10x32xf32>
    %cst_8 = arith.constant 9.99999974E-6 : f32
    %16 = vector.broadcast %cst_8 : f32 to vector<10x1xf32>
    %17 = arith.addf %13, %16 : vector<10x1xf32>
    %18 = math.rsqrt %17 : vector<10x1xf32>
    %19 = vector.broadcast %18 : vector<10x1xf32> to vector<10x32xf32>
    %20 = arith.mulf %15, %19 : vector<10x32xf32>
    %21 = vector.broadcast %1 : vector<1x32xf32> to vector<10x32xf32>
    %22 = arith.mulf %20, %21 : vector<10x32xf32>
    %23 = vector.broadcast %2 : vector<1x32xf32> to vector<10x32xf32>
    %24 = arith.addf %22, %23 : vector<10x32xf32>
    %c0_9 = arith.constant 0 : index
    %c0_10 = arith.constant 0 : index
    %25 = vector.load %arg4[%c0_9, %c0_10] : memref<32x32xbf16, #tpu.memory_space<vmem>>, vector<32x32xbf16>
    %26 = arith.truncf %24 : vector<10x32xf32> to vector<10x32xbf16>
    %cst_11 = arith.constant dense<0.000000e+00> : vector<10x32xf32>
    %27 = tpu.matmul %26, %25, %cst_11 {dimension_numbers = #tpu.dot_dimension_numbers<[1], [0], [0], [1], [0, 0, 1, 1], [], []>} : vector<10x32xbf16>, vector<32x32xbf16>, vector<10x32xf32> -> vector<10x32xf32>
    %28 = arith.truncf %27 : vector<10x32xf32> to vector<10x32xbf16>
    %c0_12 = arith.constant 0 : index
    %c0_13 = arith.constant 0 : index
    %29 = vector.load %arg5[%c0_12, %c0_13] : memref<10x32xbf16, #tpu.memory_space<vmem>>, vector<10x32xbf16>
    tpu.vector_store %arg5[%c0_12, %c0_13], %28 {strides = array<i32>} : memref<10x32xbf16, #tpu.memory_space<vmem>>, vector<10x32xbf16>,
    return
  }
  func.func @transform_0(%arg0: i32) -> (i32, i32) {
    %c0_i32 = arith.constant 0 : i32
    %c0_i32_0 = arith.constant 0 : i32
    %c0_i32_1 = arith.constant 0 : i32
    return %c0_i32, %c0_i32_0 : i32, i32
  }
  func.func @transform_1(%arg0: i32) -> (i32, i32) {
    %c0_i32 = arith.constant 0 : i32
    %c0_i32_0 = arith.constant 0 : i32
    %c0_i32_1 = arith.constant 0 : i32
    return %c0_i32, %c0_i32_0 : i32, i32
  }
  func.func @transform_2(%arg0: i32) -> (i32, i32) {
    %c0_i32 = arith.constant 0 : i32
    %c0_i32_0 = arith.constant 0 : i32
    %c0_i32_1 = arith.constant 0 : i32
    return %c0_i32, %c0_i32_0 : i32, i32
  }
  func.func @transform_3(%arg0: i32) -> (i32, i32) {
    %c0_i32 = arith.constant 0 : i32
    %c0_i32_0 = arith.constant 0 : i32
    %c0_i32_1 = arith.constant 0 : i32
    return %c0_i32, %c0_i32_0 : i32, i32
  }
  func.func @transform_4(%arg0: i32) -> (i32, i32) {
    %c0_i32 = arith.constant 0 : i32
    %c0_i32_0 = arith.constant 0 : i32
    %c0_i32_1 = arith.constant 0 : i32
    return %c0_i32, %c0_i32_0 : i32, i32
  }
}

module attributes {stable_mosaic.version = 11 : i64} {
  func.func @kernel(%arg0: i32, %arg1: memref<10x32xbf16, #tpu.memory_space<vmem>>, %arg2: memref<32x32xbf16, #tpu.memory_space<vmem>>, %arg3: memref<1x32xf32, #tpu.memory_space<vmem>>, %arg4: memref<1x32xf32, #tpu.memory_space<vmem>>, %arg5: memref<1x32xf32, #tpu.memory_space<vmem>>, %arg6: memref<10x32xf32, #tpu.memory_space<vmem>>) attributes {dimension_semantics = [#tpu.dimension_semantics<arbitrary>], iteration_bounds = array<i64: 1>, scalar_prefetch = 0 : i64, scratch_operands = 0 : i64, tpu.core_type = #tpu.core_type<tc>, window_params = [{pipeline_mode = #tpu.pipeline_mode<synchronous>, transform_indices = @transform_0, window_bounds = array<i64: 10, 32>}, {pipeline_mode = #tpu.pipeline_mode<synchronous>, transform_indices = @transform_1, window_bounds = array<i64: 32, 32>}, {pipeline_mode = #tpu.pipeline_mode<synchronous>, transform_indices = @transform_2, window_bounds = array<i64: 1, 32>}, {pipeline_mode = #tpu.pipeline_mode<synchronous>, transform_indices = @transform_3, window_bounds = array<i64: 1, 32>}, {pipeline_mode = #tpu.pipeline_mode<synchronous>, transform_indices = @transform_4, window_bounds = array<i64: 1, 32>}, {pipeline_mode = #tpu.pipeline_mode<synchronous>, transform_indices = @transform_5, window_bounds = array<i64: 10, 32>}]} {
    %c0 = arith.constant 0 : index
    %c0_0 = arith.constant 0 : index
    %0 = vector.load %arg1[%c0, %c0_0] : memref<10x32xbf16, #tpu.memory_space<vmem>>, vector<10x32xbf16>
    %1 = arith.extf %0 : vector<10x32xbf16> to vector<10x32xf32>
    %c0_1 = arith.constant 0 : index
    %c0_2 = arith.constant 0 : index
    %2 = vector.load %arg2[%c0_1, %c0_2] : memref<32x32xbf16, #tpu.memory_space<vmem>>, vector<32x32xbf16>
    %3 = arith.truncf %1 : vector<10x32xf32> to vector<10x32xbf16>
    %cst = arith.constant dense<0.000000e+00> : vector<10x32xf32>
    %4 = tpu.matmul %3, %2, %cst {dimension_numbers = #tpu.dot_dimension_numbers<[1], [0], [0], [1], [0, 0, 1, 1], [], []>} : vector<10x32xbf16>, vector<32x32xbf16>, vector<10x32xf32> -> vector<10x32xf32>
    %c0_3 = arith.constant 0 : index
    %c0_4 = arith.constant 0 : index
    %5 = vector.load %arg3[%c0_3, %c0_4] : memref<1x32xf32, #tpu.memory_space<vmem>>, vector<1x32xf32>
    %6 = vector.broadcast %5 : vector<1x32xf32> to vector<10x32xf32>
    %7 = arith.addf %4, %6 : vector<10x32xf32>
    %c0_5 = arith.constant 0 : index
    %c0_6 = arith.constant 0 : index
    %8 = vector.load %arg4[%c0_5, %c0_6] : memref<1x32xf32, #tpu.memory_space<vmem>>, vector<1x32xf32>
    %c0_7 = arith.constant 0 : index
    %c0_8 = arith.constant 0 : index
    %9 = vector.load %arg5[%c0_7, %c0_8] : memref<1x32xf32, #tpu.memory_space<vmem>>, vector<1x32xf32>
    %cst_9 = arith.constant dense<0.000000e+00> : vector<10xf32>
    %10 = vector.multi_reduction <add>, %7, %cst_9 [1] : vector<10x32xf32> to vector<10xf32>
    %11 = vector.shape_cast %10 : vector<10xf32> to vector<10x1xf32>
    %cst_10 = arith.constant 3.200000e+01 : f32
    %12 = vector.broadcast %cst_10 : f32 to vector<10x1xf32>
    %13 = arith.divf %11, %12 : vector<10x1xf32>
    %14 = vector.broadcast %13 : vector<10x1xf32> to vector<10x32xf32>
    %15 = arith.subf %7, %14 : vector<10x32xf32>
    %16 = arith.mulf %15, %15 : vector<10x32xf32>
    %cst_11 = arith.constant dense<0.000000e+00> : vector<10xf32>
    %17 = vector.multi_reduction <add>, %16, %cst_11 [1] : vector<10x32xf32> to vector<10xf32>
    %18 = vector.shape_cast %17 : vector<10xf32> to vector<10x1xf32>
    %cst_12 = arith.constant 3.200000e+01 : f32
    %19 = vector.broadcast %cst_12 : f32 to vector<10x1xf32>
    %20 = arith.divf %18, %19 : vector<10x1xf32>
    %21 = vector.broadcast %13 : vector<10x1xf32> to vector<10x32xf32>
    %22 = arith.subf %7, %21 : vector<10x32xf32>
    %cst_13 = arith.constant 9.99999974E-6 : f32
    %23 = vector.broadcast %cst_13 : f32 to vector<10x1xf32>
    %24 = arith.addf %20, %23 : vector<10x1xf32>
    %25 = math.rsqrt %24 : vector<10x1xf32>
    %26 = vector.broadcast %25 : vector<10x1xf32> to vector<10x32xf32>
    %27 = arith.mulf %22, %26 : vector<10x32xf32>
    %28 = vector.broadcast %8 : vector<1x32xf32> to vector<10x32xf32>
    %29 = arith.mulf %27, %28 : vector<10x32xf32>
    %30 = vector.broadcast %9 : vector<1x32xf32> to vector<10x32xf32>
    %31 = arith.addf %29, %30 : vector<10x32xf32>
    %c0_14 = arith.constant 0 : index
    %c0_15 = arith.constant 0 : index
    %32 = vector.load %arg6[%c0_14, %c0_15] : memref<10x32xf32, #tpu.memory_space<vmem>>, vector<10x32xf32>
    tpu.vector_store %arg6[%c0_14, %c0_15], %31 {strides = array<i32>} : memref<10x32xf32, #tpu.memory_space<vmem>>, vector<10x32xf32>,
    return
  }
  func.func @transform_0(%arg0: i32) -> (i32, i32) {
    %c0_i32 = arith.constant 0 : i32
    %c0_i32_0 = arith.constant 0 : i32
    %c0_i32_1 = arith.constant 0 : i32
    return %c0_i32, %c0_i32_0 : i32, i32
  }
  func.func @transform_1(%arg0: i32) -> (i32, i32) {
    %c0_i32 = arith.constant 0 : i32
    %c0_i32_0 = arith.constant 0 : i32
    %c0_i32_1 = arith.constant 0 : i32
    return %c0_i32, %c0_i32_0 : i32, i32
  }
  func.func @transform_2(%arg0: i32) -> (i32, i32) {
    %c0_i32 = arith.constant 0 : i32
    %c0_i32_0 = arith.constant 0 : i32
    %c0_i32_1 = arith.constant 0 : i32
    return %c0_i32, %c0_i32_0 : i32, i32
  }
  func.func @transform_3(%arg0: i32) -> (i32, i32) {
    %c0_i32 = arith.constant 0 : i32
    %c0_i32_0 = arith.constant 0 : i32
    %c0_i32_1 = arith.constant 0 : i32
    return %c0_i32, %c0_i32_0 : i32, i32
  }
  func.func @transform_4(%arg0: i32) -> (i32, i32) {
    %c0_i32 = arith.constant 0 : i32
    %c0_i32_0 = arith.constant 0 : i32
    %c0_i32_1 = arith.constant 0 : i32
    return %c0_i32, %c0_i32_0 : i32, i32
  }
  func.func @transform_5(%arg0: i32) -> (i32, i32) {
    %c0_i32 = arith.constant 0 : i32
    %c0_i32_0 = arith.constant 0 : i32
    %c0_i32_1 = arith.constant 0 : i32
    return %c0_i32, %c0_i32_0 : i32, i32
  }
}

module attributes {stable_mosaic.version = 11 : i64} {
  func.func @kernel(%arg0: i32, %arg1: memref<18x32xf32, #tpu.memory_space<vmem>>, %arg2: memref<1x32xf32, #tpu.memory_space<vmem>>, %arg3: memref<1x32xf32, #tpu.memory_space<vmem>>, %arg4: memref<32x96xbf16, #tpu.memory_space<vmem>>, %arg5: memref<1x96xf32, #tpu.memory_space<vmem>>, %arg6: memref<18x96xbf16, #tpu.memory_space<vmem>>) attributes {dimension_semantics = [#tpu.dimension_semantics<arbitrary>], iteration_bounds = array<i64: 1>, scalar_prefetch = 0 : i64, scratch_operands = 0 : i64, tpu.core_type = #tpu.core_type<tc>, window_params = [{pipeline_mode = #tpu.pipeline_mode<synchronous>, transform_indices = @transform_0, window_bounds = array<i64: 18, 32>}, {pipeline_mode = #tpu.pipeline_mode<synchronous>, transform_indices = @transform_1, window_bounds = array<i64: 1, 32>}, {pipeline_mode = #tpu.pipeline_mode<synchronous>, transform_indices = @transform_2, window_bounds = array<i64: 1, 32>}, {pipeline_mode = #tpu.pipeline_mode<synchronous>, transform_indices = @transform_3, window_bounds = array<i64: 32, 96>}, {pipeline_mode = #tpu.pipeline_mode<synchronous>, transform_indices = @transform_4, window_bounds = array<i64: 1, 96>}, {pipeline_mode = #tpu.pipeline_mode<synchronous>, transform_indices = @transform_5, window_bounds = array<i64: 18, 96>}]} {
    %c0 = arith.constant 0 : index
    %c0_0 = arith.constant 0 : index
    %0 = vector.load %arg1[%c0, %c0_0] : memref<18x32xf32, #tpu.memory_space<vmem>>, vector<18x32xf32>
    %c0_1 = arith.constant 0 : index
    %c0_2 = arith.constant 0 : index
    %1 = vector.load %arg2[%c0_1, %c0_2] : memref<1x32xf32, #tpu.memory_space<vmem>>, vector<1x32xf32>
    %c0_3 = arith.constant 0 : index
    %c0_4 = arith.constant 0 : index
    %2 = vector.load %arg3[%c0_3, %c0_4] : memref<1x32xf32, #tpu.memory_space<vmem>>, vector<1x32xf32>
    %cst = arith.constant dense<0.000000e+00> : vector<18xf32>
    %3 = vector.multi_reduction <add>, %0, %cst [1] : vector<18x32xf32> to vector<18xf32>
    %4 = vector.shape_cast %3 : vector<18xf32> to vector<18x1xf32>
    %cst_5 = arith.constant 3.200000e+01 : f32
    %5 = vector.broadcast %cst_5 : f32 to vector<18x1xf32>
    %6 = arith.divf %4, %5 : vector<18x1xf32>
    %7 = vector.broadcast %6 : vector<18x1xf32> to vector<18x32xf32>
    %8 = arith.subf %0, %7 : vector<18x32xf32>
    %9 = arith.mulf %8, %8 : vector<18x32xf32>
    %cst_6 = arith.constant dense<0.000000e+00> : vector<18xf32>
    %10 = vector.multi_reduction <add>, %9, %cst_6 [1] : vector<18x32xf32> to vector<18xf32>
    %11 = vector.shape_cast %10 : vector<18xf32> to vector<18x1xf32>
    %cst_7 = arith.constant 3.200000e+01 : f32
    %12 = vector.broadcast %cst_7 : f32 to vector<18x1xf32>
    %13 = arith.divf %11, %12 : vector<18x1xf32>
    %14 = vector.broadcast %6 : vector<18x1xf32> to vector<18x32xf32>
    %15 = arith.subf %0, %14 : vector<18x32xf32>
    %cst_8 = arith.constant 9.99999974E-6 : f32
    %16 = vector.broadcast %cst_8 : f32 to vector<18x1xf32>
    %17 = arith.addf %13, %16 : vector<18x1xf32>
    %18 = math.rsqrt %17 : vector<18x1xf32>
    %19 = vector.broadcast %18 : vector<18x1xf32> to vector<18x32xf32>
    %20 = arith.mulf %15, %19 : vector<18x32xf32>
    %21 = vector.broadcast %1 : vector<1x32xf32> to vector<18x32xf32>
    %22 = arith.mulf %20, %21 : vector<18x32xf32>
    %23 = vector.broadcast %2 : vector<1x32xf32> to vector<18x32xf32>
    %24 = arith.addf %22, %23 : vector<18x32xf32>
    %c0_9 = arith.constant 0 : index
    %c0_10 = arith.constant 0 : index
    %25 = vector.load %arg4[%c0_9, %c0_10] : memref<32x96xbf16, #tpu.memory_space<vmem>>, vector<32x96xbf16>
    %26 = arith.truncf %24 : vector<18x32xf32> to vector<18x32xbf16>
    %cst_11 = arith.constant dense<0.000000e+00> : vector<18x96xf32>
    %27 = tpu.matmul %26, %25, %cst_11 {dimension_numbers = #tpu.dot_dimension_numbers<[1], [0], [0], [1], [0, 0, 1, 1], [], []>} : vector<18x32xbf16>, vector<32x96xbf16>, vector<18x96xf32> -> vector<18x96xf32>
    %c0_12 = arith.constant 0 : index
    %c0_13 = arith.constant 0 : index
    %28 = vector.load %arg5[%c0_12, %c0_13] : memref<1x96xf32, #tpu.memory_space<vmem>>, vector<1x96xf32>
    %29 = vector.broadcast %28 : vector<1x96xf32> to vector<18x96xf32>
    %30 = arith.addf %27, %29 : vector<18x96xf32>
    %31 = arith.truncf %30 : vector<18x96xf32> to vector<18x96xbf16>
    %c0_14 = arith.constant 0 : index
    %c0_15 = arith.constant 0 : index
    %32 = vector.load %arg6[%c0_14, %c0_15] : memref<18x96xbf16, #tpu.memory_space<vmem>>, vector<18x96xbf16>
    tpu.vector_store %arg6[%c0_14, %c0_15], %31 {strides = array<i32>} : memref<18x96xbf16, #tpu.memory_space<vmem>>, vector<18x96xbf16>,
    return
  }
  func.func @transform_0(%arg0: i32) -> (i32, i32) {
    %c0_i32 = arith.constant 0 : i32
    %c0_i32_0 = arith.constant 0 : i32
    %c0_i32_1 = arith.constant 0 : i32
    return %c0_i32, %c0_i32_0 : i32, i32
  }
  func.func @transform_1(%arg0: i32) -> (i32, i32) {
    %c0_i32 = arith.constant 0 : i32
    %c0_i32_0 = arith.constant 0 : i32
    %c0_i32_1 = arith.constant 0 : i32
    return %c0_i32, %c0_i32_0 : i32, i32
  }
  func.func @transform_2(%arg0: i32) -> (i32, i32) {
    %c0_i32 = arith.constant 0 : i32
    %c0_i32_0 = arith.constant 0 : i32
    %c0_i32_1 = arith.constant 0 : i32
    return %c0_i32, %c0_i32_0 : i32, i32
  }
  func.func @transform_3(%arg0: i32) -> (i32, i32) {
    %c0_i32 = arith.constant 0 : i32
    %c0_i32_0 = arith.constant 0 : i32
    %c0_i32_1 = arith.constant 0 : i32
    return %c0_i32, %c0_i32_0 : i32, i32
  }
  func.func @transform_4(%arg0: i32) -> (i32, i32) {
    %c0_i32 = arith.constant 0 : i32
    %c0_i32_0 = arith.constant 0 : i32
    %c0_i32_1 = arith.constant 0 : i32
    return %c0_i32, %c0_i32_0 : i32, i32
  }
  func.func @transform_5(%arg0: i32) -> (i32, i32) {
    %c0_i32 = arith.constant 0 : i32
    %c0_i32_0 = arith.constant 0 : i32
    %c0_i32_1 = arith.constant 0 : i32
    return %c0_i32, %c0_i32_0 : i32, i32
  }
}

module attributes {stable_mosaic.version = 11 : i64} {
  func.func @kernel(%arg0: i32, %arg1: memref<1x9x8xbf16, #tpu.memory_space<vmem>>, %arg2: memref<1x9x8xbf16, #tpu.memory_space<vmem>>, %arg3: memref<1x9x8xbf16, #tpu.memory_space<vmem>>, %arg4: memref<1x9x8xbf16, #tpu.memory_space<vmem>>) attributes {dimension_semantics = [#tpu.dimension_semantics<parallel>], iteration_bounds = array<i64: 8>, scalar_prefetch = 0 : i64, scratch_operands = 0 : i64, tpu.core_type = #tpu.core_type<tc>, window_params = [{transform_indices = @transform_0, window_bounds = array<i64: 1, 9, 8>}, {transform_indices = @transform_1, window_bounds = array<i64: 1, 9, 8>}, {transform_indices = @transform_2, window_bounds = array<i64: 1, 9, 8>}, {transform_indices = @transform_3, window_bounds = array<i64: 1, 9, 8>}]} {
    %c0 = arith.constant 0 : index
    %c0_0 = arith.constant 0 : index
    %c0_1 = arith.constant 0 : index
    %0 = vector.load %arg1[%c0, %c0_0, %c0_1] : memref<1x9x8xbf16, #tpu.memory_space<vmem>>, vector<1x9x8xbf16>
    %1 = arith.extf %0 : vector<1x9x8xbf16> to vector<1x9x8xf32>
    %c0_2 = arith.constant 0 : index
    %c0_3 = arith.constant 0 : index
    %c0_4 = arith.constant 0 : index
    %2 = vector.load %arg2[%c0_2, %c0_3, %c0_4] : memref<1x9x8xbf16, #tpu.memory_space<vmem>>, vector<1x9x8xbf16>
    %3 = arith.extf %2 : vector<1x9x8xbf16> to vector<1x9x8xf32>
    %c0_5 = arith.constant 0 : index
    %c0_6 = arith.constant 0 : index
    %c0_7 = arith.constant 0 : index
    %4 = vector.load %arg3[%c0_5, %c0_6, %c0_7] : memref<1x9x8xbf16, #tpu.memory_space<vmem>>, vector<1x9x8xbf16>
    %5 = arith.truncf %1 : vector<1x9x8xf32> to vector<1x9x8xbf16>
    %6 = arith.truncf %3 : vector<1x9x8xf32> to vector<1x9x8xbf16>
    "tpu.trace_start"() <{level = 10 : i32, message = "bqd,bkd->bqk"}> : () -> ()
    %cst = arith.constant dense<0.000000e+00> : vector<1x9x9xf32>
    %7 = tpu.matmul %5, %6, %cst {dimension_numbers = #tpu.dot_dimension_numbers<[2], [2], [1], [1], [0, 0, 0, 1, 1, 1], [0], [0]>} : vector<1x9x8xbf16>, vector<1x9x8xbf16>, vector<1x9x9xf32> -> vector<1x9x9xf32>
    "tpu.trace_stop"() : () -> ()
    %cst_8 = arith.constant 0.353553385 : f32
    %8 = vector.broadcast %cst_8 : f32 to vector<1x9x9xf32>
    %9 = arith.mulf %7, %8 : vector<1x9x9xf32>
    %cst_9 = arith.constant dense<0xFF800000> : vector<1x9xf32>
    %10 = vector.multi_reduction <maximumf>, %9, %cst_9 [2] : vector<1x9x9xf32> to vector<1x9xf32>
    %11 = vector.shape_cast %10 : vector<1x9xf32> to vector<1x9x1xf32>
    %12 = vector.broadcast %11 : vector<1x9x1xf32> to vector<1x9x9xf32>
    %13 = arith.subf %9, %12 : vector<1x9x9xf32>
    %14 = math.exp %13 : vector<1x9x9xf32>
    %cst_10 = arith.constant dense<0.000000e+00> : vector<1x9xf32>
    %15 = vector.multi_reduction <add>, %14, %cst_10 [2] : vector<1x9x9xf32> to vector<1x9xf32>
    %16 = vector.shape_cast %15 : vector<1x9xf32> to vector<1x9x1xf32>
    %17 = vector.broadcast %16 : vector<1x9x1xf32> to vector<1x9x9xf32>
    %18 = arith.divf %14, %17 : vector<1x9x9xf32>
    %19 = arith.truncf %18 : vector<1x9x9xf32> to vector<1x9x9xbf16>
    "tpu.trace_start"() <{level = 10 : i32, message = "bqk,bkd->bqd"}> : () -> ()
    %cst_11 = arith.constant dense<0.000000e+00> : vector<1x9x8xf32>
    %20 = tpu.matmul %19, %4, %cst_11 {dimension_numbers = #tpu.dot_dimension_numbers<[2], [1], [1], [2], [0, 0, 0, 1, 1, 2], [0], [0]>} : vector<1x9x9xbf16>, vector<1x9x8xbf16>, vector<1x9x8xf32> -> vector<1x9x8xf32>
    "tpu.trace_stop"() : () -> ()
    %21 = arith.truncf %20 : vector<1x9x8xf32> to vector<1x9x8xbf16>
    %c0_12 = arith.constant 0 : index
    %c0_13 = arith.constant 0 : index
    %c0_14 = arith.constant 0 : index
    %22 = vector.load %arg4[%c0_12, %c0_13, %c0_14] : memref<1x9x8xbf16, #tpu.memory_space<vmem>>, vector<1x9x8xbf16>
    tpu.vector_store %arg4[%c0_12, %c0_13, %c0_14], %21 {strides = array<i32>} : memref<1x9x8xbf16, #tpu.memory_space<vmem>>, vector<1x9x8xbf16>,
    return
  }
  func.func @transform_0(%arg0: i32) -> (i32, i32, i32) {
    %c0_i32 = arith.constant 0 : i32
    %c0_i32_0 = arith.constant 0 : i32
    %c0_i32_1 = arith.constant 0 : i32
    return %arg0, %c0_i32, %c0_i32_0 : i32, i32, i32
  }
  func.func @transform_1(%arg0: i32) -> (i32, i32, i32) {
    %c0_i32 = arith.constant 0 : i32
    %c0_i32_0 = arith.constant 0 : i32
    %c0_i32_1 = arith.constant 0 : i32
    return %arg0, %c0_i32, %c0_i32_0 : i32, i32, i32
  }
  func.func @transform_2(%arg0: i32) -> (i32, i32, i32) {
    %c0_i32 = arith.constant 0 : i32
    %c0_i32_0 = arith.constant 0 : i32
    %c0_i32_1 = arith.constant 0 : i32
    return %arg0, %c0_i32, %c0_i32_0 : i32, i32, i32
  }
  func.func @transform_3(%arg0: i32) -> (i32, i32, i32) {
    %c0_i32 = arith.constant 0 : i32
    %c0_i32_0 = arith.constant 0 : i32
    %c0_i32_1 = arith.constant 0 : i32
    return %arg0, %c0_i32, %c0_i32_0 : i32, i32, i32
  }
}

module attributes {stable_mosaic.version = 11 : i64} {
  func.func @kernel(%arg0: i32, %arg1: memref<18x32xbf16, #tpu.memory_space<vmem>>, %arg2: memref<32x32xbf16, #tpu.memory_space<vmem>>, %arg3: memref<1x32xf32, #tpu.memory_space<vmem>>, %arg4: memref<18x32xf32, #tpu.memory_space<vmem>>, %arg5: memref<18x32xf32, #tpu.memory_space<vmem>>) attributes {dimension_semantics = [#tpu.dimension_semantics<arbitrary>], iteration_bounds = array<i64: 1>, scalar_prefetch = 0 : i64, scratch_operands = 0 : i64, tpu.core_type = #tpu.core_type<tc>, window_params = [{pipeline_mode = #tpu.pipeline_mode<synchronous>, transform_indices = @transform_0, window_bounds = array<i64: 18, 32>}, {pipeline_mode = #tpu.pipeline_mode<synchronous>, transform_indices = @transform_1, window_bounds = array<i64: 32, 32>}, {pipeline_mode = #tpu.pipeline_mode<synchronous>, transform_indices = @transform_2, window_bounds = array<i64: 1, 32>}, {pipeline_mode = #tpu.pipeline_mode<synchronous>, transform_indices = @transform_3, window_bounds = array<i64: 18, 32>}, {pipeline_mode = #tpu.pipeline_mode<synchronous>, transform_indices = @transform_4, window_bounds = array<i64: 18, 32>}]} {
    %c0 = arith.constant 0 : index
    %c0_0 = arith.constant 0 : index
    %0 = vector.load %arg1[%c0, %c0_0] : memref<18x32xbf16, #tpu.memory_space<vmem>>, vector<18x32xbf16>
    %1 = arith.extf %0 : vector<18x32xbf16> to vector<18x32xf32>
    %c0_1 = arith.constant 0 : index
    %c0_2 = arith.constant 0 : index
    %2 = vector.load %arg2[%c0_1, %c0_2] : memref<32x32xbf16, #tpu.memory_space<vmem>>, vector<32x32xbf16>
    %3 = arith.truncf %1 : vector<18x32xf32> to vector<18x32xbf16>
    %cst = arith.constant dense<0.000000e+00> : vector<18x32xf32>
    %4 = tpu.matmul %3, %2, %cst {dimension_numbers = #tpu.dot_dimension_numbers<[1], [0], [0], [1], [0, 0, 1, 1], [], []>} : vector<18x32xbf16>, vector<32x32xbf16>, vector<18x32xf32> -> vector<18x32xf32>
    %c0_3 = arith.constant 0 : index
    %c0_4 = arith.constant 0 : index
    %5 = vector.load %arg3[%c0_3, %c0_4] : memref<1x32xf32, #tpu.memory_space<vmem>>, vector<1x32xf32>
    %6 = vector.broadcast %5 : vector<1x32xf32> to vector<18x32xf32>
    %7 = arith.addf %4, %6 : vector<18x32xf32>
    %c0_5 = arith.constant 0 : index
    %c0_6 = arith.constant 0 : index
    %8 = vector.load %arg4[%c0_5, %c0_6] : memref<18x32xf32, #tpu.memory_space<vmem>>, vector<18x32xf32>
    %9 = arith.addf %7, %8 : vector<18x32xf32>
    %c0_7 = arith.constant 0 : index
    %c0_8 = arith.constant 0 : index
    %10 = vector.load %arg5[%c0_7, %c0_8] : memref<18x32xf32, #tpu.memory_space<vmem>>, vector<18x32xf32>
    tpu.vector_store %arg5[%c0_7, %c0_8], %9 {strides = array<i32>} : memref<18x32xf32, #tpu.memory_space<vmem>>, vector<18x32xf32>,
    return
  }
  func.func @transform_0(%arg0: i32) -> (i32, i32) {
    %c0_i32 = arith.constant 0 : i32
    %c0_i32_0 = arith.constant 0 : i32
    %c0_i32_1 = arith.constant 0 : i32
    return %c0_i32, %c0_i32_0 : i32, i32
  }
  func.func @transform_1(%arg0: i32) -> (i32, i32) {
    %c0_i32 = arith.constant 0 : i32
    %c0_i32_0 = arith.constant 0 : i32
    %c0_i32_1 = arith.constant 0 : i32
    return %c0_i32, %c0_i32_0 : i32, i32
  }
  func.func @transform_2(%arg0: i32) -> (i32, i32) {
    %c0_i32 = arith.constant 0 : i32
    %c0_i32_0 = arith.constant 0 : i32
    %c0_i32_1 = arith.constant 0 : i32
    return %c0_i32, %c0_i32_0 : i32, i32
  }
  func.func @transform_3(%arg0: i32) -> (i32, i32) {
    %c0_i32 = arith.constant 0 : i32
    %c0_i32_0 = arith.constant 0 : i32
    %c0_i32_1 = arith.constant 0 : i32
    return %c0_i32, %c0_i32_0 : i32, i32
  }
  func.func @transform_4(%arg0: i32) -> (i32, i32) {
    %c0_i32 = arith.constant 0 : i32
    %c0_i32_0 = arith.constant 0 : i32
    %c0_i32_1 = arith.constant 0 : i32
    return %c0_i32, %c0_i32_0 : i32, i32
  }
}

module attributes {stable_mosaic.version = 11 : i64} {
  func.func @kernel(%arg0: i32, %arg1: memref<8x32xf32, #tpu.memory_space<vmem>>, %arg2: memref<32x32xbf16, #tpu.memory_space<vmem>>, %arg3: memref<1x32xf32, #tpu.memory_space<vmem>>, %arg4: memref<1x32xf32, #tpu.memory_space<vmem>>, %arg5: memref<1x32xf32, #tpu.memory_space<vmem>>, %arg6: memref<8x32xf32, #tpu.memory_space<vmem>>) attributes {dimension_semantics = [#tpu.dimension_semantics<arbitrary>], iteration_bounds = array<i64: 1>, scalar_prefetch = 0 : i64, scratch_operands = 0 : i64, tpu.core_type = #tpu.core_type<tc>, window_params = [{pipeline_mode = #tpu.pipeline_mode<synchronous>, transform_indices = @transform_0, window_bounds = array<i64: 8, 32>}, {pipeline_mode = #tpu.pipeline_mode<synchronous>, transform_indices = @transform_1, window_bounds = array<i64: 32, 32>}, {pipeline_mode = #tpu.pipeline_mode<synchronous>, transform_indices = @transform_2, window_bounds = array<i64: 1, 32>}, {pipeline_mode = #tpu.pipeline_mode<synchronous>, transform_indices = @transform_3, window_bounds = array<i64: 1, 32>}, {pipeline_mode = #tpu.pipeline_mode<synchronous>, transform_indices = @transform_4, window_bounds = array<i64: 1, 32>}, {pipeline_mode = #tpu.pipeline_mode<synchronous>, transform_indices = @transform_5, window_bounds = array<i64: 8, 32>}]} {
    %c0 = arith.constant 0 : index
    %c0_0 = arith.constant 0 : index
    %0 = vector.load %arg1[%c0, %c0_0] : memref<8x32xf32, #tpu.memory_space<vmem>>, vector<8x32xf32>
    %c0_1 = arith.constant 0 : index
    %c0_2 = arith.constant 0 : index
    %1 = vector.load %arg2[%c0_1, %c0_2] : memref<32x32xbf16, #tpu.memory_space<vmem>>, vector<32x32xbf16>
    %2 = arith.truncf %0 : vector<8x32xf32> to vector<8x32xbf16>
    %cst = arith.constant dense<0.000000e+00> : vector<8x32xf32>
    %3 = tpu.matmul %2, %1, %cst {dimension_numbers = #tpu.dot_dimension_numbers<[1], [0], [0], [1], [0, 0, 1, 1], [], []>} : vector<8x32xbf16>, vector<32x32xbf16>, vector<8x32xf32> -> vector<8x32xf32>
    %c0_3 = arith.constant 0 : index
    %c0_4 = arith.constant 0 : index
    %4 = vector.load %arg3[%c0_3, %c0_4] : memref<1x32xf32, #tpu.memory_space<vmem>>, vector<1x32xf32>
    %5 = vector.broadcast %4 : vector<1x32xf32> to vector<8x32xf32>
    %6 = arith.addf %3, %5 : vector<8x32xf32>
    %c0_5 = arith.constant 0 : index
    %c0_6 = arith.constant 0 : index
    %7 = vector.load %arg4[%c0_5, %c0_6] : memref<1x32xf32, #tpu.memory_space<vmem>>, vector<1x32xf32>
    %c0_7 = arith.constant 0 : index
    %c0_8 = arith.constant 0 : index
    %8 = vector.load %arg5[%c0_7, %c0_8] : memref<1x32xf32, #tpu.memory_space<vmem>>, vector<1x32xf32>
    %cst_9 = arith.constant dense<0.000000e+00> : vector<8xf32>
    %9 = vector.multi_reduction <add>, %6, %cst_9 [1] : vector<8x32xf32> to vector<8xf32>
    %10 = vector.shape_cast %9 : vector<8xf32> to vector<8x1xf32>
    %cst_10 = arith.constant 3.200000e+01 : f32
    %11 = vector.broadcast %cst_10 : f32 to vector<8x1xf32>
    %12 = arith.divf %10, %11 : vector<8x1xf32>
    %13 = vector.broadcast %12 : vector<8x1xf32> to vector<8x32xf32>
    %14 = arith.subf %6, %13 : vector<8x32xf32>
    %15 = arith.mulf %14, %14 : vector<8x32xf32>
    %cst_11 = arith.constant dense<0.000000e+00> : vector<8xf32>
    %16 = vector.multi_reduction <add>, %15, %cst_11 [1] : vector<8x32xf32> to vector<8xf32>
    %17 = vector.shape_cast %16 : vector<8xf32> to vector<8x1xf32>
    %cst_12 = arith.constant 3.200000e+01 : f32
    %18 = vector.broadcast %cst_12 : f32 to vector<8x1xf32>
    %19 = arith.divf %17, %18 : vector<8x1xf32>
    %20 = vector.broadcast %12 : vector<8x1xf32> to vector<8x32xf32>
    %21 = arith.subf %6, %20 : vector<8x32xf32>
    %cst_13 = arith.constant 9.99999974E-6 : f32
    %22 = vector.broadcast %cst_13 : f32 to vector<8x1xf32>
    %23 = arith.addf %19, %22 : vector<8x1xf32>
    %24 = math.rsqrt %23 : vector<8x1xf32>
    %25 = vector.broadcast %24 : vector<8x1xf32> to vector<8x32xf32>
    %26 = arith.mulf %21, %25 : vector<8x32xf32>
    %27 = vector.broadcast %7 : vector<1x32xf32> to vector<8x32xf32>
    %28 = arith.mulf %26, %27 : vector<8x32xf32>
    %29 = vector.broadcast %8 : vector<1x32xf32> to vector<8x32xf32>
    %30 = arith.addf %28, %29 : vector<8x32xf32>
    %c0_14 = arith.constant 0 : index
    %c0_15 = arith.constant 0 : index
    %31 = vector.load %arg6[%c0_14, %c0_15] : memref<8x32xf32, #tpu.memory_space<vmem>>, vector<8x32xf32>
    tpu.vector_store %arg6[%c0_14, %c0_15], %30 {strides = array<i32>} : memref<8x32xf32, #tpu.memory_space<vmem>>, vector<8x32xf32>,
    return
  }
  func.func @transform_0(%arg0: i32) -> (i32, i32) {
    %c0_i32 = arith.constant 0 : i32
    %c0_i32_0 = arith.constant 0 : i32
    %c0_i32_1 = arith.constant 0 : i32
    return %c0_i32, %c0_i32_0 : i32, i32
  }
  func.func @transform_1(%arg0: i32) -> (i32, i32) {
    %c0_i32 = arith.constant 0 : i32
    %c0_i32_0 = arith.constant 0 : i32
    %c0_i32_1 = arith.constant 0 : i32
    return %c0_i32, %c0_i32_0 : i32, i32
  }
  func.func @transform_2(%arg0: i32) -> (i32, i32) {
    %c0_i32 = arith.constant 0 : i32
    %c0_i32_0 = arith.constant 0 : i32
    %c0_i32_1 = arith.constant 0 : i32
    return %c0_i32, %c0_i32_0 : i32, i32
  }
  func.func @transform_3(%arg0: i32) -> (i32, i32) {
    %c0_i32 = arith.constant 0 : i32
    %c0_i32_0 = arith.constant 0 : i32
    %c0_i32_1 = arith.constant 0 : i32
    return %c0_i32, %c0_i32_0 : i32, i32
  }
  func.func @transform_4(%arg0: i32) -> (i32, i32) {
    %c0_i32 = arith.constant 0 : i32
    %c0_i32_0 = arith.constant 0 : i32
    %c0_i32_1 = arith.constant 0 : i32
    return %c0_i32, %c0_i32_0 : i32, i32
  }
  func.func @transform_5(%arg0: i32) -> (i32, i32) {
    %c0_i32 = arith.constant 0 : i32
    %c0_i32_0 = arith.constant 0 : i32
    %c0_i32_1 = arith.constant 0 : i32
    return %c0_i32, %c0_i32_0 : i32, i32
  }
}

module attributes {stable_mosaic.version = 11 : i64} {
  func.func @kernel(%arg0: i32, %arg1: memref<18x32xf32, #tpu.memory_space<vmem>>, %arg2: memref<1x32xf32, #tpu.memory_space<vmem>>, %arg3: memref<1x32xf32, #tpu.memory_space<vmem>>, %arg4: memref<32x128xbf16, #tpu.memory_space<vmem>>, %arg5: memref<1x128xf32, #tpu.memory_space<vmem>>, %arg6: memref<128x32xbf16, #tpu.memory_space<vmem>>, %arg7: memref<1x32xf32, #tpu.memory_space<vmem>>, %arg8: memref<18x32xf32, #tpu.memory_space<vmem>>) attributes {dimension_semantics = [#tpu.dimension_semantics<arbitrary>], iteration_bounds = array<i64: 1>, scalar_prefetch = 0 : i64, scratch_operands = 0 : i64, tpu.core_type = #tpu.core_type<tc>, window_params = [{pipeline_mode = #tpu.pipeline_mode<synchronous>, transform_indices = @transform_0, window_bounds = array<i64: 18, 32>}, {pipeline_mode = #tpu.pipeline_mode<synchronous>, transform_indices = @transform_1, window_bounds = array<i64: 1, 32>}, {pipeline_mode = #tpu.pipeline_mode<synchronous>, transform_indices = @transform_2, window_bounds = array<i64: 1, 32>}, {pipeline_mode = #tpu.pipeline_mode<synchronous>, transform_indices = @transform_3, window_bounds = array<i64: 32, 128>}, {pipeline_mode = #tpu.pipeline_mode<synchronous>, transform_indices = @transform_4, window_bounds = array<i64: 1, 128>}, {pipeline_mode = #tpu.pipeline_mode<synchronous>, transform_indices = @transform_5, window_bounds = array<i64: 128, 32>}, {pipeline_mode = #tpu.pipeline_mode<synchronous>, transform_indices = @transform_6, window_bounds = array<i64: 1, 32>}, {pipeline_mode = #tpu.pipeline_mode<synchronous>, transform_indices = @transform_7, window_bounds = array<i64: 18, 32>}]} {
    %c0 = arith.constant 0 : index
    %c0_0 = arith.constant 0 : index
    %0 = vector.load %arg1[%c0, %c0_0] : memref<18x32xf32, #tpu.memory_space<vmem>>, vector<18x32xf32>
    %c0_1 = arith.constant 0 : index
    %c0_2 = arith.constant 0 : index
    %1 = vector.load %arg2[%c0_1, %c0_2] : memref<1x32xf32, #tpu.memory_space<vmem>>, vector<1x32xf32>
    %c0_3 = arith.constant 0 : index
    %c0_4 = arith.constant 0 : index
    %2 = vector.load %arg3[%c0_3, %c0_4] : memref<1x32xf32, #tpu.memory_space<vmem>>, vector<1x32xf32>
    %cst = arith.constant dense<0.000000e+00> : vector<18xf32>
    %3 = vector.multi_reduction <add>, %0, %cst [1] : vector<18x32xf32> to vector<18xf32>
    %4 = vector.shape_cast %3 : vector<18xf32> to vector<18x1xf32>
    %cst_5 = arith.constant 3.200000e+01 : f32
    %5 = vector.broadcast %cst_5 : f32 to vector<18x1xf32>
    %6 = arith.divf %4, %5 : vector<18x1xf32>
    %7 = vector.broadcast %6 : vector<18x1xf32> to vector<18x32xf32>
    %8 = arith.subf %0, %7 : vector<18x32xf32>
    %9 = arith.mulf %8, %8 : vector<18x32xf32>
    %cst_6 = arith.constant dense<0.000000e+00> : vector<18xf32>
    %10 = vector.multi_reduction <add>, %9, %cst_6 [1] : vector<18x32xf32> to vector<18xf32>
    %11 = vector.shape_cast %10 : vector<18xf32> to vector<18x1xf32>
    %cst_7 = arith.constant 3.200000e+01 : f32
    %12 = vector.broadcast %cst_7 : f32 to vector<18x1xf32>
    %13 = arith.divf %11, %12 : vector<18x1xf32>
    %14 = vector.broadcast %6 : vector<18x1xf32> to vector<18x32xf32>
    %15 = arith.subf %0, %14 : vector<18x32xf32>
    %cst_8 = arith.constant 9.99999974E-6 : f32
    %16 = vector.broadcast %cst_8 : f32 to vector<18x1xf32>
    %17 = arith.addf %13, %16 : vector<18x1xf32>
    %18 = math.rsqrt %17 : vector<18x1xf32>
    %19 = vector.broadcast %18 : vector<18x1xf32> to vector<18x32xf32>
    %20 = arith.mulf %15, %19 : vector<18x32xf32>
    %21 = vector.broadcast %1 : vector<1x32xf32> to vector<18x32xf32>
    %22 = arith.mulf %20, %21 : vector<18x32xf32>
    %23 = vector.broadcast %2 : vector<1x32xf32> to vector<18x32xf32>
    %24 = arith.addf %22, %23 : vector<18x32xf32>
    %25 = arith.truncf %24 : vector<18x32xf32> to vector<18x32xbf16>
    %c0_9 = arith.constant 0 : index
    %c0_10 = arith.constant 0 : index
    %26 = vector.load %arg4[%c0_9, %c0_10] : memref<32x128xbf16, #tpu.memory_space<vmem>>, vector<32x128xbf16>
    %cst_11 = arith.constant dense<0.000000e+00> : vector<18x128xf32>
    %27 = tpu.matmul %25, %26, %cst_11 {dimension_numbers = #tpu.dot_dimension_numbers<[1], [0], [0], [1], [0, 0, 1, 1], [], []>} : vector<18x32xbf16>, vector<32x128xbf16>, vector<18x128xf32> -> vector<18x128xf32>
    %c0_12 = arith.constant 0 : index
    %c0_13 = arith.constant 0 : index
    %28 = vector.load %arg5[%c0_12, %c0_13] : memref<1x128xf32, #tpu.memory_space<vmem>>, vector<1x128xf32>
    %29 = vector.broadcast %28 : vector<1x128xf32> to vector<18x128xf32>
    %30 = arith.addf %27, %29 : vector<18x128xf32>
    %cst_14 = arith.constant 5.000000e-01 : f32
    %31 = vector.broadcast %cst_14 : f32 to vector<18x128xf32>
    %32 = arith.mulf %31, %30 : vector<18x128xf32>
    %cst_15 = arith.constant 0.707106769 : f32
    %33 = vector.broadcast %cst_15 : f32 to vector<18x128xf32>
    %34 = arith.mulf %30, %33 : vector<18x128xf32>
    %35 = math.erf %34 : vector<18x128xf32>
    %cst_16 = arith.constant 1.000000e+00 : f32
    %36 = vector.broadcast %cst_16 : f32 to vector<18x128xf32>
    %37 = arith.addf %36, %35 : vector<18x128xf32>
    %38 = arith.mulf %32, %37 : vector<18x128xf32>
    %39 = arith.truncf %38 : vector<18x128xf32> to vector<18x128xbf16>
    %c0_17 = arith.constant 0 : index
    %c0_18 = arith.constant 0 : index
    %40 = vector.load %arg6[%c0_17, %c0_18] : memref<128x32xbf16, #tpu.memory_space<vmem>>, vector<128x32xbf16>
    %cst_19 = arith.constant dense<0.000000e+00> : vector<18x32xf32>
    %41 = tpu.matmul %39, %40, %cst_19 {dimension_numbers = #tpu.dot_dimension_numbers<[1], [0], [0], [1], [0, 0, 1, 1], [], []>} : vector<18x128xbf16>, vector<128x32xbf16>, vector<18x32xf32> -> vector<18x32xf32>
    %c0_20 = arith.constant 0 : index
    %c0_21 = arith.constant 0 : index
    %42 = vector.load %arg7[%c0_20, %c0_21] : memref<1x32xf32, #tpu.memory_space<vmem>>, vector<1x32xf32>
    %43 = vector.broadcast %42 : vector<1x32xf32> to vector<18x32xf32>
    %44 = arith.addf %41, %43 : vector<18x32xf32>
    %45 = arith.addf %0, %44 : vector<18x32xf32>
    %c0_22 = arith.constant 0 : index
    %c0_23 = arith.constant 0 : index
    %46 = vector.load %arg8[%c0_22, %c0_23] : memref<18x32xf32, #tpu.memory_space<vmem>>, vector<18x32xf32>
    tpu.vector_store %arg8[%c0_22, %c0_23], %45 {strides = array<i32>} : memref<18x32xf32, #tpu.memory_space<vmem>>, vector<18x32xf32>,
    return
  }
  func.func @transform_0(%arg0: i32) -> (i32, i32) {
    %c0_i32 = arith.constant 0 : i32
    %c0_i32_0 = arith.constant 0 : i32
    %c0_i32_1 = arith.constant 0 : i32
    return %c0_i32, %c0_i32_0 : i32, i32
  }
  func.func @transform_1(%arg0: i32) -> (i32, i32) {
    %c0_i32 = arith.constant 0 : i32
    %c0_i32_0 = arith.constant 0 : i32
    %c0_i32_1 = arith.constant 0 : i32
    return %c0_i32, %c0_i32_0 : i32, i32
  }
  func.func @transform_2(%arg0: i32) -> (i32, i32) {
    %c0_i32 = arith.constant 0 : i32
    %c0_i32_0 = arith.constant 0 : i32
    %c0_i32_1 = arith.constant 0 : i32
    return %c0_i32, %c0_i32_0 : i32, i32
  }
  func.func @transform_3(%arg0: i32) -> (i32, i32) {
    %c0_i32 = arith.constant 0 : i32
    %c0_i32_0 = arith.constant 0 : i32
    %c0_i32_1 = arith.constant 0 : i32
    return %c0_i32, %c0_i32_0 : i32, i32
  }
  func.func @transform_4(%arg0: i32) -> (i32, i32) {
    %c0_i32 = arith.constant 0 : i32
    %c0_i32_0 = arith.constant 0 : i32
    %c0_i32_1 = arith.constant 0 : i32
    return %c0_i32, %c0_i32_0 : i32, i32
  }
  func.func @transform_5(%arg0: i32) -> (i32, i32) {
    %c0_i32 = arith.constant 0 : i32
    %c0_i32_0 = arith.constant 0 : i32
    %c0_i32_1 = arith.constant 0 : i32
    return %c0_i32, %c0_i32_0 : i32, i32
  }
  func.func @transform_6(%arg0: i32) -> (i32, i32) {
    %c0_i32 = arith.constant 0 : i32
    %c0_i32_0 = arith.constant 0 : i32
    %c0_i32_1 = arith.constant 0 : i32
    return %c0_i32, %c0_i32_0 : i32, i32
  }
  func.func @transform_7(%arg0: i32) -> (i32, i32) {
    %c0_i32 = arith.constant 0 : i32
    %c0_i32_0 = arith.constant 0 : i32
    %c0_i32_1 = arith.constant 0 : i32
    return %c0_i32, %c0_i32_0 : i32, i32
  }
}

module attributes {stable_mosaic.version = 11 : i64} {
  func.func @kernel(%arg0: i32, %arg1: memref<8x32xf32, #tpu.memory_space<vmem>>, %arg2: memref<32x64xbf16, #tpu.memory_space<vmem>>, %arg3: memref<1x64xf32, #tpu.memory_space<vmem>>, %arg4: memref<8x64xbf16, #tpu.memory_space<vmem>>) attributes {dimension_semantics = [#tpu.dimension_semantics<arbitrary>], iteration_bounds = array<i64: 1>, scalar_prefetch = 0 : i64, scratch_operands = 0 : i64, tpu.core_type = #tpu.core_type<tc>, window_params = [{pipeline_mode = #tpu.pipeline_mode<synchronous>, transform_indices = @transform_0, window_bounds = array<i64: 8, 32>}, {pipeline_mode = #tpu.pipeline_mode<synchronous>, transform_indices = @transform_1, window_bounds = array<i64: 32, 64>}, {pipeline_mode = #tpu.pipeline_mode<synchronous>, transform_indices = @transform_2, window_bounds = array<i64: 1, 64>}, {pipeline_mode = #tpu.pipeline_mode<synchronous>, transform_indices = @transform_3, window_bounds = array<i64: 8, 64>}]} {
    %c0 = arith.constant 0 : index
    %c0_0 = arith.constant 0 : index
    %0 = vector.load %arg1[%c0, %c0_0] : memref<8x32xf32, #tpu.memory_space<vmem>>, vector<8x32xf32>
    %c0_1 = arith.constant 0 : index
    %c0_2 = arith.constant 0 : index
    %1 = vector.load %arg2[%c0_1, %c0_2] : memref<32x64xbf16, #tpu.memory_space<vmem>>, vector<32x64xbf16>
    %2 = arith.truncf %0 : vector<8x32xf32> to vector<8x32xbf16>
    %cst = arith.constant dense<0.000000e+00> : vector<8x64xf32>
    %3 = tpu.matmul %2, %1, %cst {dimension_numbers = #tpu.dot_dimension_numbers<[1], [0], [0], [1], [0, 0, 1, 1], [], []>} : vector<8x32xbf16>, vector<32x64xbf16>, vector<8x64xf32> -> vector<8x64xf32>
    %c0_3 = arith.constant 0 : index
    %c0_4 = arith.constant 0 : index
    %4 = vector.load %arg3[%c0_3, %c0_4] : memref<1x64xf32, #tpu.memory_space<vmem>>, vector<1x64xf32>
    %5 = vector.broadcast %4 : vector<1x64xf32> to vector<8x64xf32>
    %6 = arith.addf %3, %5 : vector<8x64xf32>
    %7 = arith.truncf %6 : vector<8x64xf32> to vector<8x64xbf16>
    %c0_5 = arith.constant 0 : index
    %c0_6 = arith.constant 0 : index
    %8 = vector.load %arg4[%c0_5, %c0_6] : memref<8x64xbf16, #tpu.memory_space<vmem>>, vector<8x64xbf16>
    tpu.vector_store %arg4[%c0_5, %c0_6], %7 {strides = array<i32>} : memref<8x64xbf16, #tpu.memory_space<vmem>>, vector<8x64xbf16>,
    return
  }
  func.func @transform_0(%arg0: i32) -> (i32, i32) {
    %c0_i32 = arith.constant 0 : i32
    %c0_i32_0 = arith.constant 0 : i32
    %c0_i32_1 = arith.constant 0 : i32
    return %c0_i32, %c0_i32_0 : i32, i32
  }
  func.func @transform_1(%arg0: i32) -> (i32, i32) {
    %c0_i32 = arith.constant 0 : i32
    %c0_i32_0 = arith.constant 0 : i32
    %c0_i32_1 = arith.constant 0 : i32
    return %c0_i32, %c0_i32_0 : i32, i32
  }
  func.func @transform_2(%arg0: i32) -> (i32, i32) {
    %c0_i32 = arith.constant 0 : i32
    %c0_i32_0 = arith.constant 0 : i32
    %c0_i32_1 = arith.constant 0 : i32
    return %c0_i32, %c0_i32_0 : i32, i32
  }
  func.func @transform_3(%arg0: i32) -> (i32, i32) {
    %c0_i32 = arith.constant 0 : i32
    %c0_i32_0 = arith.constant 0 : i32
    %c0_i32_1 = arith.constant 0 : i32
    return %c0_i32, %c0_i32_0 : i32, i32
  }
}

module attributes {stable_mosaic.version = 11 : i64} {
  func.func @kernel(%arg0: i32, %arg1: memref<16x32xf32, #tpu.memory_space<vmem>>, %arg2: memref<1x32xf32, #tpu.memory_space<vmem>>, %arg3: memref<32x64xbf16, #tpu.memory_space<vmem>>, %arg4: memref<16x64xf32, #tpu.memory_space<vmem>>) attributes {dimension_semantics = [#tpu.dimension_semantics<arbitrary>], iteration_bounds = array<i64: 1>, scalar_prefetch = 0 : i64, scratch_operands = 0 : i64, tpu.core_type = #tpu.core_type<tc>, window_params = [{pipeline_mode = #tpu.pipeline_mode<synchronous>, transform_indices = @transform_0, window_bounds = array<i64: 16, 32>}, {pipeline_mode = #tpu.pipeline_mode<synchronous>, transform_indices = @transform_1, window_bounds = array<i64: 1, 32>}, {pipeline_mode = #tpu.pipeline_mode<synchronous>, transform_indices = @transform_2, window_bounds = array<i64: 32, 64>}, {pipeline_mode = #tpu.pipeline_mode<synchronous>, transform_indices = @transform_3, window_bounds = array<i64: 16, 64>}]} {
    %c0 = arith.constant 0 : index
    %c0_0 = arith.constant 0 : index
    %0 = vector.load %arg1[%c0, %c0_0] : memref<16x32xf32, #tpu.memory_space<vmem>>, vector<16x32xf32>
    %c0_1 = arith.constant 0 : index
    %c0_2 = arith.constant 0 : index
    %1 = vector.load %arg2[%c0_1, %c0_2] : memref<1x32xf32, #tpu.memory_space<vmem>>, vector<1x32xf32>
    %2 = arith.mulf %0, %0 : vector<16x32xf32>
    %cst = arith.constant dense<0.000000e+00> : vector<16xf32>
    %3 = vector.multi_reduction <add>, %2, %cst [1] : vector<16x32xf32> to vector<16xf32>
    %4 = vector.shape_cast %3 : vector<16xf32> to vector<16x1xf32>
    %cst_3 = arith.constant 3.200000e+01 : f32
    %5 = vector.broadcast %cst_3 : f32 to vector<16x1xf32>
    %6 = arith.divf %4, %5 : vector<16x1xf32>
    %cst_4 = arith.constant 9.99999997E-7 : f32
    %7 = vector.broadcast %cst_4 : f32 to vector<16x1xf32>
    %8 = arith.addf %6, %7 : vector<16x1xf32>
    %9 = math.rsqrt %8 : vector<16x1xf32>
    %10 = vector.broadcast %9 : vector<16x1xf32> to vector<16x32xf32>
    %11 = arith.mulf %0, %10 : vector<16x32xf32>
    %12 = vector.broadcast %1 : vector<1x32xf32> to vector<16x32xf32>
    %13 = arith.mulf %11, %12 : vector<16x32xf32>
    %c0_5 = arith.constant 0 : index
    %c0_6 = arith.constant 0 : index
    %14 = vector.load %arg3[%c0_5, %c0_6] : memref<32x64xbf16, #tpu.memory_space<vmem>>, vector<32x64xbf16>
    %15 = arith.truncf %13 : vector<16x32xf32> to vector<16x32xbf16>
    %cst_7 = arith.constant dense<0.000000e+00> : vector<16x64xf32>
    %16 = tpu.matmul %15, %14, %cst_7 {dimension_numbers = #tpu.dot_dimension_numbers<[1], [0], [0], [1], [0, 0, 1, 1], [], []>} : vector<16x32xbf16>, vector<32x64xbf16>, vector<16x64xf32> -> vector<16x64xf32>
    %c0_8 = arith.constant 0 : index
    %c0_9 = arith.constant 0 : index
    %17 = vector.load %arg4[%c0_8, %c0_9] : memref<16x64xf32, #tpu.memory_space<vmem>>, vector<16x64xf32>
    tpu.vector_store %arg4[%c0_8, %c0_9], %16 {strides = array<i32>} : memref<16x64xf32, #tpu.memory_space<vmem>>, vector<16x64xf32>,
    return
  }
  func.func @transform_0(%arg0: i32) -> (i32, i32) {
    %c0_i32 = arith.constant 0 : i32
    %c0_i32_0 = arith.constant 0 : i32
    %c0_i32_1 = arith.constant 0 : i32
    return %c0_i32, %c0_i32_0 : i32, i32
  }
  func.func @transform_1(%arg0: i32) -> (i32, i32) {
    %c0_i32 = arith.constant 0 : i32
    %c0_i32_0 = arith.constant 0 : i32
    %c0_i32_1 = arith.constant 0 : i32
    return %c0_i32, %c0_i32_0 : i32, i32
  }
  func.func @transform_2(%arg0: i32) -> (i32, i32) {
    %c0_i32 = arith.constant 0 : i32
    %c0_i32_0 = arith.constant 0 : i32
    %c0_i32_1 = arith.constant 0 : i32
    return %c0_i32, %c0_i32_0 : i32, i32
  }
  func.func @transform_3(%arg0: i32) -> (i32, i32) {
    %c0_i32 = arith.constant 0 : i32
    %c0_i32_0 = arith.constant 0 : i32
    %c0_i32_1 = arith.constant 0 : i32
    return %c0_i32, %c0_i32_0 : i32, i32
  }
}

module attributes {stable_mosaic.version = 11 : i64} {
  func.func @kernel(%arg0: i32, %arg1: memref<1x8x8xbf16, #tpu.memory_space<vmem>>, %arg2: memref<1x12x8xbf16, #tpu.memory_space<vmem>>, %arg3: memref<1x12x8xbf16, #tpu.memory_space<vmem>>, %arg4: memref<8x8xf32, #tpu.memory_space<vmem>>, %arg5: memref<8x8xf32, #tpu.memory_space<vmem>>, %arg6: memref<12x8xf32, #tpu.memory_space<vmem>>, %arg7: memref<12x8xf32, #tpu.memory_space<vmem>>, %arg8: memref<1x1x1xf32, #tpu.memory_space<vmem>>, %arg9: memref<1x8x8xbf16, #tpu.memory_space<vmem>>) attributes {dimension_semantics = [#tpu.dimension_semantics<parallel>], iteration_bounds = array<i64: 8>, scalar_prefetch = 0 : i64, scratch_operands = 0 : i64, tpu.core_type = #tpu.core_type<tc>, window_params = [{transform_indices = @transform_0, window_bounds = array<i64: 1, 8, 8>}, {transform_indices = @transform_1, window_bounds = array<i64: 1, 12, 8>}, {transform_indices = @transform_2, window_bounds = array<i64: 1, 12, 8>}, {pipeline_mode = #tpu.pipeline_mode<synchronous>, transform_indices = @transform_3, window_bounds = array<i64: 8, 8>}, {pipeline_mode = #tpu.pipeline_mode<synchronous>, transform_indices = @transform_4, window_bounds = array<i64: 8, 8>}, {pipeline_mode = #tpu.pipeline_mode<synchronous>, transform_indices = @transform_5, window_bounds = array<i64: 12, 8>}, {pipeline_mode = #tpu.pipeline_mode<synchronous>, transform_indices = @transform_6, window_bounds = array<i64: 12, 8>}, {transform_indices = @transform_7, window_bounds = array<i64: 1, 1, 1>}, {transform_indices = @transform_8, window_bounds = array<i64: 1, 8, 8>}]} {
    %c0 = arith.constant 0 : index
    %c0_0 = arith.constant 0 : index
    %c0_1 = arith.constant 0 : index
    %0 = vector.load %arg1[%c0, %c0_0, %c0_1] : memref<1x8x8xbf16, #tpu.memory_space<vmem>>, vector<1x8x8xbf16>
    %1 = arith.extf %0 : vector<1x8x8xbf16> to vector<1x8x8xf32>
    %c0_2 = arith.constant 0 : index
    %c0_3 = arith.constant 0 : index
    %c0_4 = arith.constant 0 : index
    %2 = vector.load %arg2[%c0_2, %c0_3, %c0_4] : memref<1x12x8xbf16, #tpu.memory_space<vmem>>, vector<1x12x8xbf16>
    %3 = arith.extf %2 : vector<1x12x8xbf16> to vector<1x12x8xf32>
    %c0_5 = arith.constant 0 : index
    %c0_6 = arith.constant 0 : index
    %c0_7 = arith.constant 0 : index
    %4 = vector.load %arg3[%c0_5, %c0_6, %c0_7] : memref<1x12x8xbf16, #tpu.memory_space<vmem>>, vector<1x12x8xbf16>
    %c0_8 = arith.constant 0 : index
    %c0_9 = arith.constant 0 : index
    %5 = vector.load %arg4[%c0_8, %c0_9] : memref<8x8xf32, #tpu.memory_space<vmem>>, vector<8x8xf32>
    %c0_10 = arith.constant 0 : index
    %c0_11 = arith.constant 0 : index
    %6 = vector.load %arg5[%c0_10, %c0_11] : memref<8x8xf32, #tpu.memory_space<vmem>>, vector<8x8xf32>
    %c0_12 = arith.constant 0 : index
    %c0_13 = arith.constant 0 : index
    %7 = vector.load %arg6[%c0_12, %c0_13] : memref<12x8xf32, #tpu.memory_space<vmem>>, vector<12x8xf32>
    %c0_14 = arith.constant 0 : index
    %c0_15 = arith.constant 0 : index
    %8 = vector.load %arg7[%c0_14, %c0_15] : memref<12x8xf32, #tpu.memory_space<vmem>>, vector<12x8xf32>
    %9 = vector.shape_cast %5 : vector<8x8xf32> to vector<1x8x8xf32>
    %10 = arith.mulf %1, %9 : vector<1x8x8xf32>
    %c4_i32 = arith.constant 4 : i32
    %11 = tpu.dynamic_rotate %1 by %c4_i32 dim 2 : vector<1x8x8xf32>, i32 -> vector<1x8x8xf32>
    %12 = tpu.iota {dimensions = array<i32: 2>} : vector<1x8x8xi32>
    %c4_i32_16 = arith.constant 4 : i32
    %13 = vector.broadcast %c4_i32_16 : i32 to vector<1x8x8xi32>
    %14 = arith.cmpi slt, %12, %13 : vector<1x8x8xi32>
    %cst = arith.constant 0.000000e+00 : f32
    %15 = vector.broadcast %cst : f32 to vector<1x8x8xf32>
    %16 = arith.subf %15, %11 : vector<1x8x8xf32>
    %17 = arith.select %14, %16, %11 : vector<1x8x8xi1>, vector<1x8x8xf32>
    %18 = vector.shape_cast %6 : vector<8x8xf32> to vector<1x8x8xf32>
    %19 = arith.mulf %17, %18 : vector<1x8x8xf32>
    %20 = arith.addf %10, %19 : vector<1x8x8xf32>
    %21 = vector.shape_cast %7 : vector<12x8xf32> to vector<1x12x8xf32>
    %22 = arith.mulf %3, %21 : vector<1x12x8xf32>
    %c4_i32_17 = arith.constant 4 : i32
    %23 = tpu.dynamic_rotate %3 by %c4_i32_17 dim 2 : vector<1x12x8xf32>, i32 -> vector<1x12x8xf32>
    %24 = tpu.iota {dimensions = array<i32: 2>} : vector<1x12x8xi32>
    %c4_i32_18 = arith.constant 4 : i32
    %25 = vector.broadcast %c4_i32_18 : i32 to vector<1x12x8xi32>
    %26 = arith.cmpi slt, %24, %25 : vector<1x12x8xi32>
    %cst_19 = arith.constant 0.000000e+00 : f32
    %27 = vector.broadcast %cst_19 : f32 to vector<1x12x8xf32>
    %28 = arith.subf %27, %23 : vector<1x12x8xf32>
    %29 = arith.select %26, %28, %23 : vector<1x12x8xi1>, vector<1x12x8xf32>
    %30 = vector.shape_cast %8 : vector<12x8xf32> to vector<1x12x8xf32>
    %31 = arith.mulf %29, %30 : vector<1x12x8xf32>
    %32 = arith.addf %22, %31 : vector<1x12x8xf32>
    %33 = arith.truncf %20 : vector<1x8x8xf32> to vector<1x8x8xbf16>
    %34 = arith.truncf %32 : vector<1x12x8xf32> to vector<1x12x8xbf16>
    "tpu.trace_start"() <{level = 10 : i32, message = "bqd,bkd->bqk"}> : () -> ()
    %cst_20 = arith.constant dense<0.000000e+00> : vector<1x8x12xf32>
    %35 = tpu.matmul %33, %34, %cst_20 {dimension_numbers = #tpu.dot_dimension_numbers<[2], [2], [1], [1], [0, 0, 0, 1, 1, 1], [0], [0]>} : vector<1x8x8xbf16>, vector<1x12x8xbf16>, vector<1x8x12xf32> -> vector<1x8x12xf32>
    "tpu.trace_stop"() : () -> ()
    %cst_21 = arith.constant 0.353553385 : f32
    %36 = vector.broadcast %cst_21 : f32 to vector<1x8x12xf32>
    %37 = arith.mulf %35, %36 : vector<1x8x12xf32>
    %38 = tpu.iota {dimensions = array<i32: 2>} : vector<1x8x12xi32>
    %39 = tpu.iota {dimensions = array<i32: 1>} : vector<1x8x12xi32>
    %c8_i32 = arith.constant 8 : i32
    %40 = vector.broadcast %c8_i32 : i32 to vector<1x8x12xi32>
    %41 = arith.cmpi slt, %38, %40 : vector<1x8x12xi32>
    %42 = arith.cmpi sgt, %38, %39 : vector<1x8x12xi32>
    %43 = arith.andi %41, %42 : vector<1x8x12xi1>
    %cst_22 = arith.constant -1.000000e+30 : f32
    %44 = vector.broadcast %cst_22 : f32 to vector<1x8x12xf32>
    %45 = arith.select %43, %44, %37 : vector<1x8x12xi1>, vector<1x8x12xf32>
    %c0_23 = arith.constant 0 : index
    %c0_24 = arith.constant 0 : index
    %c0_25 = arith.constant 0 : index
    %46 = vector.load %arg8[%c0_23, %c0_24, %c0_25] : memref<1x1x1xf32, #tpu.memory_space<vmem>>, vector<1x1x1xf32>
    %c8_i32_26 = arith.constant 8 : i32
    %47 = vector.broadcast %c8_i32_26 : i32 to vector<1x8x12xi32>
    %48 = arith.cmpi slt, %38, %47 : vector<1x8x12xi32>
    %cst_27 = arith.constant -1.000000e+30 : f32
    %49 = vector.broadcast %cst_27 : f32 to vector<1x8x12xf32>
    %50 = arith.select %48, %45, %49 : vector<1x8x12xi1>, vector<1x8x12xf32>
    %cst_28 = arith.constant -1.000000e+30 : f32
    %51 = vector.broadcast %cst_28 : f32 to vector<1x8x12xf32>
    %52 = arith.select %48, %51, %45 : vector<1x8x12xi1>, vector<1x8x12xf32>
    %cst_29 = arith.constant dense<0xFF800000> : vector<1x8xf32>
    %53 = vector.multi_reduction <maximumf>, %50, %cst_29 [2] : vector<1x8x12xf32> to vector<1x8xf32>
    %54 = vector.shape_cast %53 : vector<1x8xf32> to vector<1x8x1xf32>
    %55 = vector.broadcast %54 : vector<1x8x1xf32> to vector<1x8x12xf32>
    %56 = arith.subf %50, %55 : vector<1x8x12xf32>
    %57 = math.exp %56 : vector<1x8x12xf32>
    %cst_30 = arith.constant dense<0xFF800000> : vector<1x8xf32>
    %58 = vector.multi_reduction <maximumf>, %52, %cst_30 [2] : vector<1x8x12xf32> to vector<1x8xf32>
    %59 = vector.shape_cast %58 : vector<1x8xf32> to vector<1x8x1xf32>
    %60 = vector.broadcast %59 : vector<1x8x1xf32> to vector<1x8x12xf32>
    %61 = arith.subf %52, %60 : vector<1x8x12xf32>
    %62 = math.exp %61 : vector<1x8x12xf32>
    %cst_31 = arith.constant dense<0.000000e+00> : vector<1x8xf32>
    %63 = vector.multi_reduction <add>, %57, %cst_31 [2] : vector<1x8x12xf32> to vector<1x8xf32>
    %64 = vector.shape_cast %63 : vector<1x8xf32> to vector<1x8x1xf32>
    %65 = vector.broadcast %64 : vector<1x8x1xf32> to vector<1x8x12xf32>
    %66 = arith.divf %57, %65 : vector<1x8x12xf32>
    %cst_32 = arith.constant dense<0.000000e+00> : vector<1x8xf32>
    %67 = vector.multi_reduction <add>, %62, %cst_32 [2] : vector<1x8x12xf32> to vector<1x8xf32>
    %68 = vector.shape_cast %67 : vector<1x8xf32> to vector<1x8x1xf32>
    %69 = vector.broadcast %68 : vector<1x8x1xf32> to vector<1x8x12xf32>
    %70 = arith.divf %62, %69 : vector<1x8x12xf32>
    %71 = vector.broadcast %46 : vector<1x1x1xf32> to vector<1x8x12xf32>
    %72 = arith.mulf %71, %70 : vector<1x8x12xf32>
    %73 = arith.addf %66, %72 : vector<1x8x12xf32>
    %74 = arith.truncf %73 : vector<1x8x12xf32> to vector<1x8x12xbf16>
    "tpu.trace_start"() <{level = 10 : i32, message = "bqk,bkd->bqd"}> : () -> ()
    %cst_33 = arith.constant dense<0.000000e+00> : vector<1x8x8xf32>
    %75 = tpu.matmul %74, %4, %cst_33 {dimension_numbers = #tpu.dot_dimension_numbers<[2], [1], [1], [2], [0, 0, 0, 1, 1, 2], [0], [0]>} : vector<1x8x12xbf16>, vector<1x12x8xbf16>, vector<1x8x8xf32> -> vector<1x8x8xf32>
    "tpu.trace_stop"() : () -> ()
    %76 = arith.truncf %75 : vector<1x8x8xf32> to vector<1x8x8xbf16>
    %c0_34 = arith.constant 0 : index
    %c0_35 = arith.constant 0 : index
    %c0_36 = arith.constant 0 : index
    %77 = vector.load %arg9[%c0_34, %c0_35, %c0_36] : memref<1x8x8xbf16, #tpu.memory_space<vmem>>, vector<1x8x8xbf16>
    tpu.vector_store %arg9[%c0_34, %c0_35, %c0_36], %76 {strides = array<i32>} : memref<1x8x8xbf16, #tpu.memory_space<vmem>>, vector<1x8x8xbf16>,
    return
  }
  func.func @transform_0(%arg0: i32) -> (i32, i32, i32) {
    %c0_i32 = arith.constant 0 : i32
    %c0_i32_0 = arith.constant 0 : i32
    %c0_i32_1 = arith.constant 0 : i32
    return %arg0, %c0_i32, %c0_i32_0 : i32, i32, i32
  }
  func.func @transform_1(%arg0: i32) -> (i32, i32, i32) {
    %c0_i32 = arith.constant 0 : i32
    %c0_i32_0 = arith.constant 0 : i32
    %c0_i32_1 = arith.constant 0 : i32
    return %arg0, %c0_i32, %c0_i32_0 : i32, i32, i32
  }
  func.func @transform_2(%arg0: i32) -> (i32, i32, i32) {
    %c0_i32 = arith.constant 0 : i32
    %c0_i32_0 = arith.constant 0 : i32
    %c0_i32_1 = arith.constant 0 : i32
    return %arg0, %c0_i32, %c0_i32_0 : i32, i32, i32
  }
  func.func @transform_3(%arg0: i32) -> (i32, i32) {
    %c0_i32 = arith.constant 0 : i32
    %c0_i32_0 = arith.constant 0 : i32
    %c0_i32_1 = arith.constant 0 : i32
    return %c0_i32, %c0_i32_0 : i32, i32
  }
  func.func @transform_4(%arg0: i32) -> (i32, i32) {
    %c0_i32 = arith.constant 0 : i32
    %c0_i32_0 = arith.constant 0 : i32
    %c0_i32_1 = arith.constant 0 : i32
    return %c0_i32, %c0_i32_0 : i32, i32
  }
  func.func @transform_5(%arg0: i32) -> (i32, i32) {
    %c0_i32 = arith.constant 0 : i32
    %c0_i32_0 = arith.constant 0 : i32
    %c0_i32_1 = arith.constant 0 : i32
    return %c0_i32, %c0_i32_0 : i32, i32
  }
  func.func @transform_6(%arg0: i32) -> (i32, i32) {
    %c0_i32 = arith.constant 0 : i32
    %c0_i32_0 = arith.constant 0 : i32
    %c0_i32_1 = arith.constant 0 : i32
    return %c0_i32, %c0_i32_0 : i32, i32
  }
  func.func @transform_7(%arg0: i32) -> (i32, i32, i32) {
    %c0_i32 = arith.constant 0 : i32
    %c0_i32_0 = arith.constant 0 : i32
    %c0_i32_1 = arith.constant 0 : i32
    return %arg0, %c0_i32, %c0_i32_0 : i32, i32, i32
  }
  func.func @transform_8(%arg0: i32) -> (i32, i32, i32) {
    %c0_i32 = arith.constant 0 : i32
    %c0_i32_0 = arith.constant 0 : i32
    %c0_i32_1 = arith.constant 0 : i32
    return %arg0, %c0_i32, %c0_i32_0 : i32, i32, i32
  }
}

module attributes {stable_mosaic.version = 11 : i64} {
  func.func @_ce_kernel(%arg0: i32, %arg1: memref<14x64xf32, #tpu.memory_space<vmem>>, %arg2: memref<14x1xi32, #tpu.memory_space<vmem>>, %arg3: memref<1x1xf32, #tpu.memory_space<smem>>, %arg4: memref<1x1xf32, #tpu.memory_space<smem>>) attributes {dimension_semantics = [#tpu.dimension_semantics<arbitrary>], iteration_bounds = array<i64: 1>, scalar_prefetch = 0 : i64, scratch_operands = 0 : i64, tpu.core_type = #tpu.core_type<tc>, window_params = [{pipeline_mode = #tpu.pipeline_mode<synchronous>, transform_indices = @transform_0, window_bounds = array<i64: 14, 64>}, {pipeline_mode = #tpu.pipeline_mode<synchronous>, transform_indices = @transform_1, window_bounds = array<i64: 14, 1>}, {transform_indices = @transform_2, window_bounds = array<i64: 1, 1>}, {transform_indices = @transform_3, window_bounds = array<i64: 1, 1>}]} {
    %c0 = arith.constant 0 : index
    %c0_0 = arith.constant 0 : index
    %0 = vector.load %arg1[%c0, %c0_0] : memref<14x64xf32, #tpu.memory_space<vmem>>, vector<14x64xf32>
    %c0_1 = arith.constant 0 : index
    %c0_2 = arith.constant 0 : index
    %1 = vector.load %arg2[%c0_1, %c0_2] : memref<14x1xi32, #tpu.memory_space<vmem>>, vector<14x1xi32>
    %cst = arith.constant dense<0xFF800000> : vector<14xf32>
    %2 = vector.multi_reduction <maximumf>, %0, %cst [1] : vector<14x64xf32> to vector<14xf32>
    %3 = vector.shape_cast %2 : vector<14xf32> to vector<14x1xf32>
    %4 = vector.broadcast %3 : vector<14x1xf32> to vector<14x64xf32>
    %5 = arith.subf %0, %4 : vector<14x64xf32>
    %6 = math.exp %5 : vector<14x64xf32>
    %cst_3 = arith.constant dense<0.000000e+00> : vector<14xf32>
    %7 = vector.multi_reduction <add>, %6, %cst_3 [1] : vector<14x64xf32> to vector<14xf32>
    %8 = vector.shape_cast %7 : vector<14xf32> to vector<14x1xf32>
    %9 = math.log %8 : vector<14x1xf32>
    %10 = arith.addf %9, %3 : vector<14x1xf32>
    %11 = tpu.iota {dimensions = array<i32: 1>} : vector<14x64xi32>
    %12 = vector.broadcast %1 : vector<14x1xi32> to vector<14x64xi32>
    %13 = arith.cmpi eq, %11, %12 : vector<14x64xi32>
    %14 = arith.extui %13 : vector<14x64xi1> to vector<14x64xi32>
    %15 = arith.sitofp %14 : vector<14x64xi32> to vector<14x64xf32>
    %16 = arith.mulf %15, %0 : vector<14x64xf32>
    %cst_4 = arith.constant dense<0.000000e+00> : vector<14xf32>
    %17 = vector.multi_reduction <add>, %16, %cst_4 [1] : vector<14x64xf32> to vector<14xf32>
    %18 = vector.shape_cast %17 : vector<14xf32> to vector<14x1xf32>
    %c0_i32 = arith.constant 0 : i32
    %19 = vector.broadcast %c0_i32 : i32 to vector<14x1xi32>
    %20 = arith.cmpi ne, %1, %19 : vector<14x1xi32>
    %21 = arith.extui %20 : vector<14x1xi1> to vector<14x1xi32>
    %22 = arith.sitofp %21 : vector<14x1xi32> to vector<14x1xf32>
    %23 = arith.subf %10, %18 : vector<14x1xf32>
    %24 = arith.mulf %23, %22 : vector<14x1xf32>
    %25 = vector.shape_cast %24 : vector<14x1xf32> to vector<1x14x1xf32>
    %cst_5 = arith.constant dense<0.000000e+00> : vector<1xf32>
    %26 = vector.multi_reduction <add>, %25, %cst_5 [1, 2] : vector<1x14x1xf32> to vector<1xf32>
    %27 = vector.shape_cast %26 : vector<1xf32> to vector<1x1x1xf32>
    %28 = vector.extract %27[0, 0, 0] : f32 from vector<1x1x1xf32>
    %c0_6 = arith.constant 0 : index
    %c0_7 = arith.constant 0 : index
    %29 = memref.load %arg3[%c0_6, %c0_7] : memref<1x1xf32, #tpu.memory_space<smem>>
    memref.store %28, %arg3[%c0_6, %c0_7] : memref<1x1xf32, #tpu.memory_space<smem>>
    %30 = vector.shape_cast %22 : vector<14x1xf32> to vector<1x14x1xf32>
    %cst_8 = arith.constant dense<0.000000e+00> : vector<1xf32>
    %31 = vector.multi_reduction <add>, %30, %cst_8 [1, 2] : vector<1x14x1xf32> to vector<1xf32>
    %32 = vector.shape_cast %31 : vector<1xf32> to vector<1x1x1xf32>
    %33 = vector.extract %32[0, 0, 0] : f32 from vector<1x1x1xf32>
    %c0_9 = arith.constant 0 : index
    %c0_10 = arith.constant 0 : index
    %34 = memref.load %arg4[%c0_9, %c0_10] : memref<1x1xf32, #tpu.memory_space<smem>>
    memref.store %33, %arg4[%c0_9, %c0_10] : memref<1x1xf32, #tpu.memory_space<smem>>
    return
  }
  func.func @transform_0(%arg0: i32) -> (i32, i32) {
    %c0_i32 = arith.constant 0 : i32
    %c0_i32_0 = arith.constant 0 : i32
    %c0_i32_1 = arith.constant 0 : i32
    return %c0_i32, %c0_i32_0 : i32, i32
  }
  func.func @transform_1(%arg0: i32) -> (i32, i32) {
    %c0_i32 = arith.constant 0 : i32
    %c0_i32_0 = arith.constant 0 : i32
    %c0_i32_1 = arith.constant 0 : i32
    return %c0_i32, %c0_i32_0 : i32, i32
  }
  func.func @transform_2(%arg0: i32) -> (i32, i32) {
    %c0_i32 = arith.constant 0 : i32
    %c0_i32_0 = arith.constant 0 : i32
    %c0_i32_1 = arith.constant 0 : i32
    return %c0_i32, %c0_i32_0 : i32, i32
  }
  func.func @transform_3(%arg0: i32) -> (i32, i32) {
    %c0_i32 = arith.constant 0 : i32
    %c0_i32_0 = arith.constant 0 : i32
    %c0_i32_1 = arith.constant 0 : i32
    return %c0_i32, %c0_i32_0 : i32, i32
  }
}

</mosaic_0001>

<bundles_post_ra>
// kernel: hf_adapter_forward.62
= control target key start
LH: loop header
LB: loop body
LE: loop exit
PB: predicated region body
PF: predicated region fallthrough
CT: control target
= control target key end

     0   :  { %vm23_vm0 = vcmask 261120   ;;  %v135_v6 = vmov 32.0   ;;  %vm108_vm8 = vcmask 781312   ;;  %s188_s0 = inlined_call_operand.vmem [shape: f32[16,32], index: 0, kind: input, shape index: {}]   ;;  %s189_s1 = inlined_call_operand.vmem [shape: f32[1,32], index: 1, kind: input, shape index: {}]   ;;  %s190_s3 = inlined_call_operand.vmem [shape: f32[1,96], index: 3, kind: input, shape index: {}]   ;;  %s191_s2 = inlined_call_operand.vmem [shape: bf16[32,96], index: 2, kind: input, shape index: {}]   ;;  %s192_s4 = inlined_call_operand.vmem [shape: bf16[16,96], index: 4, kind: output, shape index: {}]  }
   0x1   :  { %v18_v0 = vld [vmem:[%s188_s0] sm:$0xff]  ;;  %v19_v2 = vld [vmem:[%s188_s0 + $0x8] sm:$0xff]  ;;  %129 = vrcp.f32 %v135_v6 }
   0x2   :  { %v21_v1 = vmul.f32 %v18_v0, %v18_v0  ;;  %v22_v4 = vmul.f32 %v19_v2, %v19_v2  ;;  %v125_v12 = vld [vmem:[%s191_s2 + $0x8] sm:$0xff]  ;;  %v124_v14 = vld [vmem:[%s191_s2] sm:$0xff] }
   0x3   :  { %98 = vmatpush.bf16.msra.mxu0 %v125_v12  ;;  %v127_v35 = vld [vmem:[%s189_s1] ss:$0 sm:$0xff] }
   0x4   :  { %v24_v3 = vsel %vm23_vm0, %v21_v1, 0.0  ;;  %v27_v5 = vsel %vm23_vm0, %v22_v4, 0.0  ;;  %v128_v41 = vld [vmem:[%s190_s3] ss:$0 sm:$0xff] }
   0x5   :  { %25 = vadd.xlane.f32.xlu0 %v24_v3 }
   0x7   :  { %v130_v7 = vpop.eup %129  ;;  %99 = vmatpush.bf16.msra.mxu0 %v124_v14 }
   0x8   :  { %v31_v8 = vmul.f32 32.0, %v130_v7  ;;  %vm35_vm1 = vweird.f32 %v130_v7 }
   0xa   :  { %v32_v9 = vsub.f32 1.0, %v31_v8 }
   0xc   :  { %v33_v10 = vmul.f32 %v130_v7, %v32_v9 }
   0xd   :  { %28 = vadd.xlane.f32.xlu0 %v27_v5 }
   0xe   :  { %v34_v11 = vadd.f32 %v130_v7, %v33_v10 }
  0x10   :  { %v36_v13 = vsel %vm35_vm1, %v130_v7, %v34_v11 }
  0x78   :  { %v26_v15 = vpop.xlane.xlu0 %25 }
  0x79   :  { %v37_v16 = vmul.f32 %v36_v13, %v26_v15 }
  0x7b   :  { %v39_v17 = vadd.f32 1e-06, %v37_v16 }
  0x7d   :  { %131 = vrsqrt.f32 %v39_v17  ;;  %vm47_vm3 = vweird.f32 %v39_v17 }
  0x80   :  { %v29_v18 = vpop.xlane.xlu0 %28 }
  0x81   :  { %v38_v19 = vmul.f32 %v36_v13, %v29_v18 }
  0x83   :  { %v132_v20 = vpop.eup %131  ;;  %v40_v21 = vadd.f32 1e-06, %v38_v19 }
  0x84   :  { %v42_v22 = vmul.f32 %v132_v20, %v39_v17  ;;  %vm48_vm2 = vweird.f32 %v132_v20 }
  0x85   :  { %133 = vrsqrt.f32 %v40_v21  ;;  %vm49_vm4 = vmor %vm47_vm3, %vm48_vm2  ;;  %vm57_vm6 = vweird.f32 %v40_v21 }
  0x86   :  { %v43_v23 = vmul.f32 %v132_v20, %v42_v22 }
  0x88   :  { %v44_v24 = vmul.f32 0.5, %v43_v23 }
  0x8a   :  { %v45_v25 = vsub.f32 1.5, %v44_v24 }
  0x8b   :  { %v134_v26 = vpop.eup %133 }
  0x8c   :  { %v52_v27 = vmul.f32 %v134_v26, %v40_v21  ;;  %v46_v28 = vmul.f32 %v132_v20, %v45_v25  ;;  %vm58_vm5 = vweird.f32 %v134_v26 }
  0x8d   :  { %vm59_vm7 = vmor %vm57_vm6, %vm58_vm5 }
  0x8e   :  { %v53_v29 = vmul.f32 %v134_v26, %v52_v27  ;;  %v50_v31 = vsel %vm49_vm4, %v132_v20, %v46_v28 }
  0x8f   :  { %v61_v34 = vmul.f32 %v50_v31, %v18_v0 }
  0x90   :  { %v54_v30 = vmul.f32 0.5, %v53_v29 }
  0x91   :  { %v66_v38 = vmul.f32 %v127_v35, %v61_v34 }
  0x92   :  { %v55_v32 = vsub.f32 1.5, %v54_v30 }
  0x94   :  { %v56_v33 = vmul.f32 %v134_v26, %v55_v32 }
  0x96   :  { %v60_v36 = vsel %vm59_vm7, %v134_v26, %v56_v33 }
  0x97   :  { %v62_v37 = vmul.f32 %v60_v36, %v19_v2 }
  0x99   :  { %v67_v39 = vmul.f32 %v127_v35, %v62_v37 }
  0x9b   :  { %v72_v40 = vpack.c.bf16 %v67_v39, %v66_v38 }
  0x9d   :  { %123 = vmatmul.msk.bf16.vlgmr.msra.gmra.mxu0 %vm23_vm0, %v72_v40 }
 0x11a   :  { %v101_v42 = vpop.f32.mrf.mxu0 }
 0x11b   :  { %v102_v43 = vadd.f32 %v128_v41, %v101_v42 }
 0x11d   :  { %v106_v44 = vpack.c.bf16 %v102_v43, %v102_v43 }
 0x11f   :  { %109 = vst.msk [vmem:[%s192_s4] sm:$0xf] %vm108_vm8, %v106_v44 }
 0x122   :  { %v103_v45 = vpop.f32.mrf.mxu0 }
 0x123   :  { %v104_v46 = vadd.f32 %v128_v41, %v103_v45 }
 0x125   :  { %v107_v47 = vpack.c.bf16 %v104_v46, %v104_v46 }
 0x127   :  { %110 = vst.msk [vmem:[%s192_s4 + $0x4] sm:$0xf] %vm108_vm8, %v107_v47 }

// kernel: hf_adapter_forward.63
= control target key start
LH: loop header
LB: loop body
LE: loop exit
PB: predicated region body
PF: predicated region fallthrough
CT: control target
= control target key end

     0   :  { %s591_s24 = smov 0   ;;  %s639_s0 = inlined_call_operand.vmem [shape: bf16[8,8,8], index: 0, kind: input, shape index: {}]   ;;  %s640_s1 = inlined_call_operand.vmem [shape: bf16[8,8,8], index: 1, kind: input, shape index: {}]   ;;  %s641_s2 = inlined_call_operand.vmem [shape: bf16[8,8,8], index: 2, kind: input, shape index: {}]   ;;  %s642_s3 = inlined_call_operand.vmem [shape: f32[8,8], index: 3, kind: input, shape index: {}, may-alias: {3,5}]   ;;  %s643_s4 = inlined_call_operand.vmem [shape: f32[8,8], index: 4, kind: input, shape index: {}, may-alias: {4,6}]   ;;  %s644_s5 = inlined_call_operand.vmem [shape: f32[8,8], index: 5, kind: input, shape index: {}, may-alias: {3,5}]   ;;  %s645_s6 = inlined_call_operand.vmem [shape: f32[8,8], index: 6, kind: input, shape index: {}, may-alias: {4,6}]   ;;  %s646_s7 = inlined_call_operand.vmem [shape: bf16[8,8,8], index: 7, kind: output, shape index: {}]  }
   0x1 LB: > { %s514_s25 = sadd.s32 4294967295, %s547_s24   ;;  %p518_p0 = scmp.ge.s32.totalorder %s547_s24, 1  ;;  %s547_s24 = sphi %s591_s24, %s17_s24  }
   0x2   : > { %p254_p1 = scmp.lt.s32.totalorder %s547_s24, 9 }
   0x4   : > { %p255_p2 = pnand %p518_p0, %p254_p1 }
   0x5   : > { %p292_p3 = scmp.lt.s32.totalorder (!%p255_p2), %s514_s25, 7  ;;  %s549_s10 = smov (!%p255_p2), 8  }
   0x6   : > { %258 = sbr.rel (%p255_p2) target bundleno = 910 (0x38e), region = 48  ;;  %s550_s11 = smov (!%p255_p2), 124  }
   0xb   : > { %s648_s25 = smov (!%p292_p3, %s514_s25), 7  ;;  %vm319_vm0 = vcmask 1047616   ;;  %v326_v14 = vlaneseq  ;;  %v316_v17 = vld [vmem:[%s644_s5] sm:$0xff]  ;;  %vm362_vm2 = vcmask 64512   ;;  %vm417_vm6 = vcmask 1043456  }
   0xc   : > { %s599_s26 = sshll.u32 %s648_s25, 2  ;;  %v317_v18 = vld [vmem:[%s645_s6] sm:$0xff]  ;;  %vm435_vm11 = vcmask 60416  }
   0xd   : > { %s299_s29 = scalar_lea.vmem %s640_s1, %s599_s26  ;;  %s295_s9 = scalar_lea.vmem %s639_s0, %s599_s26  ;;  %v327_v16 = vand.u32 127, %v326_v14  ;;  %v314_v26 = vld [vmem:[%s642_s3] sm:$0xff]  ;;  %v384_v35 = vshrl.u32 %v326_v14, 7 }
   0xe   : > { %v311_v0 = vld [vmem:[%s299_s29] sm:$0xf]  ;;  %s303_s22 = scalar_lea.vmem %s641_s2, %s599_s26  ;;  %s307_s27 = scalar_lea.vmem %s646_s7, %s599_s26 }
   0xf   : > { %v312_v1 = vunpack.c.l.bf16 %v311_v0  ;;  %v309_v2 = vld [vmem:[%s295_s9] sm:$0xf]  ;;  %vm328_vm1 = vcmp.lt.s32.totalorder %v327_v16, 4  ;;  %vm385_vm3 = vcmp.lt.s32.totalorder %v327_v16, 8  ;;  %vm386_vm4 = vcmp.gt.s32.totalorder %v327_v16, %v384_v35 }
  0x10   : > { %v310_v3 = vunpack.c.l.bf16 %v309_v2  ;;  %v315_v27 = vld [vmem:[%s643_s4] sm:$0xff]  ;;  %vm387_vm5 = vmand %vm385_vm3, %vm386_vm4 }
  0x11   : > { %342 = vrot.lane.b32.xlu0 %v312_v1, %s549_s10  ;;  %v341_v20 = vmul.f32 %v316_v17, %v312_v1  ;;  %v313_v46 = vld [vmem:[%s303_s22] sm:$0xf] }
  0x12   : > { %v318_v30 = vmul.f32 %v314_v26, %v310_v3  ;;  %v419_v47 = vsel %vm417_vm6, %v313_v46, 0 }
  0x13   : > { %428 = vmatpush.bf16.msra.mxu1 %v419_v47 }
  0x19   : > { %320 = vrot.lane.b32.xlu0 %v310_v3, %s549_s10 }
  0x83   : > { %v343_v4 = vpop.permute.xlu0 %342 }
  0x84   : > { %v344_v5 = vsel %vm319_vm0, %v343_v4, %v312_v1 }
  0x85   : > { %345 = vrot.lane.b32.xlu1 %v344_v5, %s549_s10 }
  0x8b   : > { %v321_v6 = vpop.permute.xlu0 %320 }
  0x8c   : > { %v322_v7 = vsel %vm319_vm0, %v321_v6, %v310_v3 }
  0x8d   : > { %323 = vrot.lane.b32.xlu1 %v322_v7, %s549_s10 }
  0xf7   : > { %v346_v8 = vpop.permute.xlu1 %345 }
  0xf8   : > { %v347_v9 = vsel %vm319_vm0, %v346_v8, %v312_v1 }
  0xf9   : > { %v348_v10 = vsub.f32 0.0, %v347_v9 }
  0xfb   : > { %350 = vrot.lane.b32.xlu2 %v348_v10, %s550_s11 }
  0xff   : > { %v324_v11 = vpop.permute.xlu1 %323 }
 0x100   : > { %v325_v12 = vsel %vm319_vm0, %v324_v11, %v310_v3 }
 0x101   : > { %335 = vrot.lane.b32.xlu1 %v325_v12, %s550_s11  ;;  %v329_v13 = vsub.f32 0.0, %v325_v12 }
 0x103   : > { %354 = vrot.lane.b32.xlu2 %v347_v9, %s550_s11  ;;  %331 = vrot.lane.b32.xlu0 %v329_v13, %s550_s11 }
 0x155   : > { %v351_v15 = vpop.permute.xlu2 %350 }
 0x15d   : > { %v355_v19 = vpop.permute.xlu2 %354 }
 0x15e   : > { %v357_v21 = vsel %vm328_vm1, %v351_v15, %v355_v19 }
 0x15f   : > { %v358_v22 = vmul.f32 %v357_v21, %v317_v18 }
 0x161   : > { %v359_v23 = vadd.f32 %v358_v22, %v341_v20 }
 0x163   : > { %v361_v24 = vpack.c.bf16 %v359_v23, %v359_v23 }
 0x165   : > { %v367_v25 = vsel %vm362_vm2, %v361_v24, 0 }
 0x166   : > { %376 = vmatpush.bf16.xpose.msra.mxu0 %v367_v25 }
 0x173   : > { %v336_v28 = vpop.permute.xlu1 %335 }
 0x175   : > { %v332_v29 = vpop.permute.xlu0 %331 }
 0x176   : > { %v338_v31 = vsel %vm328_vm1, %v332_v29, %v336_v28 }
 0x177   : > { %v339_v32 = vmul.f32 %v338_v31, %v315_v27 }
 0x179   : > { %v340_v33 = vadd.f32 %v339_v32, %v318_v30 }
 0x17b   : > { %v360_v34 = vpack.c.bf16 %v340_v33, %v340_v33 }
 0x17d   : > { %523 = vmatmul.msk.bf16.vlgmr.msra.gmra.mxu0 %vm362_vm2, %v360_v34 }
 0x1fa   : > { %v378_v36 = vpop.f32.mrf.mxu0 }
 0x1fb   : > { %v382_v37 = vmul.f32 0.35355338, %v378_v36 }
 0x1fd   : > { %v388_v38 = vsel %vm387_vm5, -1e+30, %v382_v37 }
 0x1fe   : > { %v389_v39 = vsel %vm362_vm2, %v388_v38, -inf }
 0x1ff   : > { %390 = vmax.xlane.f32.xlu2 %v389_v39 }
 0x202   : > { %v380_v40 = vpop.f32.mrf.mxu0 }
 0x272   : > { %v391_v41 = vpop.xlane.xlu2 %390 }
 0x273   : > { %v392_v42 = vsub.f32 %v388_v38, %v391_v41 }
 0x275   : > { %v393_v43 = vmul.f32 1.442695, %v392_v42 }
 0x277   : > { %537 = vpow2.f32 %v393_v43 }
 0x27d   : > { %v538_v44 = vpop.eup %537 }
 0x27e   : > { %v395_v45 = vsel %vm362_vm2, %v538_v44, 0.0 }
 0x27f   : > { %396 = vadd.xlane.f32.xlu0 %v395_v45 }
 0x2f2   : > { %v397_v48 = vpop.xlane.xlu0 %396 }
 0x2f3   : > { %539 = vrcp.f32 %v397_v48  ;;  %v409_v52 = vand.u32 2147483648, %v397_v48  ;;  %v407_v54 = vand.u32 2147483647, %v397_v48  ;;  %vm403_vm8 = vweird.f32 %v397_v48 }
 0x2f5   : > { %v410_v56 = vor.u32 1.1754944e-38, %v409_v52  ;;  %vm408_vm10 = vcmp.eq.f32.partialorder %v407_v54, 8.507059e+37 }
 0x2f9   : > { %v540_v49 = vpop.eup %539 }
 0x2fa   : > { %v399_v50 = vmul.f32 %v540_v49, %v397_v48  ;;  %vm404_vm7 = vweird.f32 %v540_v49 }
 0x2fb   : > { %vm405_vm9 = vmor %vm403_vm8, %vm404_vm7 }
 0x2fc   : > { %v400_v51 = vsub.f32 1.0, %v399_v50 }
 0x2fe   : > { %v401_v53 = vmul.f32 %v540_v49, %v400_v51 }
 0x300   : > { %v402_v55 = vadd.f32 %v540_v49, %v401_v53 }
 0x302   : > { %v406_v57 = vsel %vm405_vm9, %v540_v49, %v402_v55 }
 0x303   : > { %v411_v58 = vsel %vm408_vm10, %v410_v56, %v406_v57 }
 0x304   : > { %v412_v59 = vmul.f32 %v538_v44, %v411_v58 }
 0x306   : > { %v413_v60 = vpack.c.bf16 %v412_v59, %v412_v59 }
 0x308   : > { %524 = vmatmul.msk.bf16.vlgmr.msra.gmra.mxu1 %vm362_vm2, %v413_v60 }
 0x385   : > { %v430_v61 = vpop.f32.mrf.mxu1 }
 0x386   : > { %v434_v62 = vpack.c.bf16 %v430_v61, %v430_v61 }
 0x388   : > { %436 = vst.msk [vmem:[%s307_s27] sm:$0xf] %vm435_vm11, %v434_v62 }
 0x38d   : > { %v432_v63 = vpop.f32.mrf.mxu1 }
 0x38e PF: > { %s17_s24 = sadd.s32 1, %s547_s24  }
 0x38f   : > { %p14_p4 = scmp.ge.s32.totalorder %s17_s24, 10  }
 0x391   :  { %16 = sbr.rel (!%p14_p4) target bundleno = 1 (0x1), region = 84 }

// kernel: hf_adapter_forward.64
= control target key start
LH: loop header
LB: loop body
LE: loop exit
PB: predicated region body
PF: predicated region fallthrough
CT: control target
= control target key end

     0   :  { %vm45_vm0 = vcmask 261120   ;;  %s139_s1 = inlined_call_operand.vmem [shape: bf16[32,32], index: 1, kind: input, shape index: {}]   ;;  %s140_s2 = inlined_call_operand.vmem [shape: f32[1,32], index: 2, kind: input, shape index: {}]   ;;  %s141_s0 = inlined_call_operand.vmem [shape: bf16[16,32], index: 0, kind: input, shape index: {}]   ;;  %s142_s3 = inlined_call_operand.vmem [shape: f32[16,32], index: 3, kind: input, shape index: {}]   ;;  %s143_s4 = inlined_call_operand.vmem [shape: f32[16,32], index: 4, kind: output, shape index: {}]  }
   0x1   :  { %v88_v0 = vld [vmem:[%s139_s1 + $0x8] sm:$0xff]  ;;  %v87_v1 = vld [vmem:[%s139_s1] sm:$0xff] }
   0x2   :  { %55 = vmatpush.bf16.msra.mxu0 %v88_v0  ;;  %v86_v2 = vld [vmem:[%s141_s0] sm:$0xff]  ;;  %v64_v9 = vld [vmem:[%s142_s3 + $0x8] sm:$0xff] }
   0x3   :  { %v89_v3 = vld [vmem:[%s140_s2] ss:$0 sm:$0xff] }
   0x4   :  { %v63_v5 = vld [vmem:[%s142_s3] sm:$0xff] }
   0x6   :  { %56 = vmatpush.bf16.msra.mxu0 %v87_v1 }
   0x9   :  { %85 = vmatmul.msk.bf16.vlgmr.msra.gmra.mxu0 %vm45_vm0, %v86_v2 }
  0x86   :  { %v58_v4 = vpop.f32.mrf.mxu0 }
  0x87   :  { %v59_v6 = vadd.f32 %v89_v3, %v58_v4 }
  0x89   :  { %v65_v7 = vadd.f32 %v63_v5, %v59_v6 }
  0x8b   :  { %67 = vst.msk [vmem:[%s143_s4] sm:$0xff] %vm45_vm0, %v65_v7 }
  0x8e   :  { %v60_v8 = vpop.f32.mrf.mxu0 }
  0x8f   :  { %v61_v10 = vadd.f32 %v89_v3, %v60_v8 }
  0x91   :  { %v66_v11 = vadd.f32 %v64_v9, %v61_v10 }
  0x93   :  { %68 = vst.msk [vmem:[%s143_s4 + $0x8] sm:$0xff] %vm45_vm0, %v66_v11 }

// kernel: hf_adapter_forward.65
= control target key start
LH: loop header
LB: loop body
LE: loop exit
PB: predicated region body
PF: predicated region fallthrough
CT: control target
= control target key end

     0   :  { %vm25_vm0 = vcmask 261120   ;;  %v297_v6 = vmov 32.0   ;;  %s385_s0 = inlined_call_operand.vmem [shape: f32[16,32], index: 0, kind: input, shape index: {}]   ;;  %s386_s1 = inlined_call_operand.vmem [shape: f32[1,32], index: 1, kind: input, shape index: {}]   ;;  %s387_s2 = inlined_call_operand.vmem [shape: bf16[32,64], index: 2, kind: input, shape index: {}]   ;;  %s388_s3 = inlined_call_operand.vmem [shape: bf16[32,64], index: 3, kind: input, shape index: {}]   ;;  %s389_s4 = inlined_call_operand.vmem [shape: bf16[64,32], index: 4, kind: input, shape index: {}]   ;;  %s390_s5 = inlined_call_operand.vmem [shape: f32[16,32], index: 5, kind: output, shape index: {}]  }
   0x1   :  { %v331_v0 = vld [vmem:[%s385_s0] sm:$0xff]  ;;  %v338_v2 = vld [vmem:[%s385_s0 + $0x8] sm:$0xff]  ;;  %283 = vrcp.f32 %v297_v6  ;;  %v280_v43 = vld [vmem:[%s389_s4 + $0x18] sm:$0xff] }
   0x2   :  { %v23_v1 = vmul.f32 %v331_v0, %v331_v0  ;;  %v24_v4 = vmul.f32 %v338_v2, %v338_v2  ;;  %v274_v12 = vld [vmem:[%s387_s2 + $0x8] sm:$0xff]  ;;  %v273_v15 = vld [vmem:[%s387_s2] sm:$0xff]  ;;  %218 = vmatpush.bf16.msra.mxu2 %v280_v43  ;;  %v279_v44 = vld [vmem:[%s389_s4 + $0x10] sm:$0xff] }
   0x3   :  { %v276_v13 = vld [vmem:[%s388_s3 + $0x8] sm:$0xff]  ;;  %97 = vmatpush.bf16.msra.mxu0 %v274_v12  ;;  %v275_v16 = vld [vmem:[%s388_s3] sm:$0xff] }
   0x4   :  { %v26_v3 = vsel %vm25_vm0, %v23_v1, 0.0  ;;  %v29_v5 = vsel %vm25_vm0, %v24_v4, 0.0  ;;  %127 = vmatpush.bf16.msra.mxu1 %v276_v13  ;;  %v282_v37 = vld [vmem:[%s386_s1] ss:$0 sm:$0xff]  ;;  %v278_v47 = vld [vmem:[%s389_s4 + $0x8] sm:$0xff] }
   0x5   :  { %27 = vadd.xlane.f32.xlu0 %v26_v3  ;;  %v277_v48 = vld [vmem:[%s389_s4] sm:$0xff] }
   0x6   :  { %219 = vmatpush.bf16.msra.mxu2 %v279_v44 }
   0x7   :  { %v284_v7 = vpop.eup %283  ;;  %98 = vmatpush.bf16.msra.mxu0 %v273_v15 }
   0x8   :  { %v33_v8 = vmul.f32 32.0, %v284_v7  ;;  %vm37_vm1 = vweird.f32 %v284_v7  ;;  %128 = vmatpush.bf16.msra.mxu1 %v275_v16 }
   0xa   :  { %v34_v9 = vsub.f32 1.0, %v33_v8  ;;  %220 = vmatpush.bf16.msra.mxu2 %v278_v47 }
   0xc   :  { %v35_v10 = vmul.f32 %v284_v7, %v34_v9 }
   0xd   :  { %30 = vadd.xlane.f32.xlu0 %v29_v5 }
   0xe   :  { %v36_v11 = vadd.f32 %v284_v7, %v35_v10  ;;  %221 = vmatpush.bf16.msra.mxu2 %v277_v48 }
  0x10   :  { %v38_v14 = vsel %vm37_vm1, %v284_v7, %v36_v11  ;;  %vm210_vm1 = vcmask 523264  }
  0x78   :  { %v28_v17 = vpop.xlane.xlu0 %27 }
  0x79   :  { %v39_v18 = vmul.f32 %v38_v14, %v28_v17 }
  0x7b   :  { %v41_v19 = vadd.f32 1e-06, %v39_v18 }
  0x7d   :  { %285 = vrsqrt.f32 %v41_v19  ;;  %vm49_vm3 = vweird.f32 %v41_v19 }
  0x80   :  { %v31_v20 = vpop.xlane.xlu0 %30 }
  0x81   :  { %v40_v21 = vmul.f32 %v38_v14, %v31_v20 }
  0x83   :  { %v286_v22 = vpop.eup %285  ;;  %v42_v23 = vadd.f32 1e-06, %v40_v21 }
  0x84   :  { %v44_v24 = vmul.f32 %v286_v22, %v41_v19  ;;  %vm50_vm2 = vweird.f32 %v286_v22 }
  0x85   :  { %287 = vrsqrt.f32 %v42_v23  ;;  %vm51_vm4 = vmor %vm49_vm3, %vm50_vm2  ;;  %vm59_vm6 = vweird.f32 %v42_v23 }
  0x86   :  { %v45_v25 = vmul.f32 %v286_v22, %v44_v24 }
  0x88   :  { %v46_v26 = vmul.f32 0.5, %v45_v25 }
  0x8a   :  { %v47_v27 = vsub.f32 1.5, %v46_v26 }
  0x8b   :  { %v288_v28 = vpop.eup %287 }
  0x8c   :  { %v54_v29 = vmul.f32 %v288_v28, %v42_v23  ;;  %v48_v30 = vmul.f32 %v286_v22, %v47_v27  ;;  %vm60_vm5 = vweird.f32 %v288_v28 }
  0x8d   :  { %vm61_vm7 = vmor %vm59_vm6, %vm60_vm5 }
  0x8e   :  { %v55_v31 = vmul.f32 %v288_v28, %v54_v29  ;;  %v52_v33 = vsel %vm51_vm4, %v286_v22, %v48_v30 }
  0x8f   :  { %v63_v36 = vmul.f32 %v52_v33, %v331_v0 }
  0x90   :  { %v56_v32 = vmul.f32 0.5, %v55_v31 }
  0x91   :  { %v69_v40 = vmul.f32 %v282_v37, %v63_v36 }
  0x92   :  { %v57_v34 = vsub.f32 1.5, %v56_v32 }
  0x94   :  { %v58_v35 = vmul.f32 %v288_v28, %v57_v34 }
  0x96   :  { %v62_v38 = vsel %vm61_vm7, %v288_v28, %v58_v35 }
  0x97   :  { %v64_v39 = vmul.f32 %v62_v38, %v338_v2 }
  0x99   :  { %v70_v41 = vmul.f32 %v282_v37, %v64_v39 }
  0x9b   :  { %v71_v42 = vpack.c.bf16 %v70_v41, %v69_v40 }
  0x9d   :  { %244 = vmatmul.msk.bf16.vlgmr.msra.gmra.mxu0 %vm25_vm0, %v71_v42  ;;  %253 = vmatmul.msk.bf16.vlgmr.msra.gmra.mxu1 %vm25_vm0, %v71_v42 }
 0x11a   :  { %v100_v45 = vpop.f32.mrf.mxu0  ;;  %v130_v1 = vpop.f32.mrf.mxu1 }
 0x11b   :  { %v254_v46 = vmul.f32 -1.442695, %v100_v45 }
 0x11d   :  { %289 = vpow2.f32 %v254_v46 }
 0x122   :  { %v102_v49 = vpop.f32.mrf.mxu0  ;;  %v132_v16 = vpop.f32.mrf.mxu1 }
 0x123   :  { %v290_v50 = vpop.eup %289  ;;  %v255_v51 = vmul.f32 -1.442695, %v102_v49 }
 0x124   :  { %v141_v52 = vadd.f32 1.0, %v290_v50 }
 0x125   :  { %291 = vpow2.f32 %v255_v51 }
 0x126   :  { %293 = vrcp.f32 %v141_v52  ;;  %v154_v61 = vand.u32 2147483648, %v141_v52  ;;  %vm148_vm9 = vweird.f32 %v141_v52  ;;  %v152_v62 = vand.u32 2147483647, %v141_v52 }
 0x128   :  { %v155_v5 = vor.u32 1.1754944e-38, %v154_v61  ;;  %vm153_vm11 = vcmp.eq.f32.partialorder %v152_v62, 8.507059e+37 }
 0x12b   :  { %v292_v53 = vpop.eup %291 }
 0x12c   :  { %v294_v54 = vpop.eup %293  ;;  %v142_v55 = vadd.f32 1.0, %v292_v53 }
 0x12d   :  { %v144_v56 = vmul.f32 %v294_v54, %v141_v52  ;;  %vm149_vm8 = vweird.f32 %v294_v54 }
 0x12e   :  { %295 = vrcp.f32 %v142_v55  ;;  %vm150_vm10 = vmor %vm148_vm9, %vm149_vm8  ;;  %v169_v6 = vand.u32 2147483648, %v142_v55  ;;  %v167_v8 = vand.u32 2147483647, %v142_v55  ;;  %vm163_vm13 = vweird.f32 %v142_v55 }
 0x12f   :  { %v145_v57 = vsub.f32 1.0, %v144_v56 }
 0x130   :  { %v170_v11 = vor.u32 1.1754944e-38, %v169_v6  ;;  %vm168_vm15 = vcmp.eq.f32.partialorder %v167_v8, 8.507059e+37 }
 0x131   :  { %v146_v58 = vmul.f32 %v294_v54, %v145_v57 }
 0x133   :  { %v147_v59 = vadd.f32 %v294_v54, %v146_v58 }
 0x134   :  { %v296_v60 = vpop.eup %295 }
 0x135   :  { %v159_v63 = vmul.f32 %v296_v60, %v142_v55  ;;  %v151_v3 = vsel %vm150_vm10, %v294_v54, %v147_v59  ;;  %vm164_vm12 = vweird.f32 %v296_v60 }
 0x136   :  { %v156_v9 = vsel %vm153_vm11, %v155_v5, %v151_v3  ;;  %vm165_vm14 = vmor %vm163_vm13, %vm164_vm12 }
 0x137   :  { %v160_v4 = vsub.f32 1.0, %v159_v63  ;;  %v173_v12 = vmul.f32 %v156_v9, %v100_v45 }
 0x139   :  { %v161_v7 = vmul.f32 %v296_v60, %v160_v4  ;;  %v175_v17 = vmul.f32 %v173_v12, %v130_v1 }
 0x13b   :  { %v162_v10 = vadd.f32 %v296_v60, %v161_v7 }
 0x13d   :  { %v166_v13 = vsel %vm165_vm14, %v296_v60, %v162_v10 }
 0x13e   :  { %v171_v14 = vsel %vm168_vm15, %v170_v11, %v166_v13 }
 0x13f   :  { %v174_v15 = vmul.f32 %v171_v14, %v102_v49 }
 0x141   :  { %v176_v18 = vmul.f32 %v174_v15, %v132_v16 }
 0x143   :  { %v177_v19 = vpack.c.bf16 %v176_v18, %v175_v17 }
 0x145   :  { %272 = vmatmul.msk.bf16.vlgmr.msra.gmra.mxu2 %vm210_vm1, %v177_v19 }
 0x1c8   :  { %v223_v20 = vpop.f32.mrf.mxu2 }
 0x1c9   :  { %v228_v21 = vadd.f32 %v223_v20, %v331_v0 }
 0x1cb   :  { %230 = vst.msk [vmem:[%s390_s5] sm:$0xff] %vm25_vm0, %v228_v21 }
 0x1d0   :  { %v225_v22 = vpop.f32.mrf.mxu2 }
 0x1d1   :  { %v229_v23 = vadd.f32 %v225_v22, %v338_v2 }
 0x1d3   :  { %231 = vst.msk [vmem:[%s390_s5 + $0x8] sm:$0xff] %vm25_vm0, %v229_v23 }

// kernel: hf_adapter_forward.41
= control target key start
LH: loop header
LB: loop body
LE: loop exit
PB: predicated region body
PF: predicated region fallthrough
CT: control target
= control target key end

     0   :  { %vm112_vm0 = vcmask 523264   ;;  %vm142_vm1 = vcmask 261120   ;;  %s269_s1 = inlined_call_operand.vmem [shape: bf16[192,32], index: 1, kind: input, shape index: {}]   ;;  %s270_s0 = inlined_call_operand.vmem [shape: f32[8,192], index: 0, kind: input, shape index: {}]   ;;  %s271_s2 = inlined_call_operand.vmem [shape: f32[8,32], index: 2, kind: output, shape index: {}]  }
   0x1   :  { %v204_v0 = vld [vmem:[%s269_s1 + $0x38] sm:$0xff]  ;;  %v203_v2 = vld [vmem:[%s269_s1 + $0x30] sm:$0xff]  ;;  %v202_v4 = vld [vmem:[%s269_s1 + $0x28] sm:$0xff] }
   0x2   :  { %v208_v1 = vld [vmem:[%s269_s1 + $0x58] sm:$0xff]  ;;  %116 = vmatpush.bf16.msra.mxu0 %v204_v0  ;;  %v207_v3 = vld [vmem:[%s269_s1 + $0x50] sm:$0xff]  ;;  %v206_v5 = vld [vmem:[%s269_s1 + $0x48] sm:$0xff] }
   0x3   :  { %133 = vmatpush.bf16.msra.mxu1 %v208_v1  ;;  %v201_v6 = vld [vmem:[%s269_s1 + $0x20] sm:$0xff]  ;;  %v13_v8 = vld [vmem:[%s270_s0 + $0x8] sm:$0xff]  ;;  %v200_v9 = vld [vmem:[%s269_s1 + $0x18] sm:$0xff] }
   0x4   :  { %v205_v7 = vld [vmem:[%s269_s1 + $0x40] sm:$0xff]  ;;  %v39_v10 = vpack.c.bf16 %v13_v8, %v13_v8  ;;  %v199_v11 = vld [vmem:[%s269_s1 + $0x10] sm:$0xff]  ;;  %v198_v12 = vld [vmem:[%s269_s1 + $0x8] sm:$0xff] }
   0x5   :  { %v197_v13 = vld [vmem:[%s269_s1] sm:$0xff] }
   0x6   :  { %117 = vmatpush.bf16.msra.mxu0 %v203_v2  ;;  %v12_v14 = vld [vmem:[%s270_s0] sm:$0xff] }
   0x7   :  { %134 = vmatpush.bf16.msra.mxu1 %v207_v3  ;;  %v38_v15 = vpack.c.bf16 %v12_v14, %v12_v14 }
   0xa   :  { %118 = vmatpush.bf16.msra.mxu0 %v202_v4 }
   0xb   :  { %135 = vmatpush.bf16.msra.mxu1 %v206_v5 }
   0xe   :  { %119 = vmatpush.bf16.msra.mxu0 %v201_v6 }
   0xf   :  { %136 = vmatpush.bf16.msra.mxu1 %v205_v7 }
  0x12   :  { %120 = vmatpush.bf16.msra.mxu0 %v200_v9  ;;  %196 = vmatmul.msk.bf16.vlgmr.msra.gmra.mxu1 %vm112_vm0, %v39_v10 }
  0x16   :  { %121 = vmatpush.bf16.msra.mxu0 %v199_v11 }
  0x1a   :  { %122 = vmatpush.bf16.msra.mxu0 %v198_v12 }
  0x1e   :  { %123 = vmatpush.bf16.msra.mxu0 %v197_v13 }
  0x21   :  { %124 = vmatmul.bf16.vlgmr.msra.gmra.mxu0 %v38_v15 }
  0x8f   :  { %v138_v16 = vpop.f32.mrf.mxu1 }
  0x97   :  { %v140_v17 = vpop.f32.mrf.mxu1 }
  0x9e   :  { %v125_v18 = vpop.f32.mrf.mxu0 }
  0x9f   :  { %v139_v19 = vadd.f32 %v138_v16, %v125_v18 }
  0xa1   :  { %143 = vst.msk [vmem:[%s271_s2] sm:$0xff] %vm142_vm1, %v139_v19 }
  0xa6   :  { %v127_v20 = vpop.f32.mrf.mxu0 }

// kernel: hf_adapter_forward.42
= control target key start
LH: loop header
LB: loop body
LE: loop exit
PB: predicated region body
PF: predicated region fallthrough
CT: control target
= control target key end

     0   :  { %vm24_vm0 = vcmask 258048   ;;  %v101_v7 = vmov 32.0   ;;  %s154_s0 = inlined_call_operand.vmem [shape: f32[2,5,32], index: 0, kind: input, shape index: {}]   ;;  %s155_s1 = inlined_call_operand.vmem [shape: f32[5,32], index: 1, kind: input, shape index: {}]   ;;  %s156_s2 = inlined_call_operand.vmem [shape: f32[1,32], index: 2, kind: input, shape index: {}]   ;;  %s157_s3 = inlined_call_operand.vmem [shape: f32[1,32], index: 3, kind: input, shape index: {}]   ;;  %s158_s4 = inlined_call_operand.vmem [shape: f32[2,5,32], index: 4, kind: output, shape index: {}]  }
   0x1   :  { %v17_v0 = vld [vmem:[%s154_s0] sm:$0x1f]  ;;  %v18_v3 = vld [vmem:[%s154_s0 + $0x8] sm:$0x1f]  ;;  %95 = vrcp.f32 %v101_v7 }
   0x2   :  { %v19_v1 = vld [vmem:[%s155_s1] sm:$0x1f] }
   0x3   :  { %v20_v2 = vadd.f32 %v19_v1, %v17_v0  ;;  %v21_v5 = vadd.f32 %v19_v1, %v18_v3  ;;  %v93_v38 = vld [vmem:[%s156_s2] ss:$0 sm:$0xff] }
   0x4   :  { %v94_v41 = vld [vmem:[%s157_s3] ss:$0 sm:$0xff] }
   0x5   :  { %v25_v4 = vsel %vm24_vm0, %v20_v2, 0.0  ;;  %v28_v6 = vsel %vm24_vm0, %v21_v5, 0.0 }
   0x6   :  { %26 = vadd.xlane.f32.xlu0 %v25_v4 }
   0x7   :  { %v96_v8 = vpop.eup %95 }
   0x8   :  { %v32_v9 = vmul.f32 32.0, %v96_v8  ;;  %vm36_vm1 = vweird.f32 %v96_v8 }
   0xa   :  { %v33_v10 = vsub.f32 1.0, %v32_v9 }
   0xc   :  { %v34_v11 = vmul.f32 %v96_v8, %v33_v10 }
   0xe   :  { %29 = vadd.xlane.f32.xlu0 %v28_v6  ;;  %v35_v12 = vadd.f32 %v96_v8, %v34_v11 }
  0x10   :  { %v37_v13 = vsel %vm36_vm1, %v96_v8, %v35_v12 }
  0x79   :  { %v27_v14 = vpop.xlane.xlu0 %26 }
  0x7a   :  { %v38_v15 = vmul.f32 %v37_v13, %v27_v14 }
  0x7c   :  { %v40_v16 = vsub.f32 %v20_v2, %v38_v15 }
  0x7e   :  { %v42_v17 = vmul.f32 %v40_v16, %v40_v16 }
  0x80   :  { %v44_v18 = vsel %vm24_vm0, %v42_v17, 0.0 }
  0x81   :  { %45 = vadd.xlane.f32.xlu1 %v44_v18  ;;  %v30_v19 = vpop.xlane.xlu0 %29 }
  0x82   :  { %v39_v20 = vmul.f32 %v37_v13, %v30_v19 }
  0x84   :  { %v41_v21 = vsub.f32 %v21_v5, %v39_v20 }
  0x86   :  { %v43_v22 = vmul.f32 %v41_v21, %v41_v21 }
  0x88   :  { %v47_v23 = vsel %vm24_vm0, %v43_v22, 0.0 }
  0x89   :  { %48 = vadd.xlane.f32.xlu1 %v47_v23 }
  0xf4   :  { %v46_v24 = vpop.xlane.xlu1 %45 }
  0xf5   :  { %v50_v25 = vmul.f32 %v46_v24, %v37_v13 }
  0xf7   :  { %v52_v26 = vadd.f32 1e-05, %v50_v25 }
  0xf9   :  { %97 = vrsqrt.f32 %v52_v26  ;;  %vm60_vm3 = vweird.f32 %v52_v26 }
  0xfc   :  { %v49_v27 = vpop.xlane.xlu1 %48 }
  0xfd   :  { %v51_v28 = vmul.f32 %v49_v27, %v37_v13 }
  0xff   :  { %v98_v29 = vpop.eup %97  ;;  %v53_v30 = vadd.f32 1e-05, %v51_v28 }
 0x100   :  { %v55_v31 = vmul.f32 %v98_v29, %v52_v26  ;;  %vm61_vm2 = vweird.f32 %v98_v29 }
 0x101   :  { %99 = vrsqrt.f32 %v53_v30  ;;  %vm62_vm4 = vmor %vm60_vm3, %vm61_vm2  ;;  %vm70_vm6 = vweird.f32 %v53_v30 }
 0x102   :  { %v56_v32 = vmul.f32 %v98_v29, %v55_v31 }
 0x104   :  { %v57_v33 = vmul.f32 0.5, %v56_v32 }
 0x106   :  { %v58_v34 = vsub.f32 1.5, %v57_v33 }
 0x107   :  { %v100_v35 = vpop.eup %99 }
 0x108   :  { %v59_v36 = vmul.f32 %v98_v29, %v58_v34  ;;  %v65_v37 = vmul.f32 %v100_v35, %v53_v30  ;;  %vm71_vm5 = vweird.f32 %v100_v35 }
 0x109   :  { %vm72_vm7 = vmor %vm70_vm6, %vm71_vm5 }
 0x10a   :  { %v63_v39 = vsel %vm62_vm4, %v98_v29, %v59_v36  ;;  %v66_v40 = vmul.f32 %v100_v35, %v65_v37 }
 0x10b   :  { %v74_v42 = vmul.f32 %v63_v39, %v40_v16 }
 0x10c   :  { %v67_v43 = vmul.f32 0.5, %v66_v40 }
 0x10d   :  { %v79_v44 = vmul.f32 %v93_v38, %v74_v42 }
 0x10e   :  { %v68_v45 = vsub.f32 1.5, %v67_v43 }
 0x10f   :  { %v84_v46 = vadd.f32 %v94_v41, %v79_v44 }
 0x110   :  { %v69_v47 = vmul.f32 %v100_v35, %v68_v45 }
 0x111   :  { %86 = vst.msk [vmem:[%s158_s4] sm:$0x1f] %vm24_vm0, %v84_v46 }
 0x112   :  { %v73_v48 = vsel %vm72_vm7, %v100_v35, %v69_v47 }
 0x113   :  { %v75_v49 = vmul.f32 %v73_v48, %v41_v21 }
 0x115   :  { %v80_v50 = vmul.f32 %v93_v38, %v75_v49 }
 0x117   :  { %v85_v51 = vadd.f32 %v94_v41, %v80_v50 }
 0x119   :  { %87 = vst.msk [vmem:[%s158_s4 + $0x8] sm:$0x1f] %vm24_vm0, %v85_v51 }

// kernel: hf_adapter_forward.43
= control target key start
LH: loop header
LB: loop body
LE: loop exit
PB: predicated region body
PF: predicated region fallthrough
CT: control target
= control target key end

     0   :  { %vm25_vm0 = vcmask 261120   ;;  %vm29_vm1 = vcmask 254976   ;;  %v157_v4 = vmov 32.0   ;;  %vm128_vm9 = vcmask 781312   ;;  %s220_s0 = inlined_call_operand.vmem [shape: f32[10,32], index: 0, kind: input, shape index: {}]   ;;  %s221_s1 = inlined_call_operand.vmem [shape: f32[1,32], index: 1, kind: input, shape index: {}]   ;;  %s222_s2 = inlined_call_operand.vmem [shape: f32[1,32], index: 2, kind: input, shape index: {}]   ;;  %s223_s4 = inlined_call_operand.vmem [shape: f32[1,96], index: 4, kind: input, shape index: {}]   ;;  %s224_s3 = inlined_call_operand.vmem [shape: bf16[32,96], index: 3, kind: input, shape index: {}]   ;;  %s225_s5 = inlined_call_operand.vmem [shape: bf16[10,96], index: 5, kind: output, shape index: {}]  }
   0x1   :  { %v21_v0 = vld [vmem:[%s220_s0] sm:$0xff]  ;;  %v22_v2 = vld [vmem:[%s220_s0 + $0x8] sm:$0x3]  ;;  %151 = vrcp.f32 %v157_v4  ;;  %vm130_vm10 = vcmask 778240  }
   0x2   :  { %v26_v1 = vsel %vm25_vm0, %v21_v0, 0.0  ;;  %v30_v3 = vsel %vm29_vm1, %v22_v2, 0.0  ;;  %v146_v21 = vld [vmem:[%s224_s3 + $0x8] sm:$0xff]  ;;  %v145_v23 = vld [vmem:[%s224_s3] sm:$0xff] }
   0x3   :  { %27 = vadd.xlane.f32.xlu0 %v26_v1  ;;  %118 = vmatpush.bf16.msra.mxu0 %v146_v21  ;;  %v148_v42 = vld [vmem:[%s221_s1] ss:$0 sm:$0xff] }
   0x4   :  { %v149_v47 = vld [vmem:[%s222_s2] ss:$0 sm:$0xff] }
   0x5   :  { %v150_v52 = vld [vmem:[%s223_s4] ss:$0 sm:$0xff] }
   0x7   :  { %v152_v5 = vpop.eup %151  ;;  %119 = vmatpush.bf16.msra.mxu0 %v145_v23 }
   0x8   :  { %v34_v6 = vmul.f32 32.0, %v152_v5  ;;  %vm38_vm2 = vweird.f32 %v152_v5 }
   0xa   :  { %v35_v7 = vsub.f32 1.0, %v34_v6 }
   0xb   :  { %31 = vadd.xlane.f32.xlu0 %v30_v3 }
   0xc   :  { %v36_v8 = vmul.f32 %v152_v5, %v35_v7 }
   0xe   :  { %v37_v9 = vadd.f32 %v152_v5, %v36_v8 }
  0x10   :  { %v39_v10 = vsel %vm38_vm2, %v152_v5, %v37_v9 }
  0x76   :  { %v28_v11 = vpop.xlane.xlu0 %27 }
  0x77   :  { %v40_v12 = vmul.f32 %v39_v10, %v28_v11 }
  0x79   :  { %v42_v13 = vsub.f32 %v21_v0, %v40_v12 }
  0x7b   :  { %v44_v14 = vmul.f32 %v42_v13, %v42_v13 }
  0x7d   :  { %v46_v15 = vsel %vm25_vm0, %v44_v14, 0.0 }
  0x7e   :  { %47 = vadd.xlane.f32.xlu1 %v46_v15  ;;  %v32_v16 = vpop.xlane.xlu0 %31 }
  0x7f   :  { %v41_v17 = vmul.f32 %v39_v10, %v32_v16 }
  0x81   :  { %v43_v18 = vsub.f32 %v22_v2, %v41_v17 }
  0x83   :  { %v45_v19 = vmul.f32 %v43_v18, %v43_v18 }
  0x85   :  { %v49_v20 = vsel %vm29_vm1, %v45_v19, 0.0 }
  0x86   :  { %50 = vadd.xlane.f32.xlu1 %v49_v20 }
  0xf1   :  { %v48_v22 = vpop.xlane.xlu1 %47 }
  0xf2   :  { %v52_v24 = vmul.f32 %v48_v22, %v39_v10 }
  0xf4   :  { %v54_v25 = vadd.f32 1e-05, %v52_v24 }
  0xf6   :  { %153 = vrsqrt.f32 %v54_v25  ;;  %vm62_vm4 = vweird.f32 %v54_v25 }
  0xf9   :  { %v51_v26 = vpop.xlane.xlu1 %50 }
  0xfa   :  { %v53_v27 = vmul.f32 %v51_v26, %v39_v10 }
  0xfc   :  { %v154_v28 = vpop.eup %153  ;;  %v55_v29 = vadd.f32 1e-05, %v53_v27 }
  0xfd   :  { %v57_v30 = vmul.f32 %v154_v28, %v54_v25  ;;  %vm63_vm3 = vweird.f32 %v154_v28 }
  0xfe   :  { %155 = vrsqrt.f32 %v55_v29  ;;  %vm64_vm5 = vmor %vm62_vm4, %vm63_vm3  ;;  %vm72_vm7 = vweird.f32 %v55_v29 }
  0xff   :  { %v58_v31 = vmul.f32 %v154_v28, %v57_v30 }
 0x101   :  { %v59_v32 = vmul.f32 0.5, %v58_v31 }
 0x103   :  { %v60_v33 = vsub.f32 1.5, %v59_v32 }
 0x104   :  { %v156_v34 = vpop.eup %155 }
 0x105   :  { %v61_v35 = vmul.f32 %v154_v28, %v60_v33  ;;  %v67_v36 = vmul.f32 %v156_v34, %v55_v29  ;;  %vm73_vm6 = vweird.f32 %v156_v34 }
 0x106   :  { %vm74_vm8 = vmor %vm72_vm7, %vm73_vm6 }
 0x107   :  { %v68_v37 = vmul.f32 %v156_v34, %v67_v36  ;;  %v65_v38 = vsel %vm64_vm5, %v154_v28, %v61_v35 }
 0x108   :  { %v76_v41 = vmul.f32 %v65_v38, %v42_v13 }
 0x109   :  { %v69_v39 = vmul.f32 0.5, %v68_v37 }
 0x10a   :  { %v81_v46 = vmul.f32 %v148_v42, %v76_v41 }
 0x10b   :  { %v70_v40 = vsub.f32 1.5, %v69_v39 }
 0x10c   :  { %v86_v49 = vadd.f32 %v149_v47, %v81_v46 }
 0x10d   :  { %v71_v43 = vmul.f32 %v156_v34, %v70_v40 }
 0x10f   :  { %v75_v44 = vsel %vm74_vm8, %v156_v34, %v71_v43 }
 0x110   :  { %v77_v45 = vmul.f32 %v75_v44, %v43_v18 }
 0x112   :  { %v82_v48 = vmul.f32 %v148_v42, %v77_v45 }
 0x114   :  { %v87_v50 = vadd.f32 %v149_v47, %v82_v48 }
 0x116   :  { %v92_v51 = vpack.c.bf16 %v87_v50, %v86_v49 }
 0x118   :  { %144 = vmatmul.msk.bf16.vlgmr.msra.gmra.mxu0 %vm25_vm0, %v92_v51 }
 0x195   :  { %v121_v53 = vpop.f32.mrf.mxu0 }
 0x196   :  { %v122_v54 = vadd.f32 %v150_v52, %v121_v53 }
 0x198   :  { %v126_v55 = vpack.c.bf16 %v122_v54, %v122_v54 }
 0x19a   :  { %129 = vst.msk [vmem:[%s225_s5] sm:$0xf] %vm128_vm9, %v126_v55 }
 0x19d   :  { %v123_v56 = vpop.f32.mrf.mxu0 }
 0x19e   :  { %v124_v57 = vadd.f32 %v150_v52, %v123_v56 }
 0x1a0   :  { %v127_v58 = vpack.c.bf16 %v124_v57, %v124_v57 }
 0x1a2   :  { %131 = vst.msk [vmem:[%s225_s5 + $0x4] sm:$0x1] %vm130_vm10, %v127_v58 }

// kernel: hf_adapter_forward.44
= control target key start
LH: loop header
LB: loop body
LE: loop exit
PB: predicated region body
PF: predicated region fallthrough
CT: control target
= control target key end

     0   :  { %s414_s12 = smov 0   ;;  %s443_s0 = inlined_call_operand.vmem [shape: bf16[8,5,8], index: 0, kind: input, shape index: {}]   ;;  %s444_s1 = inlined_call_operand.vmem [shape: bf16[8,5,8], index: 1, kind: input, shape index: {}]   ;;  %s445_s2 = inlined_call_operand.vmem [shape: bf16[8,5,8], index: 2, kind: input, shape index: {}]   ;;  %s446_s3 = inlined_call_operand.vmem [shape: bf16[8,5,8], index: 3, kind: output, shape index: {}]  }
   0x1 LB: > { %s359_s13 = sadd.s32 4294967295, %s391_s12   ;;  %p363_p0 = scmp.ge.s32.totalorder %s391_s12, 1  ;;  %s391_s12 = sphi %s414_s12, %s13_s12  }
   0x2   : > { %p154_p1 = scmp.lt.s32.totalorder %s391_s12, 9 }
   0x4   : > { %p155_p2 = pnand %p363_p0, %p154_p1 }
   0x5   : > { %p184_p3 = scmp.lt.s32.totalorder (!%p155_p2), %s359_s13, 7 }
   0x6   : > { %158 = sbr.rel (%p155_p2) target bundleno = 551 (0x227), region = 32 }
   0xb   : > { %s448_s13 = smov (!%p184_p3, %s359_s13), 7  ;;  %vm204_vm0 = vcmask 64512   ;;  %vm225_vm1 = vcmask 36864   ;;  %vm255_vm2 = vcmask 1041408   ;;  %vm256_vm3 = vcmask 1042432  }
   0xc   : > { %s422_s14 = sshll.u32 %s448_s13, 2  ;;  %v393_v13 = vmov 65535   ;;  %vm251_vm8 = vcmask 39936   ;;  %vm276_vm9 = vcmask 59392   ;;  %vm277_vm10 = vsmask.f32 2304 }
   0xd   : > { %s191_s17 = scalar_lea.vmem %s444_s1, %s422_s14  ;;  %s187_s20 = scalar_lea.vmem %s443_s0, %s422_s14  ;;  %v257_v14 = vsel %vm255_vm2, 4294967295, %v393_v13  ;;  %vm278_vm11 = vmand %vm276_vm9, %vm277_vm10 }
   0xe   : > { %v202_v0 = vld [vmem:[%s191_s17] sm:$0x7]  ;;  %s195_s23 = scalar_lea.vmem %s445_s2, %s422_s14  ;;  %v258_v15 = vsel %vm256_vm3, %v257_v14, 0  ;;  %s199_s26 = scalar_lea.vmem %s446_s3, %s422_s14 }
   0xf   : > { %v209_v1 = vsel %vm204_vm0, %v202_v0, 0  ;;  %v201_v2 = vld [vmem:[%s187_s20] sm:$0x7] }
  0x10   : > { %218 = vmatpush.bf16.xpose.msra.mxu0 %v209_v1  ;;  %v203_v12 = vld [vmem:[%s195_s23] sm:$0x7] }
  0x11   : > { %v260_v16 = vand.u32 %v258_v15, %v203_v12  ;;  %v279_v31 = vld [vmem:[%s199_s26] sm:$0x7] }
  0x13   : > { %269 = vmatpush.bf16.msra.mxu1 %v260_v16 }
  0x17   : > { %368 = vmatmul.msk.bf16.vlgmr.msra.gmra.mxu0 %vm204_vm0, %v201_v2 }
  0x94   : > { %v220_v3 = vpop.f32.mrf.mxu0 }
  0x95   : > { %v224_v4 = vmul.f32 0.35355338, %v220_v3 }
  0x97   : > { %v226_v5 = vsel %vm225_vm1, %v224_v4, -inf }
  0x98   : > { %227 = vmax.xlane.f32.xlu0 %v226_v5 }
  0x9c   : > { %v222_v6 = vpop.f32.mrf.mxu0 }
 0x10b   : > { %v228_v7 = vpop.xlane.xlu0 %227 }
 0x10c   : > { %v229_v8 = vsub.f32 %v224_v4, %v228_v7 }
 0x10e   : > { %v230_v9 = vmul.f32 1.442695, %v229_v8 }
 0x110   : > { %381 = vpow2.f32 %v230_v9 }
 0x116   : > { %v382_v10 = vpop.eup %381 }
 0x117   : > { %v232_v11 = vsel %vm225_vm1, %v382_v10, 0.0 }
 0x118   : > { %233 = vadd.xlane.f32.xlu0 %v232_v11 }
 0x18b   : > { %v234_v17 = vpop.xlane.xlu0 %233 }
 0x18c   : > { %383 = vrcp.f32 %v234_v17  ;;  %v246_v21 = vand.u32 2147483648, %v234_v17  ;;  %v244_v23 = vand.u32 2147483647, %v234_v17  ;;  %vm240_vm5 = vweird.f32 %v234_v17 }
 0x18e   : > { %v247_v25 = vor.u32 1.1754944e-38, %v246_v21  ;;  %vm245_vm7 = vcmp.eq.f32.partialorder %v244_v23, 8.507059e+37 }
 0x192   : > { %v384_v18 = vpop.eup %383 }
 0x193   : > { %v236_v19 = vmul.f32 %v384_v18, %v234_v17  ;;  %vm241_vm4 = vweird.f32 %v384_v18 }
 0x194   : > { %vm242_vm6 = vmor %vm240_vm5, %vm241_vm4 }
 0x195   : > { %v237_v20 = vsub.f32 1.0, %v236_v19 }
 0x197   : > { %v238_v22 = vmul.f32 %v384_v18, %v237_v20 }
 0x199   : > { %v239_v24 = vadd.f32 %v384_v18, %v238_v22 }
 0x19b   : > { %v243_v26 = vsel %vm242_vm6, %v384_v18, %v239_v24 }
 0x19c   : > { %v248_v27 = vsel %vm245_vm7, %v247_v25, %v243_v26 }
 0x19d   : > { %v249_v28 = vmul.f32 %v382_v10, %v248_v27 }
 0x19f   : > { %v250_v29 = vpack.c.bf16 %v249_v28, %v249_v28 }
 0x1a1   : > { %369 = vmatmul.msk.bf16.vlgmr.msra.gmra.mxu1 %vm251_vm8, %v250_v29 }
 0x21e   : > { %v271_v30 = vpop.f32.mrf.mxu1 }
 0x21f   : > { %v275_v32 = vpack.c.bf16 %v271_v30, %v271_v30 }
 0x221   : > { %v280_v33 = vsel %vm278_vm11, %v275_v32, %v279_v31 }
 0x222   : > { %281 = vst [vmem:[%s199_s26] sm:$0x7] %v280_v33 }
 0x226   : > { %v273_v34 = vpop.f32.mrf.mxu1 }
 0x227 PF: > { %s13_s12 = sadd.s32 1, %s391_s12  }
 0x228   : > { %p10_p4 = scmp.ge.s32.totalorder %s13_s12, 10  }
 0x22a   :  { %12 = sbr.rel (!%p10_p4) target bundleno = 1 (0x1), region = 68 }

// kernel: hf_adapter_forward.45
= control target key start
LH: loop header
LB: loop body
LE: loop exit
PB: predicated region body
PF: predicated region fallthrough
CT: control target
= control target key end

     0   :  { %vm45_vm0 = vcmask 261120   ;;  %vm68_vm1 = vcmask 254976   ;;  %s143_s1 = inlined_call_operand.vmem [shape: bf16[32,32], index: 1, kind: input, shape index: {}]   ;;  %s144_s0 = inlined_call_operand.vmem [shape: bf16[10,32], index: 0, kind: input, shape index: {}]   ;;  %s145_s2 = inlined_call_operand.vmem [shape: f32[1,32], index: 2, kind: input, shape index: {}]   ;;  %s146_s3 = inlined_call_operand.vmem [shape: f32[10,32], index: 3, kind: input, shape index: {}]   ;;  %s147_s4 = inlined_call_operand.vmem [shape: f32[10,32], index: 4, kind: output, shape index: {}]  }
   0x1   :  { %v89_v0 = vld [vmem:[%s143_s1 + $0x8] sm:$0xff]  ;;  %v88_v1 = vld [vmem:[%s143_s1] sm:$0xff] }
   0x2   :  { %55 = vmatpush.bf16.msra.mxu0 %v89_v0  ;;  %v76_v2 = vld [vmem:[%s144_s0] sm:$0xf]  ;;  %v87_v3 = vld [vmem:[%s144_s0] sm:$0x10]  ;;  %v64_v11 = vld [vmem:[%s146_s3 + $0x8] sm:$0x3] }
   0x3   :  { %v77_v4 = vor.u32 %v87_v3, %v76_v2  ;;  %v90_v5 = vld [vmem:[%s145_s2] ss:$0 sm:$0xff] }
   0x4   :  { %v63_v7 = vld [vmem:[%s146_s3] sm:$0xff] }
   0x6   :  { %56 = vmatpush.bf16.msra.mxu0 %v88_v1 }
   0x9   :  { %86 = vmatmul.msk.bf16.vlgmr.msra.gmra.mxu0 %vm45_vm0, %v77_v4 }
  0x86   :  { %v58_v6 = vpop.f32.mrf.mxu0 }
  0x87   :  { %v59_v8 = vadd.f32 %v90_v5, %v58_v6 }
  0x89   :  { %v65_v9 = vadd.f32 %v63_v7, %v59_v8 }
  0x8b   :  { %67 = vst.msk [vmem:[%s147_s4] sm:$0xff] %vm45_vm0, %v65_v9 }
  0x8e   :  { %v60_v10 = vpop.f32.mrf.mxu0 }
  0x8f   :  { %v61_v12 = vadd.f32 %v90_v5, %v60_v10 }
  0x91   :  { %v66_v13 = vadd.f32 %v64_v11, %v61_v12 }
  0x93   :  { %69 = vst.msk [vmem:[%s147_s4 + $0x8] sm:$0x3] %vm68_vm1, %v66_v13 }

// kernel: hf_adapter_forward.46
= control target key start
LH: loop header
LB: loop body
LE: loop exit
PB: predicated region body
PF: predicated region fallthrough
CT: control target
= control target key end

     0   :  { %vm31_vm0 = vcmask 261120   ;;  %vm35_vm1 = vcmask 254976   ;;  %v337_v4 = vmov 32.0   ;;  %s449_s0 = inlined_call_operand.vmem [shape: f32[10,32], index: 0, kind: input, shape index: {}]   ;;  %s450_s1 = inlined_call_operand.vmem [shape: f32[1,32], index: 1, kind: input, shape index: {}]   ;;  %s451_s2 = inlined_call_operand.vmem [shape: f32[1,32], index: 2, kind: input, shape index: {}]   ;;  %s452_s4 = inlined_call_operand.vmem [shape: f32[1,128], index: 4, kind: input, shape index: {}]   ;;  %s453_s3 = inlined_call_operand.vmem [shape: bf16[32,128], index: 3, kind: input, shape index: {}]   ;;  %s454_s6 = inlined_call_operand.vmem [shape: f32[1,32], index: 6, kind: input, shape index: {}]   ;;  %s455_s5 = inlined_call_operand.vmem [shape: bf16[128,32], index: 5, kind: input, shape index: {}]   ;;  %s456_s7 = inlined_call_operand.vmem [shape: f32[10,32], index: 7, kind: output, shape index: {}]  }
   0x1   :  { %v381_v0 = vld [vmem:[%s449_s0] sm:$0xff]  ;;  %v388_v2 = vld [vmem:[%s449_s0 + $0x8] sm:$0x3]  ;;  %323 = vrcp.f32 %v337_v4  ;;  %v317_v52 = vld [vmem:[%s455_s5 + $0x38] sm:$0xff] }
   0x2   :  { %v32_v1 = vsel %vm31_vm0, %v381_v0, 0.0  ;;  %v36_v3 = vsel %vm35_vm1, %v388_v2, 0.0  ;;  %v309_v21 = vld [vmem:[%s453_s3 + $0x8] sm:$0xff]  ;;  %v308_v23 = vld [vmem:[%s453_s3] sm:$0xff]  ;;  %243 = vmatpush.bf16.msra.mxu1 %v317_v52  ;;  %v316_v53 = vld [vmem:[%s455_s5 + $0x30] sm:$0xff] }
   0x3   :  { %33 = vadd.xlane.f32.xlu0 %v32_v1  ;;  %124 = vmatpush.bf16.msra.mxu0 %v309_v21  ;;  %v319_v42 = vld [vmem:[%s450_s1] ss:$0 sm:$0xff]  ;;  %v315_v54 = vld [vmem:[%s455_s5 + $0x28] sm:$0xff]  ;;  %v313_v56 = vld [vmem:[%s455_s5 + $0x18] sm:$0xff] }
   0x4   :  { %v320_v47 = vld [vmem:[%s451_s2] ss:$0 sm:$0xff]  ;;  %v312_v59 = vld [vmem:[%s455_s5 + $0x10] sm:$0xff]  ;;  %v311_v62 = vld [vmem:[%s455_s5 + $0x8] sm:$0xff] }
   0x5   :  { %v314_v55 = vld [vmem:[%s455_s5 + $0x20] sm:$0xff] }
   0x6   :  { %244 = vmatpush.bf16.msra.mxu1 %v316_v53  ;;  %v321_v57 = vld [vmem:[%s452_s4] ss:$0 sm:$0xff] }
   0x7   :  { %v324_v5 = vpop.eup %323  ;;  %125 = vmatpush.bf16.msra.mxu0 %v308_v23 }
   0x8   :  { %v40_v6 = vmul.f32 32.0, %v324_v5  ;;  %vm44_vm2 = vweird.f32 %v324_v5 }
   0xa   :  { %v41_v7 = vsub.f32 1.0, %v40_v6  ;;  %245 = vmatpush.bf16.msra.mxu1 %v315_v54 }
   0xb   :  { %37 = vadd.xlane.f32.xlu0 %v36_v3  ;;  %v310_v3 = vld [vmem:[%s455_s5] sm:$0xff] }
   0xc   :  { %v42_v8 = vmul.f32 %v324_v5, %v41_v7 }
   0xe   :  { %v43_v9 = vadd.f32 %v324_v5, %v42_v8  ;;  %246 = vmatpush.bf16.msra.mxu1 %v314_v55 }
  0x10   :  { %v45_v10 = vsel %vm44_vm2, %v324_v5, %v43_v9 }
  0x12   :  { %247 = vmatpush.bf16.msra.mxu1 %v313_v56 }
  0x16   :  { %248 = vmatpush.bf16.msra.mxu1 %v312_v59 }
  0x1a   :  { %249 = vmatpush.bf16.msra.mxu1 %v311_v62 }
  0x1e   :  { %250 = vmatpush.bf16.msra.mxu1 %v310_v3 }
  0x76   :  { %v34_v11 = vpop.xlane.xlu0 %33 }
  0x77   :  { %v46_v12 = vmul.f32 %v45_v10, %v34_v11 }
  0x79   :  { %v48_v13 = vsub.f32 %v381_v0, %v46_v12 }
  0x7b   :  { %v50_v14 = vmul.f32 %v48_v13, %v48_v13 }
  0x7d   :  { %v52_v15 = vsel %vm31_vm0, %v50_v14, 0.0 }
  0x7e   :  { %53 = vadd.xlane.f32.xlu1 %v52_v15  ;;  %v38_v16 = vpop.xlane.xlu0 %37 }
  0x7f   :  { %v47_v17 = vmul.f32 %v45_v10, %v38_v16 }
  0x81   :  { %v49_v18 = vsub.f32 %v388_v2, %v47_v17 }
  0x83   :  { %v51_v19 = vmul.f32 %v49_v18, %v49_v18 }
  0x85   :  { %v55_v20 = vsel %vm35_vm1, %v51_v19, 0.0 }
  0x86   :  { %56 = vadd.xlane.f32.xlu1 %v55_v20 }
  0xf1   :  { %v54_v22 = vpop.xlane.xlu1 %53 }
  0xf2   :  { %v58_v24 = vmul.f32 %v54_v22, %v45_v10 }
  0xf4   :  { %v60_v25 = vadd.f32 1e-05, %v58_v24 }
  0xf6   :  { %325 = vrsqrt.f32 %v60_v25  ;;  %vm68_vm4 = vweird.f32 %v60_v25 }
  0xf9   :  { %v57_v26 = vpop.xlane.xlu1 %56 }
  0xfa   :  { %v59_v27 = vmul.f32 %v57_v26, %v45_v10 }
  0xfc   :  { %v326_v28 = vpop.eup %325  ;;  %v61_v29 = vadd.f32 1e-05, %v59_v27 }
  0xfd   :  { %v63_v30 = vmul.f32 %v326_v28, %v60_v25  ;;  %vm69_vm3 = vweird.f32 %v326_v28 }
  0xfe   :  { %327 = vrsqrt.f32 %v61_v29  ;;  %vm70_vm5 = vmor %vm68_vm4, %vm69_vm3  ;;  %vm78_vm7 = vweird.f32 %v61_v29 }
  0xff   :  { %v64_v31 = vmul.f32 %v326_v28, %v63_v30 }
 0x101   :  { %v65_v32 = vmul.f32 0.5, %v64_v31 }
 0x103   :  { %v66_v33 = vsub.f32 1.5, %v65_v32 }
 0x104   :  { %v328_v34 = vpop.eup %327 }
 0x105   :  { %v67_v35 = vmul.f32 %v326_v28, %v66_v33  ;;  %v73_v36 = vmul.f32 %v328_v34, %v61_v29  ;;  %vm79_vm6 = vweird.f32 %v328_v34 }
 0x106   :  { %vm80_vm8 = vmor %vm78_vm7, %vm79_vm6 }
 0x107   :  { %v74_v37 = vmul.f32 %v328_v34, %v73_v36  ;;  %v71_v38 = vsel %vm70_vm5, %v326_v28, %v67_v35 }
 0x108   :  { %v82_v41 = vmul.f32 %v71_v38, %v48_v13 }
 0x109   :  { %v75_v39 = vmul.f32 0.5, %v74_v37 }
 0x10a   :  { %v87_v46 = vmul.f32 %v319_v42, %v82_v41 }
 0x10b   :  { %v76_v40 = vsub.f32 1.5, %v75_v39 }
 0x10c   :  { %v92_v49 = vadd.f32 %v320_v47, %v87_v46 }
 0x10d   :  { %v77_v43 = vmul.f32 %v328_v34, %v76_v40 }
 0x10f   :  { %v81_v44 = vsel %vm80_vm8, %v328_v34, %v77_v43  ;;  %v322_v34 = vld [vmem:[%s454_s6] ss:$0 sm:$0xff] }
 0x110   :  { %v83_v45 = vmul.f32 %v81_v44, %v49_v18 }
 0x112   :  { %v88_v48 = vmul.f32 %v319_v42, %v83_v45 }
 0x114   :  { %v93_v50 = vadd.f32 %v320_v47, %v88_v48 }
 0x116   :  { %v94_v51 = vpack.c.bf16 %v93_v50, %v92_v49 }
 0x118   :  { %273 = vmatmul.msk.bf16.vlgmr.msra.gmra.mxu0 %vm31_vm0, %v94_v51 }
 0x195   :  { %v127_v58 = vpop.f32.mrf.mxu0 }
 0x196   :  { %v128_v60 = vadd.f32 %v321_v57, %v127_v58 }
 0x198   :  { %v274_v61 = vmul.f32 -1.702, %v128_v60 }
 0x19a   :  { %v136_v63 = vmul.f32 1.442695, %v274_v61 }
 0x19c   :  { %329 = vpow2.f32 %v136_v63 }
 0x19d   :  { %v129_v1 = vpop.f32.mrf.mxu0 }
 0x19e   :  { %v130_v4 = vadd.f32 %v321_v57, %v129_v1 }
 0x1a0   :  { %v275_v5 = vmul.f32 -1.702, %v130_v4 }
 0x1a2   :  { %v330_v6 = vpop.eup %329  ;;  %v138_v7 = vmul.f32 1.442695, %v275_v5 }
 0x1a3   :  { %v140_v8 = vadd.f32 1.0, %v330_v6 }
 0x1a4   :  { %331 = vpow2.f32 %v138_v7 }
 0x1a5   :  { %333 = vrcp.f32 %v140_v8  ;;  %v153_v18 = vand.u32 2147483648, %v140_v8  ;;  %vm147_vm10 = vweird.f32 %v140_v8  ;;  %v151_v19 = vand.u32 2147483647, %v140_v8 }
 0x1a7   :  { %v154_v25 = vor.u32 1.1754944e-38, %v153_v18  ;;  %vm152_vm13 = vcmp.eq.f32.partialorder %v151_v19, 8.507059e+37 }
 0x1aa   :  { %v332_v9 = vpop.eup %331 }
 0x1ab   :  { %v334_v10 = vpop.eup %333  ;;  %v141_v11 = vadd.f32 1.0, %v332_v9 }
 0x1ac   :  { %v143_v12 = vmul.f32 %v334_v10, %v140_v8  ;;  %vm148_vm9 = vweird.f32 %v334_v10 }
 0x1ad   :  { %335 = vrcp.f32 %v141_v11  ;;  %vm149_vm11 = vmor %vm147_vm10, %vm148_vm9  ;;  %v168_v21 = vand.u32 2147483648, %v141_v11  ;;  %v166_v24 = vand.u32 2147483647, %v141_v11  ;;  %vm162_vm14 = vweird.f32 %v141_v11 }
 0x1ae   :  { %v144_v13 = vsub.f32 1.0, %v143_v12 }
 0x1af   :  { %v169_v28 = vor.u32 1.1754944e-38, %v168_v21  ;;  %vm167_vm2 = vcmp.eq.f32.partialorder %v166_v24, 8.507059e+37 }
 0x1b0   :  { %v145_v14 = vmul.f32 %v334_v10, %v144_v13 }
 0x1b2   :  { %v146_v16 = vadd.f32 %v334_v10, %v145_v14 }
 0x1b3   :  { %v336_v15 = vpop.eup %335 }
 0x1b4   :  { %v158_v17 = vmul.f32 %v336_v15, %v141_v11  ;;  %v150_v22 = vsel %vm149_vm11, %v334_v10, %v146_v16  ;;  %vm163_vm12 = vweird.f32 %v336_v15 }
 0x1b5   :  { %v155_v27 = vsel %vm152_vm13, %v154_v25, %v150_v22  ;;  %vm164_vm15 = vmor %vm162_vm14, %vm163_vm12 }
 0x1b6   :  { %v159_v20 = vsub.f32 1.0, %v158_v17  ;;  %v172_v31 = vmul.f32 %v155_v27, %v128_v60 }
 0x1b8   :  { %v160_v23 = vmul.f32 %v336_v15, %v159_v20 }
 0x1ba   :  { %v161_v26 = vadd.f32 %v336_v15, %v160_v23 }
 0x1bc   :  { %v165_v29 = vsel %vm164_vm15, %v336_v15, %v161_v26 }
 0x1bd   :  { %v170_v30 = vsel %vm167_vm2, %v169_v28, %v165_v29 }
 0x1be   :  { %v173_v32 = vmul.f32 %v170_v30, %v130_v4 }
 0x1c0   :  { %v174_v33 = vpack.c.bf16 %v173_v32, %v172_v31 }
 0x1c2   :  { %251 = vmatmul.bf16.vlgmr.msra.gmra.mxu1 %v174_v33 }
 0x23f   :  { %v252_v35 = vpop.f32.mrf.mxu1 }
 0x240   :  { %v253_v36 = vadd.f32 %v322_v34, %v252_v35 }
 0x242   :  { %v257_v37 = vadd.f32 %v253_v36, %v381_v0 }
 0x244   :  { %259 = vst.msk [vmem:[%s456_s7] sm:$0xff] %vm31_vm0, %v257_v37 }
 0x247   :  { %v254_v38 = vpop.f32.mrf.mxu1 }
 0x248   :  { %v255_v39 = vadd.f32 %v322_v34, %v254_v38 }
 0x24a   :  { %v258_v40 = vadd.f32 %v255_v39, %v388_v2 }
 0x24c   :  { %260 = vst.msk [vmem:[%s456_s7 + $0x8] sm:$0x3] %vm35_vm1, %v258_v40 }

// kernel: hf_adapter_forward.51
= control target key start
LH: loop header
LB: loop body
LE: loop exit
PB: predicated region body
PF: predicated region fallthrough
CT: control target
= control target key end

     0   :  { %vm22_vm0 = vcmask 261120   ;;  %vm26_vm1 = vcmask 254976   ;;  %v149_v4 = vmov 32.0   ;;  %vm121_vm9 = vcmask 257024   ;;  %s204_s0 = inlined_call_operand.vmem [shape: f32[10,32], index: 0, kind: input, shape index: {}]   ;;  %s205_s1 = inlined_call_operand.vmem [shape: f32[1,32], index: 1, kind: input, shape index: {}]   ;;  %s206_s2 = inlined_call_operand.vmem [shape: f32[1,32], index: 2, kind: input, shape index: {}]   ;;  %s207_s3 = inlined_call_operand.vmem [shape: bf16[32,32], index: 3, kind: input, shape index: {}]   ;;  %s208_s4 = inlined_call_operand.vmem [shape: bf16[10,32], index: 4, kind: output, shape index: {}]  }
   0x1   :  { %v18_v0 = vld [vmem:[%s204_s0] sm:$0xff]  ;;  %v19_v2 = vld [vmem:[%s204_s0 + $0x8] sm:$0x3]  ;;  %143 = vrcp.f32 %v149_v4  ;;  %vm123_vm10 = vcmask 253952  }
   0x2   :  { %v23_v1 = vsel %vm22_vm0, %v18_v0, 0.0  ;;  %v27_v3 = vsel %vm26_vm1, %v19_v2, 0.0  ;;  %v139_v21 = vld [vmem:[%s207_s3 + $0x8] sm:$0xff]  ;;  %v138_v23 = vld [vmem:[%s207_s3] sm:$0xff] }
   0x3   :  { %24 = vadd.xlane.f32.xlu0 %v23_v1  ;;  %111 = vmatpush.bf16.msra.mxu0 %v139_v21  ;;  %v141_v42 = vld [vmem:[%s205_s1] ss:$0 sm:$0xff] }
   0x4   :  { %v142_v47 = vld [vmem:[%s206_s2] ss:$0 sm:$0xff] }
   0x7   :  { %v144_v5 = vpop.eup %143  ;;  %112 = vmatpush.bf16.msra.mxu0 %v138_v23 }
   0x8   :  { %v31_v6 = vmul.f32 32.0, %v144_v5  ;;  %vm35_vm2 = vweird.f32 %v144_v5 }
   0xa   :  { %v32_v7 = vsub.f32 1.0, %v31_v6 }
   0xb   :  { %28 = vadd.xlane.f32.xlu0 %v27_v3 }
   0xc   :  { %v33_v8 = vmul.f32 %v144_v5, %v32_v7 }
   0xe   :  { %v34_v9 = vadd.f32 %v144_v5, %v33_v8 }
  0x10   :  { %v36_v10 = vsel %vm35_vm2, %v144_v5, %v34_v9 }
  0x76   :  { %v25_v11 = vpop.xlane.xlu0 %24 }
  0x77   :  { %v37_v12 = vmul.f32 %v36_v10, %v25_v11 }
  0x79   :  { %v39_v13 = vsub.f32 %v18_v0, %v37_v12 }
  0x7b   :  { %v41_v14 = vmul.f32 %v39_v13, %v39_v13 }
  0x7d   :  { %v43_v15 = vsel %vm22_vm0, %v41_v14, 0.0 }
  0x7e   :  { %44 = vadd.xlane.f32.xlu1 %v43_v15  ;;  %v29_v16 = vpop.xlane.xlu0 %28 }
  0x7f   :  { %v38_v17 = vmul.f32 %v36_v10, %v29_v16 }
  0x81   :  { %v40_v18 = vsub.f32 %v19_v2, %v38_v17 }
  0x83   :  { %v42_v19 = vmul.f32 %v40_v18, %v40_v18 }
  0x85   :  { %v46_v20 = vsel %vm26_vm1, %v42_v19, 0.0 }
  0x86   :  { %47 = vadd.xlane.f32.xlu1 %v46_v20 }
  0xf1   :  { %v45_v22 = vpop.xlane.xlu1 %44 }
  0xf2   :  { %v49_v24 = vmul.f32 %v45_v22, %v36_v10 }
  0xf4   :  { %v51_v25 = vadd.f32 1e-05, %v49_v24 }
  0xf6   :  { %145 = vrsqrt.f32 %v51_v25  ;;  %vm59_vm4 = vweird.f32 %v51_v25 }
  0xf9   :  { %v48_v26 = vpop.xlane.xlu1 %47 }
  0xfa   :  { %v50_v27 = vmul.f32 %v48_v26, %v36_v10 }
  0xfc   :  { %v146_v28 = vpop.eup %145  ;;  %v52_v29 = vadd.f32 1e-05, %v50_v27 }
  0xfd   :  { %v54_v30 = vmul.f32 %v146_v28, %v51_v25  ;;  %vm60_vm3 = vweird.f32 %v146_v28 }
  0xfe   :  { %147 = vrsqrt.f32 %v52_v29  ;;  %vm61_vm5 = vmor %vm59_vm4, %vm60_vm3  ;;  %vm69_vm7 = vweird.f32 %v52_v29 }
  0xff   :  { %v55_v31 = vmul.f32 %v146_v28, %v54_v30 }
 0x101   :  { %v56_v32 = vmul.f32 0.5, %v55_v31 }
 0x103   :  { %v57_v33 = vsub.f32 1.5, %v56_v32 }
 0x104   :  { %v148_v34 = vpop.eup %147 }
 0x105   :  { %v58_v35 = vmul.f32 %v146_v28, %v57_v33  ;;  %v64_v36 = vmul.f32 %v148_v34, %v52_v29  ;;  %vm70_vm6 = vweird.f32 %v148_v34 }
 0x106   :  { %vm71_vm8 = vmor %vm69_vm7, %vm70_vm6 }
 0x107   :  { %v65_v37 = vmul.f32 %v148_v34, %v64_v36  ;;  %v62_v38 = vsel %vm61_vm5, %v146_v28, %v58_v35 }
 0x108   :  { %v73_v41 = vmul.f32 %v62_v38, %v39_v13 }
 0x109   :  { %v66_v39 = vmul.f32 0.5, %v65_v37 }
 0x10a   :  { %v78_v46 = vmul.f32 %v141_v42, %v73_v41 }
 0x10b   :  { %v67_v40 = vsub.f32 1.5, %v66_v39 }
 0x10c   :  { %v83_v49 = vadd.f32 %v142_v47, %v78_v46 }
 0x10d   :  { %v68_v43 = vmul.f32 %v148_v34, %v67_v40 }
 0x10f   :  { %v72_v44 = vsel %vm71_vm8, %v148_v34, %v68_v43 }
 0x110   :  { %v74_v45 = vmul.f32 %v72_v44, %v40_v18 }
 0x112   :  { %v79_v48 = vmul.f32 %v141_v42, %v74_v45 }
 0x114   :  { %v84_v50 = vadd.f32 %v142_v47, %v79_v48 }
 0x116   :  { %v89_v51 = vpack.c.bf16 %v84_v50, %v83_v49 }
 0x118   :  { %137 = vmatmul.msk.bf16.vlgmr.msra.gmra.mxu0 %vm22_vm0, %v89_v51 }
 0x195   :  { %v114_v52 = vpop.f32.mrf.mxu0 }
 0x196   :  { %v119_v53 = vpack.c.bf16 %v114_v52, %v114_v52 }
 0x198   :  { %122 = vst.msk [vmem:[%s208_s4] sm:$0xf] %vm121_vm9, %v119_v53 }
 0x19d   :  { %v116_v54 = vpop.f32.mrf.mxu0 }
 0x19e   :  { %v120_v55 = vpack.c.bf16 %v116_v54, %v116_v54 }
 0x1a0   :  { %124 = vst.msk [vmem:[%s208_s4 + $0x4] sm:$0x1] %vm123_vm10, %v120_v55 }

// kernel: hf_adapter_forward.52
= control target key start
LH: loop header
LB: loop body
LE: loop exit
PB: predicated region body
PF: predicated region fallthrough
CT: control target
= control target key end

     0   :  { %vm48_vm0 = vcmask 261120   ;;  %vm71_vm1 = vcmask 254976   ;;  %v162_v12 = vmov 32.0   ;;  %s227_s1 = inlined_call_operand.vmem [shape: bf16[32,32], index: 1, kind: input, shape index: {}]   ;;  %s228_s0 = inlined_call_operand.vmem [shape: bf16[10,32], index: 0, kind: input, shape index: {}]   ;;  %s229_s2 = inlined_call_operand.vmem [shape: f32[1,32], index: 2, kind: input, shape index: {}]   ;;  %s230_s3 = inlined_call_operand.vmem [shape: f32[1,32], index: 3, kind: input, shape index: {}]   ;;  %s231_s4 = inlined_call_operand.vmem [shape: f32[1,32], index: 4, kind: input, shape index: {}]   ;;  %s232_s5 = inlined_call_operand.vmem [shape: f32[10,32], index: 5, kind: output, shape index: {}]  }
   0x1   :  { %v151_v0 = vld [vmem:[%s227_s1 + $0x8] sm:$0xff]  ;;  %v150_v1 = vld [vmem:[%s227_s1] sm:$0xff]  ;;  %156 = vrcp.f32 %v162_v12 }
   0x2   :  { %58 = vmatpush.bf16.msra.mxu0 %v151_v0  ;;  %v138_v2 = vld [vmem:[%s228_s0] sm:$0xf]  ;;  %v149_v3 = vld [vmem:[%s228_s0] sm:$0x10] }
   0x3   :  { %v139_v4 = vor.u32 %v149_v3, %v138_v2  ;;  %v153_v5 = vld [vmem:[%s229_s2] ss:$0 sm:$0xff] }
   0x4   :  { %v154_v43 = vld [vmem:[%s230_s3] ss:$0 sm:$0xff] }
   0x5   :  { %v155_v46 = vld [vmem:[%s231_s4] ss:$0 sm:$0xff] }
   0x6   :  { %59 = vmatpush.bf16.msra.mxu0 %v150_v1 }
   0x7   :  { %v157_v13 = vpop.eup %156 }
   0x8   :  { %v76_v14 = vmul.f32 32.0, %v157_v13  ;;  %vm80_vm2 = vweird.f32 %v157_v13 }
   0x9   :  { %148 = vmatmul.msk.bf16.vlgmr.msra.gmra.mxu0 %vm48_vm0, %v139_v4 }
   0xa   :  { %v77_v15 = vsub.f32 1.0, %v76_v14 }
   0xc   :  { %v78_v16 = vmul.f32 %v157_v13, %v77_v15 }
   0xe   :  { %v79_v17 = vadd.f32 %v157_v13, %v78_v16 }
  0x10   :  { %v81_v18 = vsel %vm80_vm2, %v157_v13, %v79_v17 }
  0x86   :  { %v61_v6 = vpop.f32.mrf.mxu0 }
  0x87   :  { %v62_v7 = vadd.f32 %v153_v5, %v61_v6 }
  0x89   :  { %v68_v8 = vsel %vm48_vm0, %v62_v7, 0.0 }
  0x8a   :  { %69 = vadd.xlane.f32.xlu0 %v68_v8 }
  0x8e   :  { %v63_v9 = vpop.f32.mrf.mxu0 }
  0x8f   :  { %v64_v10 = vadd.f32 %v153_v5, %v63_v9 }
  0x91   :  { %v72_v11 = vsel %vm71_vm1, %v64_v10, 0.0 }
  0x92   :  { %73 = vadd.xlane.f32.xlu0 %v72_v11 }
  0xfd   :  { %v70_v19 = vpop.xlane.xlu0 %69 }
  0xfe   :  { %v82_v20 = vmul.f32 %v81_v18, %v70_v19 }
 0x100   :  { %v84_v21 = vsub.f32 %v62_v7, %v82_v20 }
 0x102   :  { %v86_v22 = vmul.f32 %v84_v21, %v84_v21 }
 0x104   :  { %v88_v23 = vsel %vm48_vm0, %v86_v22, 0.0 }
 0x105   :  { %89 = vadd.xlane.f32.xlu1 %v88_v23  ;;  %v74_v24 = vpop.xlane.xlu0 %73 }
 0x106   :  { %v83_v25 = vmul.f32 %v81_v18, %v74_v24 }
 0x108   :  { %v85_v26 = vsub.f32 %v64_v10, %v83_v25 }
 0x10a   :  { %v87_v27 = vmul.f32 %v85_v26, %v85_v26 }
 0x10c   :  { %v91_v28 = vsel %vm71_vm1, %v87_v27, 0.0 }
 0x10d   :  { %92 = vadd.xlane.f32.xlu1 %v91_v28 }
 0x178   :  { %v90_v29 = vpop.xlane.xlu1 %89 }
 0x179   :  { %v94_v30 = vmul.f32 %v90_v29, %v81_v18 }
 0x17b   :  { %v96_v31 = vadd.f32 1e-05, %v94_v30 }
 0x17d   :  { %158 = vrsqrt.f32 %v96_v31  ;;  %vm104_vm4 = vweird.f32 %v96_v31 }
 0x180   :  { %v93_v32 = vpop.xlane.xlu1 %92 }
 0x181   :  { %v95_v33 = vmul.f32 %v93_v32, %v81_v18 }
 0x183   :  { %v159_v34 = vpop.eup %158  ;;  %v97_v35 = vadd.f32 1e-05, %v95_v33 }
 0x184   :  { %v99_v36 = vmul.f32 %v159_v34, %v96_v31  ;;  %vm105_vm3 = vweird.f32 %v159_v34 }
 0x185   :  { %160 = vrsqrt.f32 %v97_v35  ;;  %vm106_vm5 = vmor %vm104_vm4, %vm105_vm3  ;;  %vm114_vm7 = vweird.f32 %v97_v35 }
 0x186   :  { %v100_v37 = vmul.f32 %v159_v34, %v99_v36 }
 0x188   :  { %v101_v38 = vmul.f32 0.5, %v100_v37 }
 0x18a   :  { %v102_v39 = vsub.f32 1.5, %v101_v38 }
 0x18b   :  { %v161_v40 = vpop.eup %160 }
 0x18c   :  { %v103_v41 = vmul.f32 %v159_v34, %v102_v39  ;;  %v109_v42 = vmul.f32 %v161_v40, %v97_v35  ;;  %vm115_vm6 = vweird.f32 %v161_v40 }
 0x18d   :  { %vm116_vm8 = vmor %vm114_vm7, %vm115_vm6 }
 0x18e   :  { %v107_v44 = vsel %vm106_vm5, %v159_v34, %v103_v41  ;;  %v110_v45 = vmul.f32 %v161_v40, %v109_v42 }
 0x18f   :  { %v118_v47 = vmul.f32 %v107_v44, %v84_v21 }
 0x190   :  { %v111_v48 = vmul.f32 0.5, %v110_v45 }
 0x191   :  { %v123_v49 = vmul.f32 %v154_v43, %v118_v47 }
 0x192   :  { %v112_v50 = vsub.f32 1.5, %v111_v48 }
 0x193   :  { %v128_v51 = vadd.f32 %v155_v46, %v123_v49 }
 0x194   :  { %v113_v52 = vmul.f32 %v161_v40, %v112_v50 }
 0x195   :  { %130 = vst.msk [vmem:[%s232_s5] sm:$0xff] %vm48_vm0, %v128_v51 }
 0x196   :  { %v117_v53 = vsel %vm116_vm8, %v161_v40, %v113_v52 }
 0x197   :  { %v119_v54 = vmul.f32 %v117_v53, %v85_v26 }
 0x199   :  { %v124_v55 = vmul.f32 %v154_v43, %v119_v54 }
 0x19b   :  { %v129_v56 = vadd.f32 %v155_v46, %v124_v55 }
 0x19d   :  { %131 = vst.msk [vmem:[%s232_s5 + $0x8] sm:$0x3] %vm71_vm1, %v129_v56 }

// kernel: hf_adapter_forward.53
= control target key start
LH: loop header
LB: loop body
LE: loop exit
PB: predicated region body
PF: predicated region fallthrough
CT: control target
= control target key end

     0   :  { %vm26_vm0 = vcmask 261120   ;;  %vm33_vm1 = vcmask 254976   ;;  %v197_v6 = vmov 32.0   ;;  %vm162_vm12 = vcmask 781312   ;;  %s274_s0 = inlined_call_operand.vmem [shape: f32[18,32], index: 0, kind: input, shape index: {}]   ;;  %s275_s1 = inlined_call_operand.vmem [shape: f32[1,32], index: 1, kind: input, shape index: {}]   ;;  %s276_s2 = inlined_call_operand.vmem [shape: f32[1,32], index: 2, kind: input, shape index: {}]   ;;  %s277_s4 = inlined_call_operand.vmem [shape: f32[1,96], index: 4, kind: input, shape index: {}]   ;;  %s278_s3 = inlined_call_operand.vmem [shape: bf16[32,96], index: 3, kind: input, shape index: {}]   ;;  %s279_s5 = inlined_call_operand.vmem [shape: bf16[18,96], index: 5, kind: output, shape index: {}]  }
   0x1   :  { %v21_v0 = vld [vmem:[%s274_s0] sm:$0xff]  ;;  %v23_v1 = vld [vmem:[%s274_s0 + $0x10] sm:$0x3]  ;;  %v22_v4 = vld [vmem:[%s274_s0 + $0x8] sm:$0xff]  ;;  %189 = vrcp.f32 %v197_v6  ;;  %vm165_vm13 = vcmask 778240  }
   0x2   :  { %v27_v2 = vsel %vm26_vm0, %v21_v0, 0.0  ;;  %v34_v3 = vsel %vm33_vm1, %v23_v1, 0.0  ;;  %v30_v5 = vsel %vm26_vm0, %v22_v4, 0.0  ;;  %v182_v28 = vld [vmem:[%s278_s3 + $0x8] sm:$0xff]  ;;  %v181_v31 = vld [vmem:[%s278_s3] sm:$0xff] }
   0x3   :  { %28 = vadd.xlane.f32.xlu0 %v27_v2  ;;  %35 = vadd.xlane.f32.xlu1 %v34_v3  ;;  %v186_v53 = vld [vmem:[%s275_s1] ss:$0 sm:$0xff] }
   0x4   :  { %147 = vmatpush.bf16.msra.mxu0 %v182_v28  ;;  %183 = vmatpush.bf16.msra.mxu1 %v182_v28  ;;  %v187_v60 = vld [vmem:[%s276_s2] ss:$0 sm:$0xff] }
   0x7   :  { %v190_v7 = vpop.eup %189 }
   0x8   :  { %v38_v8 = vmul.f32 32.0, %v190_v7  ;;  %vm42_vm2 = vweird.f32 %v190_v7  ;;  %148 = vmatpush.bf16.msra.mxu0 %v181_v31  ;;  %184 = vmatpush.bf16.msra.mxu1 %v181_v31 }
   0xa   :  { %v39_v9 = vsub.f32 1.0, %v38_v8 }
   0xb   :  { %31 = vadd.xlane.f32.xlu0 %v30_v5 }
   0xc   :  { %v40_v10 = vmul.f32 %v190_v7, %v39_v9  ;;  %v188_v9 = vld [vmem:[%s277_s4] ss:$0 sm:$0xff] }
   0xe   :  { %v41_v11 = vadd.f32 %v190_v7, %v40_v10 }
  0x10   :  { %v43_v12 = vsel %vm42_vm2, %v190_v7, %v41_v11 }
  0x76   :  { %v29_v13 = vpop.xlane.xlu0 %28  ;;  %v36_v17 = vpop.xlane.xlu1 %35 }
  0x77   :  { %v44_v14 = vmul.f32 %v43_v12, %v29_v13  ;;  %v46_v21 = vmul.f32 %v43_v12, %v36_v17 }
  0x79   :  { %v47_v15 = vsub.f32 %v21_v0, %v44_v14  ;;  %v241_v23 = vsub.f32 %v23_v1, %v46_v21 }
  0x7b   :  { %v50_v16 = vmul.f32 %v47_v15, %v47_v15  ;;  %v52_v26 = vmul.f32 %v241_v23, %v241_v23 }
  0x7d   :  { %v53_v18 = vsel %vm26_vm0, %v50_v16, 0.0  ;;  %v59_v27 = vsel %vm33_vm1, %v52_v26, 0.0 }
  0x7e   :  { %54 = vadd.xlane.f32.xlu1 %v53_v18  ;;  %v32_v19 = vpop.xlane.xlu0 %31 }
  0x7f   :  { %v45_v20 = vmul.f32 %v43_v12, %v32_v19 }
  0x81   :  { %v48_v22 = vsub.f32 %v22_v4, %v45_v20 }
  0x83   :  { %v51_v24 = vmul.f32 %v48_v22, %v48_v22 }
  0x85   :  { %v56_v25 = vsel %vm26_vm0, %v51_v24, 0.0 }
  0x86   :  { %57 = vadd.xlane.f32.xlu2 %v56_v25 }
  0x8e   :  { %60 = vadd.xlane.f32.xlu2 %v59_v27 }
  0xf1   :  { %v55_v29 = vpop.xlane.xlu1 %54 }
  0xf2   :  { %v62_v30 = vmul.f32 %v55_v29, %v43_v12 }
  0xf4   :  { %v65_v32 = vadd.f32 1e-05, %v62_v30 }
  0xf6   :  { %191 = vrsqrt.f32 %v65_v32  ;;  %vm74_vm4 = vweird.f32 %v65_v32 }
  0xf9   :  { %v58_v33 = vpop.xlane.xlu2 %57 }
  0xfa   :  { %v63_v34 = vmul.f32 %v58_v33, %v43_v12 }
  0xfc   :  { %v192_v35 = vpop.eup %191  ;;  %v66_v36 = vadd.f32 1e-05, %v63_v34 }
  0xfd   :  { %v69_v37 = vmul.f32 %v192_v35, %v65_v32  ;;  %vm75_vm3 = vweird.f32 %v192_v35 }
  0xfe   :  { %193 = vrsqrt.f32 %v66_v36  ;;  %vm76_vm5 = vmor %vm74_vm4, %vm75_vm3  ;;  %vm84_vm7 = vweird.f32 %v66_v36 }
  0xff   :  { %v70_v38 = vmul.f32 %v192_v35, %v69_v37 }
 0x101   :  { %v71_v39 = vmul.f32 0.5, %v70_v38  ;;  %v61_v40 = vpop.xlane.xlu2 %60 }
 0x102   :  { %v64_v41 = vmul.f32 %v61_v40, %v43_v12 }
 0x103   :  { %v72_v42 = vsub.f32 1.5, %v71_v39 }
 0x104   :  { %v194_v43 = vpop.eup %193  ;;  %v67_v44 = vadd.f32 1e-05, %v64_v41 }
 0x105   :  { %v73_v45 = vmul.f32 %v192_v35, %v72_v42  ;;  %v79_v46 = vmul.f32 %v194_v43, %v66_v36  ;;  %vm85_vm6 = vweird.f32 %v194_v43 }
 0x106   :  { %195 = vrsqrt.f32 %v67_v44  ;;  %vm86_vm8 = vmor %vm84_vm7, %vm85_vm6  ;;  %vm94_vm10 = vweird.f32 %v67_v44 }
 0x107   :  { %v80_v47 = vmul.f32 %v194_v43, %v79_v46  ;;  %v77_v48 = vsel %vm76_vm5, %v192_v35, %v73_v45 }
 0x108   :  { %v98_v52 = vmul.f32 %v77_v48, %v47_v15 }
 0x109   :  { %v81_v49 = vmul.f32 0.5, %v80_v47 }
 0x10a   :  { %v104_v59 = vmul.f32 %v186_v53, %v98_v52 }
 0x10b   :  { %v82_v50 = vsub.f32 1.5, %v81_v49 }
 0x10c   :  { %v196_v51 = vpop.eup %195  ;;  %v110_v0 = vadd.f32 %v187_v60, %v104_v59 }
 0x10d   :  { %v83_v54 = vmul.f32 %v194_v43, %v82_v50  ;;  %v89_v55 = vmul.f32 %v196_v51, %v67_v44  ;;  %vm95_vm9 = vweird.f32 %v196_v51 }
 0x10e   :  { %vm96_vm11 = vmor %vm94_vm10, %vm95_vm9 }
 0x10f   :  { %v87_v56 = vsel %vm86_vm8, %v194_v43, %v83_v54  ;;  %v90_v57 = vmul.f32 %v196_v51, %v89_v55 }
 0x110   :  { %v99_v58 = vmul.f32 %v87_v56, %v48_v22 }
 0x111   :  { %v91_v61 = vmul.f32 0.5, %v90_v57 }
 0x112   :  { %v105_v62 = vmul.f32 %v186_v53, %v99_v58 }
 0x113   :  { %v92_v63 = vsub.f32 1.5, %v91_v61 }
 0x114   :  { %v111_v1 = vadd.f32 %v187_v60, %v105_v62 }
 0x115   :  { %v93_v2 = vmul.f32 %v196_v51, %v92_v63 }
 0x116   :  { %v117_v3 = vpack.c.bf16 %v111_v1, %v110_v0 }
 0x117   :  { %v97_v4 = vsel %vm96_vm11, %v196_v51, %v93_v2 }
 0x118   :  { %179 = vmatmul.msk.bf16.vlgmr.msra.gmra.mxu0 %vm26_vm0, %v117_v3  ;;  %v100_v5 = vmul.f32 %v97_v4, %v241_v23 }
 0x11a   :  { %v106_v6 = vmul.f32 %v186_v53, %v100_v5 }
 0x11c   :  { %v112_v7 = vadd.f32 %v187_v60, %v106_v6 }
 0x11e   :  { %v118_v8 = vpack.c.bf16 %v112_v7, %v112_v7 }
 0x120   :  { %180 = vmatmul.msk.bf16.vlgmr.msra.gmra.mxu1 %vm26_vm0, %v118_v8 }
 0x195   :  { %v150_v10 = vpop.f32.mrf.mxu0 }
 0x196   :  { %v151_v11 = vadd.f32 %v188_v9, %v150_v10 }
 0x198   :  { %v159_v12 = vpack.c.bf16 %v151_v11, %v151_v11 }
 0x19a   :  { %163 = vst.msk [vmem:[%s279_s5] sm:$0xf] %vm162_vm12, %v159_v12 }
 0x19d   :  { %v152_v13 = vpop.f32.mrf.mxu0  ;;  %v155_v14 = vpop.f32.mrf.mxu1 }
 0x19e   :  { %v153_v15 = vadd.f32 %v188_v9, %v152_v13  ;;  %v156_v16 = vadd.f32 %v188_v9, %v155_v14 }
 0x1a0   :  { %v160_v17 = vpack.c.bf16 %v153_v15, %v153_v15  ;;  %v161_v18 = vpack.c.bf16 %v156_v16, %v156_v16 }
 0x1a2   :  { %164 = vst.msk [vmem:[%s279_s5 + $0x4] sm:$0xf] %vm162_vm12, %v160_v17 }
 0x1a3   :  { %166 = vst.msk [vmem:[%s279_s5 + $0x8] sm:$0x1] %vm165_vm13, %v161_v18 }
 0x1a5   :  { %v157_v19 = vpop.f32.mrf.mxu1 }

// kernel: hf_adapter_forward.54
= control target key start
LH: loop header
LB: loop body
LE: loop exit
PB: predicated region body
PF: predicated region fallthrough
CT: control target
= control target key end

     0   :  { %s508_s12 = smov 0   ;;  %s542_s0 = inlined_call_operand.vmem [shape: bf16[8,9,8], index: 0, kind: input, shape index: {}]   ;;  %s543_s1 = inlined_call_operand.vmem [shape: bf16[8,9,8], index: 1, kind: input, shape index: {}]   ;;  %s544_s2 = inlined_call_operand.vmem [shape: bf16[8,9,8], index: 2, kind: input, shape index: {}]   ;;  %s545_s3 = inlined_call_operand.vmem [shape: bf16[8,9,8], index: 3, kind: output, shape index: {}]  }
   0x1 LB: > { %s426_s13 = sadd.s32 4294967295, %s485_s12   ;;  %p430_p0 = scmp.ge.s32.totalorder %s485_s12, 1  ;;  %s485_s12 = sphi %s508_s12, %s13_s12  }
   0x2   : > { %p157_p1 = scmp.lt.s32.totalorder %s485_s12, 9 }
   0x4   : > { %p158_p2 = pnand %p430_p0, %p157_p1 }
   0x5   : > { %p191_p3 = scmp.lt.s32.totalorder (!%p158_p2), %s426_s13, 7 }
   0x6   : > { %161 = sbr.rel (%p158_p2) target bundleno = 569 (0x239), region = 32 }
   0xb   : > { %s547_s13 = smov (!%p191_p3, %s426_s13), 7  ;;  %vm228_vm0 = vcmask 64512   ;;  %vm251_vm1 = vcmask 72704   ;;  %vm255_vm2 = vcmask 65536   ;;  %vm316_vm3 = vcmask 1043456  }
   0xc   : > { %s516_s14 = sshll.u32 %s547_s13, 3  ;;  %vm317_vm4 = vcmask 1044480   ;;  %v487_v26 = vmov 65535   ;;  %vm339_vm13 = vcmask 60416   ;;  %vm341_vm14 = vcmask 57344  }
   0xd   : > { %s200_s17 = scalar_lea.vmem %s543_s1, %s516_s14  ;;  %s195_s20 = scalar_lea.vmem %s542_s0, %s516_s14  ;;  %v318_v27 = vsel %vm316_vm3, 4294967295, %v487_v26  ;;  %vm342_vm15 = vsmask.f32 256 }
   0xe   : > { %v445_v0 = vld [vmem:[%s200_s17] sm:$0xf]  ;;  %v460_v1 = vld [vmem:[%s200_s17] sm:$0x10]  ;;  %s205_s23 = scalar_lea.vmem %s544_s2, %s516_s14  ;;  %v319_v28 = vsel %vm317_vm4, %v318_v27, 0  ;;  %s210_s26 = scalar_lea.vmem %s545_s3, %s516_s14 }
   0xf   : > { %v446_v2 = vor.u32 %v460_v1, %v445_v0  ;;  %v441_v4 = vld [vmem:[%s195_s20] sm:$0xf]  ;;  %v459_v5 = vld [vmem:[%s195_s20] sm:$0x10] }
  0x10   : > { %v442_v6 = vor.u32 %v459_v5, %v441_v4  ;;  %v450_v23 = vld [vmem:[%s205_s23] sm:$0xf]  ;;  %v461_v24 = vld [vmem:[%s205_s23] sm:$0x10] }
  0x11   : > { %v233_v3 = vsel %vm228_vm0, %v446_v2, 0  ;;  %v451_v25 = vor.u32 %v461_v24, %v450_v23  ;;  %v344_v62 = vld [vmem:[%s210_s26 + $0x4] sm:$0x1] }
  0x12   : > { %242 = vmatpush.bf16.xpose.msra.mxu0 %v233_v3 }
  0x13   : > { %v321_v29 = vand.u32 %v451_v25, %v319_v28 }
  0x15   : > { %330 = vmatpush.bf16.msra.mxu1 %v321_v29 }
  0x19   : > { %447 = vmatmul.msk.bf16.vlgmr.msra.gmra.mxu0 %vm228_vm0, %v442_v6  ;;  %vm343_vm0 = vmand %vm341_vm14, %vm342_vm15 }
  0x96   : > { %v244_v7 = vpop.f32.mrf.mxu0 }
  0x97   : > { %v249_v8 = vmul.f32 0.35355338, %v244_v7 }
  0x99   : > { %v252_v9 = vsel %vm251_vm1, %v249_v8, -inf }
  0x9a   : > { %253 = vmax.xlane.f32.xlu0 %v252_v9 }
  0x9e   : > { %v246_v10 = vpop.f32.mrf.mxu0 }
  0x9f   : > { %v250_v11 = vmul.f32 0.35355338, %v246_v10 }
  0xa1   : > { %v256_v12 = vsel %vm255_vm2, %v250_v11, -inf }
  0xa2   : > { %257 = vmax.xlane.f32.xlu0 %v256_v12 }
 0x10d   : > { %v254_v13 = vpop.xlane.xlu0 %253 }
 0x10e   : > { %v259_v14 = vsub.f32 %v249_v8, %v254_v13 }
 0x110   : > { %v261_v15 = vmul.f32 1.442695, %v259_v14 }
 0x112   : > { %471 = vpow2.f32 %v261_v15 }
 0x115   : > { %v258_v16 = vpop.xlane.xlu0 %257 }
 0x116   : > { %v260_v17 = vsub.f32 %v250_v11, %v258_v16 }
 0x118   : > { %v472_v18 = vpop.eup %471  ;;  %v263_v19 = vmul.f32 1.442695, %v260_v17 }
 0x119   : > { %v265_v20 = vsel %vm251_vm1, %v472_v18, 0.0 }
 0x11a   : > { %473 = vpow2.f32 %v263_v19  ;;  %266 = vadd.xlane.f32.xlu1 %v265_v20 }
 0x120   : > { %v474_v21 = vpop.eup %473 }
 0x121   : > { %v268_v22 = vsel %vm255_vm2, %v474_v21, 0.0 }
 0x122   : > { %269 = vadd.xlane.f32.xlu1 %v268_v22 }
 0x18d   : > { %v267_v30 = vpop.xlane.xlu1 %266 }
 0x18e   : > { %475 = vrcp.f32 %v267_v30  ;;  %v282_v36 = vand.u32 2147483648, %v267_v30  ;;  %vm276_vm6 = vweird.f32 %v267_v30  ;;  %v280_v38 = vand.u32 2147483647, %v267_v30 }
 0x190   : > { %v283_v42 = vor.u32 1.1754944e-38, %v282_v36  ;;  %vm281_vm8 = vcmp.eq.f32.partialorder %v280_v38, 8.507059e+37 }
 0x194   : > { %v476_v31 = vpop.eup %475 }
 0x195   : > { %v272_v32 = vmul.f32 %v476_v31, %v267_v30  ;;  %v270_v33 = vpop.xlane.xlu1 %269  ;;  %vm277_vm5 = vweird.f32 %v476_v31 }
 0x196   : > { %477 = vrcp.f32 %v270_v33  ;;  %vm278_vm7 = vmor %vm276_vm6, %vm277_vm5  ;;  %v297_v44 = vand.u32 2147483648, %v270_v33  ;;  %v295_v47 = vand.u32 2147483647, %v270_v33  ;;  %vm291_vm10 = vweird.f32 %v270_v33 }
 0x197   : > { %v273_v34 = vsub.f32 1.0, %v272_v32 }
 0x198   : > { %v298_v50 = vor.u32 1.1754944e-38, %v297_v44  ;;  %vm296_vm12 = vcmp.eq.f32.partialorder %v295_v47, 8.507059e+37 }
 0x199   : > { %v274_v35 = vmul.f32 %v476_v31, %v273_v34 }
 0x19b   : > { %v275_v37 = vadd.f32 %v476_v31, %v274_v35 }
 0x19c   : > { %v478_v39 = vpop.eup %477 }
 0x19d   : > { %v287_v40 = vmul.f32 %v478_v39, %v270_v33  ;;  %v279_v41 = vsel %vm278_vm7, %v476_v31, %v275_v37  ;;  %vm292_vm9 = vweird.f32 %v478_v39 }
 0x19e   : > { %v284_v45 = vsel %vm281_vm8, %v283_v42, %v279_v41  ;;  %vm293_vm11 = vmor %vm291_vm10, %vm292_vm9 }
 0x19f   : > { %v288_v43 = vsub.f32 1.0, %v287_v40  ;;  %v285_v49 = vmul.f32 %v472_v18, %v284_v45 }
 0x1a1   : > { %v289_v46 = vmul.f32 %v478_v39, %v288_v43  ;;  %v301_v54 = vpack.c.bf16 %v285_v49, %v285_v49 }
 0x1a3   : > { %v290_v48 = vadd.f32 %v478_v39, %v289_v46  ;;  %v305_v56 = vunpack.c.l.b16 %v301_v54 }
 0x1a5   : > { %v294_v51 = vsel %vm293_vm11, %v478_v39, %v290_v48 }
 0x1a6   : > { %v299_v52 = vsel %vm296_vm12, %v298_v50, %v294_v51 }
 0x1a7   : > { %v300_v53 = vmul.f32 %v474_v21, %v299_v52 }
 0x1a9   : > { %v302_v55 = vpack.c.bf16 %v300_v53, %v300_v53 }
 0x1ab   : > { %v306_v57 = vunpack.c.l.b16 %v302_v55 }
 0x1ad   : > { %v307_v58 = vpack.c.b16 %v306_v57, %v305_v56 }
 0x1af   : > { %452 = vmatmul.msk.bf16.vlgmr.msra.gmra.mxu1 %vm251_vm1, %v307_v58 }
 0x22c   : > { %v332_v59 = vpop.f32.mrf.mxu1 }
 0x22d   : > { %v337_v60 = vpack.c.bf16 %v332_v59, %v332_v59 }
 0x22f   : > { %340 = vst.msk [vmem:[%s210_s26] sm:$0xf] %vm339_vm13, %v337_v60 }
 0x234   : > { %v334_v61 = vpop.f32.mrf.mxu1 }
 0x235   : > { %v338_v63 = vpack.c.bf16 %v334_v61, %v334_v61 }
 0x237   : > { %v345_v0 = vsel %vm343_vm0, %v338_v63, %v344_v62 }
 0x238   : > { %346 = vst [vmem:[%s210_s26 + $0x4] sm:$0x1] %v345_v0 }
 0x239 PF: > { %s13_s12 = sadd.s32 1, %s485_s12  }
 0x23a   : > { %p10_p4 = scmp.ge.s32.totalorder %s13_s12, 10  }
 0x23c   :  { %12 = sbr.rel (!%p10_p4) target bundleno = 1 (0x1), region = 68 }

// kernel: hf_adapter_forward.55
= control target key start
LH: loop header
LB: loop body
LE: loop exit
PB: predicated region body
PF: predicated region fallthrough
CT: control target
= control target key end

     0   :  { %vm49_vm0 = vcmask 261120   ;;  %vm82_vm1 = vcmask 254976   ;;  %s170_s1 = inlined_call_operand.vmem [shape: bf16[32,32], index: 1, kind: input, shape index: {}]   ;;  %s171_s0 = inlined_call_operand.vmem [shape: bf16[18,32], index: 0, kind: input, shape index: {}]   ;;  %s172_s2 = inlined_call_operand.vmem [shape: f32[1,32], index: 2, kind: input, shape index: {}]   ;;  %s173_s3 = inlined_call_operand.vmem [shape: f32[18,32], index: 3, kind: input, shape index: {}]   ;;  %s174_s4 = inlined_call_operand.vmem [shape: f32[18,32], index: 4, kind: output, shape index: {}]  }
   0x1   :  { %v104_v0 = vld [vmem:[%s170_s1 + $0x8] sm:$0xff]  ;;  %v103_v2 = vld [vmem:[%s170_s1] sm:$0xff]  ;;  %v76_v10 = vld [vmem:[%s173_s3 + $0x10] sm:$0x3] }
   0x2   :  { %v20_v1 = vld [vmem:[%s171_s0 + $0x8] sm:$0x1]  ;;  %62 = vmatpush.bf16.msra.mxu0 %v104_v0  ;;  %105 = vmatpush.bf16.msra.mxu1 %v104_v0  ;;  %v102_v4 = vld [vmem:[%s171_s0] sm:$0xff] }
   0x3   :  { %v34_v3 = vunpack.c.l.b16 %v20_v1  ;;  %v107_v6 = vld [vmem:[%s172_s2] ss:$0 sm:$0xff]  ;;  %v75_v16 = vld [vmem:[%s173_s3 + $0x8] sm:$0xff] }
   0x4   :  { %v74_v8 = vld [vmem:[%s173_s3] sm:$0xff] }
   0x5   :  { %v36_v5 = vpack.c.b16 %v34_v3, %v34_v3 }
   0x6   :  { %63 = vmatpush.bf16.msra.mxu0 %v103_v2  ;;  %106 = vmatpush.bf16.msra.mxu1 %v103_v2 }
   0x9   :  { %100 = vmatmul.msk.bf16.vlgmr.msra.gmra.mxu0 %vm49_vm0, %v102_v4  ;;  %101 = vmatmul.msk.bf16.vlgmr.msra.gmra.mxu1 %vm49_vm0, %v36_v5 }
  0x86   :  { %v65_v7 = vpop.f32.mrf.mxu0  ;;  %v70_v9 = vpop.f32.mrf.mxu1 }
  0x87   :  { %v66_v11 = vadd.f32 %v107_v6, %v65_v7  ;;  %v71_v12 = vadd.f32 %v107_v6, %v70_v9 }
  0x89   :  { %v77_v13 = vadd.f32 %v74_v8, %v66_v11  ;;  %v79_v14 = vadd.f32 %v76_v10, %v71_v12 }
  0x8b   :  { %80 = vst.msk [vmem:[%s174_s4] sm:$0xff] %vm49_vm0, %v77_v13 }
  0x8c   :  { %83 = vst.msk [vmem:[%s174_s4 + $0x10] sm:$0x3] %vm82_vm1, %v79_v14 }
  0x8e   :  { %v67_v15 = vpop.f32.mrf.mxu0  ;;  %v72_v17 = vpop.f32.mrf.mxu1 }
  0x8f   :  { %v68_v18 = vadd.f32 %v107_v6, %v67_v15 }
  0x91   :  { %v78_v19 = vadd.f32 %v75_v16, %v68_v18 }
  0x93   :  { %81 = vst.msk [vmem:[%s174_s4 + $0x8] sm:$0xff] %vm49_vm0, %v78_v19 }

// kernel: hf_adapter_forward.61
= control target key start
LH: loop header
LB: loop body
LE: loop exit
PB: predicated region body
PF: predicated region fallthrough
CT: control target
= control target key end

     0   :  { %vm43_vm0 = vcmask 261120   ;;  %v123_v9 = vmov 32.0   ;;  %s179_s1 = inlined_call_operand.vmem [shape: bf16[32,32], index: 1, kind: input, shape index: {}]   ;;  %s180_s0 = inlined_call_operand.vmem [shape: f32[8,32], index: 0, kind: input, shape index: {}]   ;;  %s181_s2 = inlined_call_operand.vmem [shape: f32[1,32], index: 2, kind: input, shape index: {}]   ;;  %s182_s3 = inlined_call_operand.vmem [shape: f32[1,32], index: 3, kind: input, shape index: {}]   ;;  %s183_s4 = inlined_call_operand.vmem [shape: f32[1,32], index: 4, kind: input, shape index: {}]   ;;  %s184_s5 = inlined_call_operand.vmem [shape: f32[8,32], index: 5, kind: output, shape index: {}]  }
   0x1   :  { %v114_v0 = vld [vmem:[%s179_s1 + $0x8] sm:$0xff]  ;;  %v113_v1 = vld [vmem:[%s179_s1] sm:$0xff]  ;;  %119 = vrcp.f32 %v123_v9 }
   0x2   :  { %53 = vmatpush.bf16.msra.mxu0 %v114_v0  ;;  %v21_v2 = vld [vmem:[%s180_s0] sm:$0xff] }
   0x3   :  { %v26_v3 = vpack.c.bf16 %v21_v2, %v21_v2  ;;  %v116_v4 = vld [vmem:[%s181_s2] ss:$0 sm:$0xff] }
   0x4   :  { %v117_v30 = vld [vmem:[%s182_s3] ss:$0 sm:$0xff] }
   0x5   :  { %v118_v32 = vld [vmem:[%s183_s4] ss:$0 sm:$0xff] }
   0x6   :  { %54 = vmatpush.bf16.msra.mxu0 %v113_v1 }
   0x7   :  { %v120_v10 = vpop.eup %119 }
   0x8   :  { %v66_v11 = vmul.f32 32.0, %v120_v10  ;;  %vm70_vm1 = vweird.f32 %v120_v10 }
   0x9   :  { %112 = vmatmul.msk.bf16.vlgmr.msra.gmra.mxu0 %vm43_vm0, %v26_v3 }
   0xa   :  { %v67_v12 = vsub.f32 1.0, %v66_v11 }
   0xc   :  { %v68_v13 = vmul.f32 %v120_v10, %v67_v12 }
   0xe   :  { %v69_v14 = vadd.f32 %v120_v10, %v68_v13 }
  0x10   :  { %v71_v15 = vsel %vm70_vm1, %v120_v10, %v69_v14 }
  0x86   :  { %v56_v5 = vpop.f32.mrf.mxu0 }
  0x87   :  { %v57_v6 = vadd.f32 %v116_v4, %v56_v5 }
  0x89   :  { %v62_v7 = vsel %vm43_vm0, %v57_v6, 0.0 }
  0x8a   :  { %63 = vadd.xlane.f32.xlu0 %v62_v7 }
  0x8e   :  { %v58_v8 = vpop.f32.mrf.mxu0 }
  0xfd   :  { %v64_v16 = vpop.xlane.xlu0 %63 }
  0xfe   :  { %v72_v17 = vmul.f32 %v71_v15, %v64_v16 }
 0x100   :  { %v73_v18 = vsub.f32 %v57_v6, %v72_v17 }
 0x102   :  { %v74_v19 = vmul.f32 %v73_v18, %v73_v18 }
 0x104   :  { %v75_v20 = vsel %vm43_vm0, %v74_v19, 0.0 }
 0x105   :  { %76 = vadd.xlane.f32.xlu0 %v75_v20 }
 0x178   :  { %v77_v21 = vpop.xlane.xlu0 %76 }
 0x179   :  { %v78_v22 = vmul.f32 %v77_v21, %v71_v15 }
 0x17b   :  { %v79_v23 = vadd.f32 1e-05, %v78_v22 }
 0x17d   :  { %121 = vrsqrt.f32 %v79_v23  ;;  %vm86_vm3 = vweird.f32 %v79_v23 }
 0x183   :  { %v122_v24 = vpop.eup %121 }
 0x184   :  { %v81_v25 = vmul.f32 %v122_v24, %v79_v23  ;;  %vm87_vm2 = vweird.f32 %v122_v24 }
 0x185   :  { %vm88_vm4 = vmor %vm86_vm3, %vm87_vm2 }
 0x186   :  { %v82_v26 = vmul.f32 %v122_v24, %v81_v25 }
 0x188   :  { %v83_v27 = vmul.f32 0.5, %v82_v26 }
 0x18a   :  { %v84_v28 = vsub.f32 1.5, %v83_v27 }
 0x18c   :  { %v85_v29 = vmul.f32 %v122_v24, %v84_v28 }
 0x18e   :  { %v89_v31 = vsel %vm88_vm4, %v122_v24, %v85_v29 }
 0x18f   :  { %v90_v33 = vmul.f32 %v89_v31, %v73_v18 }
 0x191   :  { %v94_v34 = vmul.f32 %v117_v30, %v90_v33 }
 0x193   :  { %v98_v35 = vadd.f32 %v118_v32, %v94_v34 }
 0x195   :  { %99 = vst.msk [vmem:[%s184_s5] sm:$0xff] %vm43_vm0, %v98_v35 }

// kernel: tile.13
= control target key start
LH: loop header
LB: loop body
LE: loop exit
PB: predicated region body
PF: predicated region fallthrough
CT: control target
= control target key end

     0   :  { %s22_s0 = inlined_call_operand.vmem [shape: f32[4], index: 0, kind: input, shape index: {}]   ;;  %s23_s1 = inlined_call_operand.vmem [shape: f32[2,4], index: 1, kind: output, shape index: {}]  }
   0x1   :  { %v4_v0 = vld [vmem:[%s22_s0] ss:$0 sm:$0xff] }
   0x2   :  { %5 = vst [vmem:[%s23_s1] sm:$0x3] %v4_v0 }

// kernel: hf_adapter_forward.56
= control target key start
LH: loop header
LB: loop body
LE: loop exit
PB: predicated region body
PF: predicated region fallthrough
CT: control target
= control target key end

     0   :  { %vm32_vm0 = vcmask 261120   ;;  %vm39_vm1 = vcmask 254976   ;;  %v477_v6 = vmov 32.0   ;;  %s672_s0 = inlined_call_operand.vmem [shape: f32[18,32], index: 0, kind: input, shape index: {}]   ;;  %s673_s1 = inlined_call_operand.vmem [shape: f32[1,32], index: 1, kind: input, shape index: {}]   ;;  %s674_s2 = inlined_call_operand.vmem [shape: f32[1,32], index: 2, kind: input, shape index: {}]   ;;  %s675_s4 = inlined_call_operand.vmem [shape: f32[1,128], index: 4, kind: input, shape index: {}]   ;;  %s676_s3 = inlined_call_operand.vmem [shape: bf16[32,128], index: 3, kind: input, shape index: {}]   ;;  %s677_s6 = inlined_call_operand.vmem [shape: f32[1,32], index: 6, kind: input, shape index: {}]   ;;  %s678_s5 = inlined_call_operand.vmem [shape: bf16[128,32], index: 5, kind: input, shape index: {}]   ;;  %s679_s7 = inlined_call_operand.vmem [shape: f32[18,32], index: 7, kind: output, shape index: {}]  }
   0x1   :  { %v521_v0 = vld [vmem:[%s672_s0] sm:$0xff]  ;;  %v526_v1 = vld [vmem:[%s672_s0 + $0x10] sm:$0x3]  ;;  %v535_v4 = vld [vmem:[%s672_s0 + $0x8] sm:$0xff]  ;;  %463 = vrcp.f32 %v477_v6 }
   0x2   :  { %v33_v2 = vsel %vm32_vm0, %v521_v0, 0.0  ;;  %v40_v3 = vsel %vm39_vm1, %v526_v1, 0.0  ;;  %v36_v5 = vsel %vm32_vm0, %v535_v4, 0.0  ;;  %v441_v28 = vld [vmem:[%s676_s3 + $0x8] sm:$0xff]  ;;  %v440_v31 = vld [vmem:[%s676_s3] sm:$0xff] }
   0x3   :  { %34 = vadd.xlane.f32.xlu0 %v33_v2  ;;  %41 = vadd.xlane.f32.xlu1 %v40_v3  ;;  %v459_v53 = vld [vmem:[%s673_s1] ss:$0 sm:$0xff] }
   0x4   :  { %153 = vmatpush.bf16.msra.mxu0 %v441_v28  ;;  %v460_v60 = vld [vmem:[%s674_s2] ss:$0 sm:$0xff] }
   0x7   :  { %v464_v7 = vpop.eup %463 }
   0x8   :  { %v44_v8 = vmul.f32 32.0, %v464_v7  ;;  %vm48_vm2 = vweird.f32 %v464_v7  ;;  %154 = vmatpush.bf16.msra.mxu0 %v440_v31 }
   0xa   :  { %v45_v9 = vsub.f32 1.0, %v44_v8 }
   0xb   :  { %37 = vadd.xlane.f32.xlu0 %v36_v5 }
   0xc   :  { %v46_v10 = vmul.f32 %v464_v7, %v45_v9 }
   0xe   :  { %v47_v11 = vadd.f32 %v464_v7, %v46_v10 }
  0x10   :  { %v49_v12 = vsel %vm48_vm2, %v464_v7, %v47_v11 }
  0x76   :  { %v35_v13 = vpop.xlane.xlu0 %34  ;;  %v42_v17 = vpop.xlane.xlu1 %41 }
  0x77   :  { %v50_v14 = vmul.f32 %v49_v12, %v35_v13  ;;  %v52_v21 = vmul.f32 %v49_v12, %v42_v17  ;;  %v448_v17 = vld [vmem:[%s678_s5 + $0x30] sm:$0xff] }
  0x79   :  { %v53_v15 = vsub.f32 %v521_v0, %v50_v14  ;;  %v543_v23 = vsub.f32 %v526_v1, %v52_v21  ;;  %v449_v14 = vld [vmem:[%s678_s5 + $0x38] sm:$0xff]  ;;  %v447_v21 = vld [vmem:[%s678_s5 + $0x28] sm:$0xff] }
  0x7a   :  { %367 = vmatpush.bf16.msra.mxu1 %v449_v14  ;;  %450 = vmatpush.bf16.msra.mxu2 %v449_v14 }
  0x7b   :  { %v56_v16 = vmul.f32 %v53_v15, %v53_v15  ;;  %v58_v26 = vmul.f32 %v543_v23, %v543_v23 }
  0x7d   :  { %v59_v18 = vsel %vm32_vm0, %v56_v16, 0.0  ;;  %v65_v27 = vsel %vm39_vm1, %v58_v26, 0.0 }
  0x7e   :  { %60 = vadd.xlane.f32.xlu1 %v59_v18  ;;  %v38_v19 = vpop.xlane.xlu0 %37  ;;  %368 = vmatpush.bf16.msra.mxu1 %v448_v17 }
  0x7f   :  { %v51_v20 = vmul.f32 %v49_v12, %v38_v19  ;;  %451 = vmatpush.bf16.msra.mxu2 %v448_v17 }
  0x81   :  { %v54_v22 = vsub.f32 %v535_v4, %v51_v20 }
  0x82   :  { %369 = vmatpush.bf16.msra.mxu1 %v447_v21 }
  0x83   :  { %v57_v24 = vmul.f32 %v54_v22, %v54_v22  ;;  %452 = vmatpush.bf16.msra.mxu2 %v447_v21 }
  0x85   :  { %v62_v25 = vsel %vm32_vm0, %v57_v24, 0.0 }
  0x86   :  { %63 = vadd.xlane.f32.xlu2 %v62_v25 }
  0x8e   :  { %66 = vadd.xlane.f32.xlu2 %v65_v27  ;;  %v446_v27 = vld [vmem:[%s678_s5 + $0x20] sm:$0xff] }
  0x8f   :  { %370 = vmatpush.bf16.msra.mxu1 %v446_v27  ;;  %453 = vmatpush.bf16.msra.mxu2 %v446_v27 }
  0xf1   :  { %v61_v29 = vpop.xlane.xlu1 %60 }
  0xf2   :  { %v68_v30 = vmul.f32 %v61_v29, %v49_v12 }
  0xf4   :  { %v71_v32 = vadd.f32 1e-05, %v68_v30  ;;  %v445_v30 = vld [vmem:[%s678_s5 + $0x18] sm:$0xff] }
  0xf5   :  { %371 = vmatpush.bf16.msra.mxu1 %v445_v30  ;;  %454 = vmatpush.bf16.msra.mxu2 %v445_v30 }
  0xf6   :  { %465 = vrsqrt.f32 %v71_v32  ;;  %vm80_vm4 = vweird.f32 %v71_v32 }
  0xf9   :  { %v64_v33 = vpop.xlane.xlu2 %63 }
  0xfa   :  { %v69_v34 = vmul.f32 %v64_v33, %v49_v12 }
  0xfc   :  { %v466_v35 = vpop.eup %465  ;;  %v72_v36 = vadd.f32 1e-05, %v69_v34 }
  0xfd   :  { %v75_v37 = vmul.f32 %v466_v35, %v71_v32  ;;  %vm81_vm3 = vweird.f32 %v466_v35 }
  0xfe   :  { %467 = vrsqrt.f32 %v72_v36  ;;  %vm82_vm5 = vmor %vm80_vm4, %vm81_vm3  ;;  %vm90_vm7 = vweird.f32 %v72_v36 }
  0xff   :  { %v76_v38 = vmul.f32 %v466_v35, %v75_v37 }
 0x101   :  { %v77_v39 = vmul.f32 0.5, %v76_v38  ;;  %v67_v40 = vpop.xlane.xlu2 %66 }
 0x102   :  { %v70_v41 = vmul.f32 %v67_v40, %v49_v12  ;;  %v461_v12 = vld [vmem:[%s675_s4] ss:$0 sm:$0xff] }
 0x103   :  { %v78_v42 = vsub.f32 1.5, %v77_v39  ;;  %v444_v39 = vld [vmem:[%s678_s5 + $0x10] sm:$0xff] }
 0x104   :  { %v468_v43 = vpop.eup %467  ;;  %v73_v44 = vadd.f32 1e-05, %v70_v41  ;;  %372 = vmatpush.bf16.msra.mxu1 %v444_v39  ;;  %455 = vmatpush.bf16.msra.mxu2 %v444_v39 }
 0x105   :  { %v79_v45 = vmul.f32 %v466_v35, %v78_v42  ;;  %v85_v46 = vmul.f32 %v468_v43, %v72_v36  ;;  %vm91_vm6 = vweird.f32 %v468_v43 }
 0x106   :  { %469 = vrsqrt.f32 %v73_v44  ;;  %vm92_vm8 = vmor %vm90_vm7, %vm91_vm6  ;;  %vm100_vm9 = vweird.f32 %v73_v44 }
 0x107   :  { %v86_v47 = vmul.f32 %v468_v43, %v85_v46  ;;  %v83_v48 = vsel %vm82_vm5, %v466_v35, %v79_v45 }
 0x108   :  { %v104_v52 = vmul.f32 %v83_v48, %v53_v15  ;;  %v443_v48 = vld [vmem:[%s678_s5 + $0x8] sm:$0xff] }
 0x109   :  { %v87_v49 = vmul.f32 0.5, %v86_v47  ;;  %373 = vmatpush.bf16.msra.mxu1 %v443_v48  ;;  %456 = vmatpush.bf16.msra.mxu2 %v443_v48 }
 0x10a   :  { %v110_v59 = vmul.f32 %v459_v53, %v104_v52 }
 0x10b   :  { %v88_v50 = vsub.f32 1.5, %v87_v49 }
 0x10c   :  { %v470_v51 = vpop.eup %469  ;;  %v116_v2 = vadd.f32 %v460_v60, %v110_v59 }
 0x10d   :  { %v89_v54 = vmul.f32 %v468_v43, %v88_v50  ;;  %v95_v55 = vmul.f32 %v470_v51, %v73_v44  ;;  %vm101_vm10 = vweird.f32 %v470_v51 }
 0x10e   :  { %vm102_vm11 = vmor %vm100_vm9, %vm101_vm10 }
 0x10f   :  { %v93_v56 = vsel %vm92_vm8, %v468_v43, %v89_v54  ;;  %v96_v57 = vmul.f32 %v470_v51, %v95_v55 }
 0x110   :  { %v105_v58 = vmul.f32 %v93_v56, %v54_v22 }
 0x111   :  { %v97_v61 = vmul.f32 0.5, %v96_v57 }
 0x112   :  { %v111_v62 = vmul.f32 %v459_v53, %v105_v58  ;;  %v442_v58 = vld [vmem:[%s678_s5] sm:$0xff] }
 0x113   :  { %v98_v63 = vsub.f32 1.5, %v97_v61  ;;  %374 = vmatpush.bf16.msra.mxu1 %v442_v58  ;;  %457 = vmatpush.bf16.msra.mxu2 %v442_v58 }
 0x114   :  { %v117_v3 = vadd.f32 %v460_v60, %v111_v62 }
 0x115   :  { %v99_v5 = vmul.f32 %v470_v51, %v98_v63 }
 0x116   :  { %v119_v6 = vpack.c.bf16 %v117_v3, %v116_v2 }
 0x117   :  { %v103_v7 = vsel %vm102_vm11, %v470_v51, %v99_v5 }
 0x118   :  { %403 = vmatmul.msk.bf16.vlgmr.msra.gmra.mxu0 %vm32_vm0, %v119_v6  ;;  %v106_v8 = vmul.f32 %v103_v7, %v543_v23 }
 0x11a   :  { %v112_v9 = vmul.f32 %v459_v53, %v106_v8 }
 0x11c   :  { %v118_v10 = vadd.f32 %v460_v60, %v112_v9 }
 0x11e   :  { %v120_v11 = vpack.c.bf16 %v118_v10, %v118_v10 }
 0x128   :  { %404 = vmatmul.msk.bf16.gmra.mxu0 %vm32_vm0, %v120_v11 }
 0x195   :  { %v156_v13 = vpop.f32.mrf.mxu0 }
 0x196   :  { %v570_v15 = vadd.f32 %v461_v12, %v156_v13 }
 0x198   :  { %v573_v16 = vmul.f32 0.70710677, %v570_v15 }
 0x19a   :  { %v171_v18 = vmul.f32 %v573_v16, %v573_v16 }
 0x19c   :  { %v580_v19 = vmin.f32 %v171_v18, 16.0 }
 0x19d   :  { %v158_v20 = vpop.f32.mrf.mxu0 }
 0x19e   :  { %v173_v22 = vmul.f32 2.1237322e-06, %v580_v19  ;;  %v586_v23 = vadd.f32 %v461_v12, %v158_v20  ;;  %v184_v24 = vmul.f32 3.8918573e-05, %v580_v19 }
 0x1a0   :  { %v174_v25 = vadd.f32 0.00028619796, %v173_v22  ;;  %v590_v26 = vmul.f32 0.70710677, %v586_v23  ;;  %v185_v28 = vadd.f32 0.001143296, %v184_v24 }
 0x1a2   :  { %v211_v29 = vmul.f32 %v590_v26, %v590_v26  ;;  %v186_v31 = vmul.f32 %v185_v28, %v580_v19  ;;  %v175_v32 = vmul.f32 %v174_v25, %v580_v19 }
 0x1a4   :  { %v602_v33 = vmin.f32 %v211_v29, 16.0  ;;  %v187_v35 = vadd.f32 0.014752088, %v186_v31  ;;  %v176_v41 = vadd.f32 0.0036580483, %v175_v32 }
 0x1a5   :  { %v161_v34 = vpop.f32.mrf.mxu0 }
 0x1a6   :  { %v213_v36 = vmul.f32 2.1237322e-06, %v602_v33  ;;  %v605_v37 = vadd.f32 %v461_v12, %v161_v34  ;;  %v224_v38 = vmul.f32 3.8918573e-05, %v602_v33  ;;  %v188_v40 = vmul.f32 %v187_v35, %v580_v19 }
 0x1a7   :  { %v177_v51 = vmul.f32 %v176_v41, %v580_v19 }
 0x1a8   :  { %v214_v42 = vadd.f32 0.00028619796, %v213_v36  ;;  %v613_v43 = vmul.f32 0.70710677, %v605_v37  ;;  %v189_v44 = vadd.f32 0.112945676, %v188_v40 }
 0x1a9   :  { %v225_v45 = vadd.f32 0.001143296, %v224_v38  ;;  %v178_v62 = vadd.f32 0.05243302, %v177_v51 }
 0x1aa   :  { %v215_v46 = vmul.f32 %v214_v42, %v602_v33  ;;  %v251_v47 = vmul.f32 %v613_v43, %v613_v43  ;;  %v190_v49 = vmul.f32 %v189_v44, %v580_v19 }
 0x1ab   :  { %v226_v50 = vmul.f32 %v225_v45, %v602_v33  ;;  %v179_v10 = vmul.f32 %v178_v62, %v580_v19 }
 0x1ac   :  { %v624_v52 = vmin.f32 %v251_v47, 16.0  ;;  %v191_v54 = vadd.f32 0.4994258, %v190_v49  ;;  %v216_v56 = vadd.f32 0.0036580483, %v215_v46 }
 0x1ad   :  { %v163_v53 = vpop.f32.mrf.mxu0  ;;  %v227_v55 = vadd.f32 0.014752088, %v226_v50  ;;  %v180_v21 = vadd.f32 0.18741608, %v179_v10  ;;  %v165_v10 = vmul.f32 0.5, %v570_v15 }
 0x1ae   :  { %v253_v57 = vmul.f32 2.1237322e-06, %v624_v52  ;;  %v192_v59 = vmul.f32 %v191_v54, %v580_v19  ;;  %v264_v61 = vmul.f32 3.8918573e-05, %v624_v52  ;;  %v217_v5 = vmul.f32 %v216_v56, %v602_v33 }
 0x1af   :  { %v228_v60 = vmul.f32 %v227_v55, %v602_v33  ;;  %v181_v30 = vmul.f32 %v180_v21, %v580_v19 }
 0x1b0   :  { %v254_v63 = vadd.f32 0.00028619796, %v253_v57  ;;  %v193_v2 = vadd.f32 1.0, %v192_v59  ;;  %v265_v6 = vadd.f32 0.001143296, %v264_v61 }
 0x1b1   :  { %v229_v3 = vadd.f32 0.112945676, %v228_v60  ;;  %v218_v11 = vadd.f32 0.05243302, %v217_v5  ;;  %v182_v41 = vadd.f32 1.1283791, %v181_v30 }
 0x1b2   :  { %471 = vrcp.f32 %v193_v2  ;;  %v255_v7 = vmul.f32 %v254_v63, %v624_v52  ;;  %v266_v9 = vmul.f32 %v265_v6, %v624_v52  ;;  %v205_v35 = vand.u32 2147483648, %v193_v2 }
 0x1b3   :  { %v230_v8 = vmul.f32 %v229_v3, %v602_v33  ;;  %v219_v22 = vmul.f32 %v218_v11, %v602_v33  ;;  %v203_v36 = vand.u32 2147483647, %v193_v2  ;;  %vm199_vm13 = vweird.f32 %v193_v2 }
 0x1b4   :  { %v267_v13 = vadd.f32 0.014752088, %v266_v9  ;;  %v256_v14 = vadd.f32 0.0036580483, %v255_v7  ;;  %v206_v19 = vor.u32 1.1754944e-38, %v205_v35  ;;  %v183_v51 = vmul.f32 %v182_v41, %v573_v16 }
 0x1b5   :  { %v231_v12 = vadd.f32 0.4994258, %v230_v8  ;;  %v220_v32 = vadd.f32 0.18741608, %v219_v22  ;;  %vm204_vm15 = vcmp.eq.f32.partialorder %v203_v36, 8.507059e+37  ;;  %v166_v11 = vmul.f32 0.5, %v586_v23 }
 0x1b6   :  { %v268_v18 = vmul.f32 %v267_v13, %v624_v52  ;;  %v257_v28 = vmul.f32 %v256_v14, %v624_v52 }
 0x1b7   :  { %v232_v17 = vmul.f32 %v231_v12, %v602_v33  ;;  %v221_v45 = vmul.f32 %v220_v32, %v602_v33  ;;  %v462_v32 = vld [vmem:[%s677_s6] ss:$0 sm:$0xff] }
 0x1b8   :  { %v472_v20 = vpop.eup %471  ;;  %v269_v27 = vadd.f32 0.112945676, %v268_v18  ;;  %v258_v39 = vadd.f32 0.05243302, %v257_v28  ;;  %v167_v28 = vmul.f32 0.5, %v605_v37 }
 0x1b9   :  { %v195_v24 = vmul.f32 %v472_v20, %v193_v2  ;;  %v233_v25 = vadd.f32 1.0, %v232_v17  ;;  %vm200_vm12 = vweird.f32 %v472_v20  ;;  %v222_v54 = vadd.f32 1.1283791, %v221_v45 }
 0x1ba   :  { %v270_v31 = vmul.f32 %v269_v27, %v624_v52  ;;  %vm201_vm14 = vmor %vm199_vm13, %vm200_vm12  ;;  %v259_v48 = vmul.f32 %v258_v39, %v624_v52 }
 0x1bb   :  { %v196_v29 = vsub.f32 1.0, %v195_v24  ;;  %473 = vrcp.f32 %v233_v25  ;;  %v245_v55 = vand.u32 2147483648, %v233_v25  ;;  %v243_v58 = vand.u32 2147483647, %v233_v25 }
 0x1bc   :  { %v271_v38 = vadd.f32 0.4994258, %v270_v31  ;;  %v260_v59 = vadd.f32 0.18741608, %v259_v48  ;;  %vm239_vm3 = vweird.f32 %v233_v25  ;;  %v223_v61 = vmul.f32 %v222_v54, %v590_v26 }
 0x1bd   :  { %v197_v34 = vmul.f32 %v472_v20, %v196_v29  ;;  %v246_v60 = vor.u32 1.1754944e-38, %v245_v55  ;;  %vm244_vm5 = vcmp.eq.f32.partialorder %v243_v58, 8.507059e+37 }
 0x1be   :  { %v272_v42 = vmul.f32 %v271_v38, %v624_v52  ;;  %v261_v16 = vmul.f32 %v260_v59, %v624_v52 }
 0x1bf   :  { %v198_v40 = vadd.f32 %v472_v20, %v197_v34 }
 0x1c0   :  { %v273_v50 = vadd.f32 1.0, %v272_v42  ;;  %v262_v12 = vadd.f32 1.1283791, %v261_v16 }
 0x1c1   :  { %v474_v44 = vpop.eup %473  ;;  %v202_v46 = vsel %vm201_vm14, %v472_v20, %v198_v40 }
 0x1c2   :  { %v235_v47 = vmul.f32 %v474_v44, %v233_v25  ;;  %v207_v49 = vsel %vm204_vm15, %v206_v19, %v202_v46  ;;  %475 = vrcp.f32 %v273_v50  ;;  %vm240_vm2 = vweird.f32 %v474_v44 }
 0x1c3   :  { %v208_v56 = vmul.f32 %v207_v49, %v183_v51  ;;  %vm241_vm4 = vmor %vm239_vm3, %vm240_vm2  ;;  %v285_v13 = vand.u32 2147483648, %v273_v50  ;;  %v283_v17 = vand.u32 2147483647, %v273_v50  ;;  %vm279_vm7 = vweird.f32 %v273_v50 }
 0x1c4   :  { %v236_v53 = vsub.f32 1.0, %v235_v47  ;;  %v263_v22 = vmul.f32 %v262_v12, %v613_v43 }
 0x1c5   :  { %v405_v62 = vclamps-f32 %v208_v56, 1.0  ;;  %v286_v52 = vor.u32 1.1754944e-38, %v285_v13  ;;  %vm284_vm9 = vcmp.eq.f32.partialorder %v283_v17, 8.507059e+37 }
 0x1c6   :  { %v237_v57 = vmul.f32 %v474_v44, %v236_v53 }
 0x1c7   :  { %v291_v8 = vadd.f32 1.0, %v405_v62 }
 0x1c8   :  { %v238_v33 = vadd.f32 %v474_v44, %v237_v57  ;;  %v476_v2 = vpop.eup %475 }
 0x1c9   :  { %v275_v6 = vmul.f32 %v476_v2, %v273_v50  ;;  %vm280_vm6 = vweird.f32 %v476_v2  ;;  %v294_v18 = vmul.f32 %v291_v8, %v165_v10 }
 0x1ca   :  { %v242_v63 = vsel %vm241_vm4, %v474_v44, %v238_v33  ;;  %vm281_vm8 = vmor %vm279_vm7, %vm280_vm6 }
 0x1cb   :  { %v247_v3 = vsel %vm244_vm5, %v246_v60, %v242_v63  ;;  %v276_v9 = vsub.f32 1.0, %v275_v6 }
 0x1cc   :  { %v248_v5 = vmul.f32 %v247_v3, %v223_v61 }
 0x1cd   :  { %v277_v26 = vmul.f32 %v476_v2, %v276_v9 }
 0x1ce   :  { %v406_v7 = vclamps-f32 %v248_v5, 1.0 }
 0x1cf   :  { %v278_v21 = vadd.f32 %v476_v2, %v277_v26 }
 0x1d0   :  { %v292_v14 = vadd.f32 1.0, %v406_v7 }
 0x1d1   :  { %v282_v25 = vsel %vm281_vm8, %v476_v2, %v278_v21 }
 0x1d2   :  { %v295_v20 = vmul.f32 %v292_v14, %v166_v11  ;;  %v287_v15 = vsel %vm284_vm9, %v286_v52, %v282_v25 }
 0x1d3   :  { %v288_v23 = vmul.f32 %v287_v15, %v263_v22 }
 0x1d4   :  { %v297_v24 = vpack.c.bf16 %v295_v20, %v294_v18 }
 0x1d5   :  { %v407_v27 = vclamps-f32 %v288_v23, 1.0 }
 0x1d6   :  { %375 = vmatmul.bf16.vlgmr.msra.gmra.mxu1 %v297_v24 }
 0x1d7   :  { %v293_v29 = vadd.f32 1.0, %v407_v27 }
 0x1d9   :  { %v296_v30 = vmul.f32 %v293_v29, %v167_v28 }
 0x1db   :  { %v298_v31 = vpack.c.bf16 %v296_v30, %v296_v30 }
 0x1dd   :  { %380 = vmatmul.bf16.vlgmr.msra.gmra.mxu2 %v298_v31 }
 0x253   :  { %v376_v34 = vpop.f32.mrf.mxu1 }
 0x254   :  { %v377_v35 = vadd.f32 %v462_v32, %v376_v34 }
 0x256   :  { %v385_v43 = vadd.f32 %v377_v35, %v521_v0 }
 0x258   :  { %388 = vst.msk [vmem:[%s679_s7] sm:$0xff] %vm32_vm0, %v385_v43 }
 0x25b   :  { %v378_v36 = vpop.f32.mrf.mxu1 }
 0x25c   :  { %v379_v38 = vadd.f32 %v462_v32, %v378_v36 }
 0x25e   :  { %v386_v37 = vadd.f32 %v379_v38, %v535_v4 }
 0x260   :  { %389 = vst.msk [vmem:[%s679_s7 + $0x8] sm:$0xff] %vm32_vm0, %v386_v37  ;;  %v381_v39 = vpop.f32.mrf.mxu2 }
 0x261   :  { %v382_v40 = vadd.f32 %v462_v32, %v381_v39 }
 0x263   :  { %v387_v41 = vadd.f32 %v382_v40, %v526_v1 }
 0x265   :  { %390 = vst.msk [vmem:[%s679_s7 + $0x10] sm:$0x3] %vm39_vm1, %v387_v41 }
 0x268   :  { %v383_v0 = vpop.f32.mrf.mxu2 }

// kernel: tile.0
= control target key start
LH: loop header
LB: loop body
LE: loop exit
PB: predicated region body
PF: predicated region fallthrough
CT: control target
= control target key end

     0   :  { %vm7_vm0 = vcmask 7168   ;;  %s94_s8 = smov 125   ;;  %s95_s11 = smov 126   ;;  %s141_s0 = inlined_call_operand.vmem [shape: f32[2,4], index: 0, kind: input, shape index: {}]   ;;  %s142_s1 = inlined_call_operand.vmem [shape: f32[8,1,1], index: 1, kind: output, shape index: {}]  }
   0x1   :  { %v4_v0 = vld [vmem:[%s141_s0] sm:$0x3]  ;;  %s93_s0 = smov 127  }
   0x2   :  { %5 = vst [vmem:[#allocation1] sm:$0x3] %v4_v0 }
   0x9   :  { %v11_v1 = vld [vmem:[#allocation1] sm:$0x3]  }
   0xa   :  { %v6_v2 = vld [vmem:[#allocation1] sm:$0x3]   ;;  %12 = vrot.lane.b32.xlu0 %v11_v1, %s93_s0 }
   0xb   :  { %v27_v3 = vld [vmem:[#allocation1] sm:$0x3]   ;;  %8 = vst.msk [vmem:[#allocation0] sm:$0x1] %vm7_vm0, %v6_v2  }
   0xc   :  { %28 = vrot.lane.b32.xlu1 %v27_v3, %s94_s8  ;;  %10 = vst.msk [vmem:[#allocation0 + $0x1f] sm:$0x2] %vm7_vm0, %v6_v2   ;;  %v19_v4 = vld [vmem:[#allocation1] sm:$0x3]  }
  0x12   :  { %v37_v5 = vld [vmem:[#allocation0] sm:$0x1]  ;;  %20 = vrot.lane.b32.xlu0 %v19_v4, %s95_s11 }
  0x13   :  { %40 = vst [vmem:[%s142_s1] sm:$0x1] %v37_v5  ;;  %v60_v6 = vld [vmem:[#allocation0 + $0x20] sm:$0x1] }
  0x14   :  { %86 = vst [vmem:[%s142_s1 + $0x4] sm:$0x1] %v60_v6 }
  0x7c   :  { %v13_v7 = vpop.permute.xlu0 %12  }
  0x7d   :  { %16 = vst.msk [vmem:[#allocation0 + $0x8] sm:$0x1] %vm7_vm0, %v13_v7  }
  0x7e   :  { %v29_v8 = vpop.permute.xlu1 %28   ;;  %18 = vst.msk [vmem:[#allocation0 + $0x27] sm:$0x2] %vm7_vm0, %v13_v7  }
  0x7f   :  { %32 = vst.msk [vmem:[#allocation0 + $0x18] sm:$0x1] %vm7_vm0, %v29_v8  }
  0x80   :  { %34 = vst.msk [vmem:[#allocation0 + $0x37] sm:$0x2] %vm7_vm0, %v29_v8  }
  0x84   :  { %v42_v9 = vld [vmem:[#allocation0 + $0x8] sm:$0x1]  ;;  %v21_v10 = vpop.permute.xlu0 %20  }
  0x85   :  { %83 = vst [vmem:[%s142_s1 + $0x1] sm:$0x1] %v42_v9  ;;  %v66_v11 = vld [vmem:[#allocation0 + $0x28] sm:$0x1] }
  0x86   :  { %87 = vst [vmem:[%s142_s1 + $0x5] sm:$0x1] %v66_v11  ;;  %v54_v12 = vld [vmem:[#allocation0 + $0x18] sm:$0x1] }
  0x87   :  { %85 = vst [vmem:[%s142_s1 + $0x3] sm:$0x1] %v54_v12  ;;  %v78_v13 = vld [vmem:[#allocation0 + $0x38] sm:$0x1] }
  0x88   :  { %89 = vst [vmem:[%s142_s1 + $0x7] sm:$0x1] %v78_v13 }
  0x89   :  { %24 = vst.msk [vmem:[#allocation0 + $0x10] sm:$0x1] %vm7_vm0, %v21_v10  }
  0x8a   :  { %26 = vst.msk [vmem:[#allocation0 + $0x2f] sm:$0x2] %vm7_vm0, %v21_v10  }
  0x90   :  { %v48_v14 = vld [vmem:[#allocation0 + $0x10] sm:$0x1] }
  0x91   :  { %84 = vst [vmem:[%s142_s1 + $0x2] sm:$0x1] %v48_v14  ;;  %v72_v15 = vld [vmem:[#allocation0 + $0x30] sm:$0x1] }
  0x92   :  { %88 = vst [vmem:[%s142_s1 + $0x6] sm:$0x1] %v72_v15 }

// kernel: hf_adapter_forward.71
= control target key start
LH: loop header
LB: loop body
LE: loop exit
PB: predicated region body
PF: predicated region fallthrough
CT: control target
= control target key end

     0   :  { %vm37_vm0 = vcmask 261120   ;;  %vm55_vm1 = vcmask 519168   ;;  %s108_s1 = inlined_call_operand.vmem [shape: bf16[32,64], index: 1, kind: input, shape index: {}]   ;;  %s109_s0 = inlined_call_operand.vmem [shape: f32[8,32], index: 0, kind: input, shape index: {}]   ;;  %s110_s2 = inlined_call_operand.vmem [shape: f32[1,64], index: 2, kind: input, shape index: {}]   ;;  %s111_s3 = inlined_call_operand.vmem [shape: bf16[8,64], index: 3, kind: output, shape index: {}]  }
   0x1   :  { %v71_v0 = vld [vmem:[%s108_s1 + $0x8] sm:$0xff]  ;;  %v70_v1 = vld [vmem:[%s108_s1] sm:$0xff] }
   0x2   :  { %47 = vmatpush.bf16.msra.mxu0 %v71_v0  ;;  %v15_v2 = vld [vmem:[%s109_s0] sm:$0xff] }
   0x3   :  { %v20_v3 = vpack.c.bf16 %v15_v2, %v15_v2  ;;  %v72_v4 = vld [vmem:[%s110_s2] ss:$0 sm:$0xff] }
   0x6   :  { %48 = vmatpush.bf16.msra.mxu0 %v70_v1 }
   0x9   :  { %69 = vmatmul.msk.bf16.vlgmr.msra.gmra.mxu0 %vm37_vm0, %v20_v3 }
  0x86   :  { %v50_v5 = vpop.f32.mrf.mxu0 }
  0x87   :  { %v51_v6 = vadd.f32 %v72_v4, %v50_v5 }
  0x89   :  { %v54_v7 = vpack.c.bf16 %v51_v6, %v51_v6 }
  0x8b   :  { %56 = vst.msk [vmem:[%s111_s3] sm:$0xf] %vm55_vm1, %v54_v7 }
  0x8e   :  { %v52_v8 = vpop.f32.mrf.mxu0 }

// kernel: hf_adapter_forward.80
= control target key start
LH: loop header
LB: loop body
LE: loop exit
PB: predicated region body
PF: predicated region fallthrough
CT: control target
= control target key end

     0   :  { %vm20_vm0 = vcmask 261120   ;;  %v125_v6 = vmov 32.0   ;;  %vm99_vm8 = vcmask 523264   ;;  %s170_s0 = inlined_call_operand.vmem [shape: f32[16,32], index: 0, kind: input, shape index: {}]   ;;  %s171_s1 = inlined_call_operand.vmem [shape: f32[1,32], index: 1, kind: input, shape index: {}]   ;;  %s172_s2 = inlined_call_operand.vmem [shape: bf16[32,64], index: 2, kind: input, shape index: {}]   ;;  %s173_s3 = inlined_call_operand.vmem [shape: f32[16,64], index: 3, kind: output, shape index: {}]  }
   0x1   :  { %v15_v0 = vld [vmem:[%s170_s0] sm:$0xff]  ;;  %v16_v2 = vld [vmem:[%s170_s0 + $0x8] sm:$0xff]  ;;  %119 = vrcp.f32 %v125_v6 }
   0x2   :  { %v18_v1 = vmul.f32 %v15_v0, %v15_v0  ;;  %v19_v4 = vmul.f32 %v16_v2, %v16_v2  ;;  %v116_v12 = vld [vmem:[%s172_s2 + $0x8] sm:$0xff]  ;;  %v115_v14 = vld [vmem:[%s172_s2] sm:$0xff] }
   0x3   :  { %91 = vmatpush.bf16.msra.mxu0 %v116_v12  ;;  %v118_v35 = vld [vmem:[%s171_s1] ss:$0 sm:$0xff] }
   0x4   :  { %v21_v3 = vsel %vm20_vm0, %v18_v1, 0.0  ;;  %v24_v5 = vsel %vm20_vm0, %v19_v4, 0.0 }
   0x5   :  { %22 = vadd.xlane.f32.xlu0 %v21_v3 }
   0x7   :  { %v120_v7 = vpop.eup %119  ;;  %92 = vmatpush.bf16.msra.mxu0 %v115_v14 }
   0x8   :  { %v28_v8 = vmul.f32 32.0, %v120_v7  ;;  %vm32_vm1 = vweird.f32 %v120_v7 }
   0xa   :  { %v29_v9 = vsub.f32 1.0, %v28_v8 }
   0xc   :  { %v30_v10 = vmul.f32 %v120_v7, %v29_v9 }
   0xd   :  { %25 = vadd.xlane.f32.xlu0 %v24_v5 }
   0xe   :  { %v31_v11 = vadd.f32 %v120_v7, %v30_v10 }
  0x10   :  { %v33_v13 = vsel %vm32_vm1, %v120_v7, %v31_v11 }
  0x78   :  { %v23_v15 = vpop.xlane.xlu0 %22 }
  0x79   :  { %v34_v16 = vmul.f32 %v33_v13, %v23_v15 }
  0x7b   :  { %v36_v17 = vadd.f32 1e-06, %v34_v16 }
  0x7d   :  { %121 = vrsqrt.f32 %v36_v17  ;;  %vm44_vm3 = vweird.f32 %v36_v17 }
  0x80   :  { %v26_v18 = vpop.xlane.xlu0 %25 }
  0x81   :  { %v35_v19 = vmul.f32 %v33_v13, %v26_v18 }
  0x83   :  { %v122_v20 = vpop.eup %121  ;;  %v37_v21 = vadd.f32 1e-06, %v35_v19 }
  0x84   :  { %v39_v22 = vmul.f32 %v122_v20, %v36_v17  ;;  %vm45_vm2 = vweird.f32 %v122_v20 }
  0x85   :  { %123 = vrsqrt.f32 %v37_v21  ;;  %vm46_vm4 = vmor %vm44_vm3, %vm45_vm2  ;;  %vm54_vm6 = vweird.f32 %v37_v21 }
  0x86   :  { %v40_v23 = vmul.f32 %v122_v20, %v39_v22 }
  0x88   :  { %v41_v24 = vmul.f32 0.5, %v40_v23 }
  0x8a   :  { %v42_v25 = vsub.f32 1.5, %v41_v24 }
  0x8b   :  { %v124_v26 = vpop.eup %123 }
  0x8c   :  { %v49_v27 = vmul.f32 %v124_v26, %v37_v21  ;;  %v43_v28 = vmul.f32 %v122_v20, %v42_v25  ;;  %vm55_vm5 = vweird.f32 %v124_v26 }
  0x8d   :  { %vm56_vm7 = vmor %vm54_vm6, %vm55_vm5 }
  0x8e   :  { %v50_v29 = vmul.f32 %v124_v26, %v49_v27  ;;  %v47_v31 = vsel %vm46_vm4, %v122_v20, %v43_v28 }
  0x8f   :  { %v58_v34 = vmul.f32 %v47_v31, %v15_v0 }
  0x90   :  { %v51_v30 = vmul.f32 0.5, %v50_v29 }
  0x91   :  { %v63_v38 = vmul.f32 %v118_v35, %v58_v34 }
  0x92   :  { %v52_v32 = vsub.f32 1.5, %v51_v30 }
  0x94   :  { %v53_v33 = vmul.f32 %v124_v26, %v52_v32 }
  0x96   :  { %v57_v36 = vsel %vm56_vm7, %v124_v26, %v53_v33 }
  0x97   :  { %v59_v37 = vmul.f32 %v57_v36, %v16_v2 }
  0x99   :  { %v64_v39 = vmul.f32 %v118_v35, %v59_v37 }
  0x9b   :  { %v69_v40 = vpack.c.bf16 %v64_v39, %v63_v38 }
  0x9d   :  { %114 = vmatmul.msk.bf16.vlgmr.msra.gmra.mxu0 %vm20_vm0, %v69_v40 }
 0x11a   :  { %v94_v41 = vpop.f32.mrf.mxu0 }
 0x11b   :  { %100 = vst.msk [vmem:[%s173_s3] sm:$0xff] %vm99_vm8, %v94_v41 }
 0x122   :  { %v96_v42 = vpop.f32.mrf.mxu0 }
 0x123   :  { %101 = vst.msk [vmem:[%s173_s3 + $0x8] sm:$0xff] %vm99_vm8, %v96_v42 }

// kernel: hf_adapter_forward.81
= control target key start
LH: loop header
LB: loop body
LE: loop exit
PB: predicated region body
PF: predicated region fallthrough
CT: control target
= control target key end

     0   :  { %9 = vsyncpa [#allocation3], 0  ;;  %vm19_vm0 = vcmask 523264   ;;  %v186_v2 = vmov 0   ;;  %s238_s0 = inlined_call_operand.vmem [shape: f32[14,64], index: 0, kind: input, shape index: {}]   ;;  %s239_s1 = inlined_call_operand.vmem [shape: s32[14,1], index: 1, kind: input, shape index: {}]   ;;  %s240_s2 = inlined_call_operand.hbm [shape: f32[1,1], index: 2, kind: output, shape index: {0}]   ;;  %s241_s3 = inlined_call_operand.hbm [shape: f32[1,1], index: 3, kind: output, shape index: {1}]  }
   0x1   :  { %v15_v0 = vld [vmem:[%s238_s0] sm:$0xff]  ;;  %148 = vset.pattern.permute.xlu1 %v186_v2  ;;  %149 = vset.pattern.permute.xlu0 %v186_v2 }
   0x2   :  { %v20_v1 = vsel %vm19_vm0, %v15_v0, -inf  ;;  %v17_v3 = vld [vmem:[%s239_s1] sm:$0xff] }
   0x3   :  { %21 = vmax.xlane.f32.xlu0 %v20_v1  ;;  %48 = vperm.xlu1 %148, %v17_v3  }
   0x4   :  { %10 = vsyncpa [#allocation5], 0  ;;  %v16_v4 = vld [vmem:[%s238_s0 + $0x8] sm:$0x3f]  ;;  %vm23_vm1 = vcmask 521216   ;;  %v45_v7 = vlaneseq  ;;  %v187_v12 = vmov 0.0  }
   0x5   :  { %v24_v5 = vsel %vm23_vm1, %v16_v4, -inf  ;;  %v18_v6 = vld [vmem:[%s239_s1 + $0x8] sm:$0x3f]  ;;  %vm67_vm5 = vcmp.ne.s32.totalorder %v17_v3, 0  ;;  %vm77_vm6 = vcmask 7168   ;;  %vm79_vm7 = vcmask 5120  }
   0x6   :  { %v46_v8 = vand.u32 127, %v45_v7  ;;  %vm68_vm4 = vcmp.ne.s32.totalorder %v18_v6, 0  ;;  %v138_v29 = vsel %vm67_vm5, 1.0, %v187_v12  ;;  %s112_s20 = sshll.u32 %s240_s2, 4  ;;  %s121_s23 = sshll.u32 %s241_s3, 4  ;;  %s113_s20 = int_to_ptr.hbm [resolvable:$true] %s112_s20  ;;  %s122_s23 = int_to_ptr.hbm [resolvable:$true] %s121_s23 }
   0x7   :  { %v139_v28 = vsel %vm68_vm4, 1.0, %v187_v12  ;;  %v93_v30 = vsel %vm77_vm6, %v138_v29, 0.0  ;;  %s188_s26 = smov [#allocation2]   ;;  %s189_s27 = smov [#allocation4]  }
   0x8   :  { %v94_v31 = vsel %vm79_vm7, %v139_v28, 0.0 }
   0x9   :  { %v95_v32 = vadd.f32 %v94_v31, %v93_v30 }
   0xb   :  { %25 = vmax.xlane.f32.xlu0 %v24_v5  ;;  %51 = vperm.xlu1 %148, %v18_v6  }
  0x75   :  { %v49_v9 = vpop.permute.xlu1 %48 }
  0x76   :  { %v22_v10 = vpop.xlane.xlu0 %21  ;;  %vm53_vm2 = vcmp.eq.s32.totalorder %v46_v8, %v49_v9 }
  0x77   :  { %v27_v11 = vsub.f32 %v15_v0, %v22_v10  ;;  %v136_v13 = vsel %vm53_vm2, 1.0, %v187_v12 }
  0x78   :  { %v59_v14 = vmul.f32 %v136_v13, %v15_v0 }
  0x79   :  { %v29_v15 = vmul.f32 1.442695, %v27_v11 }
  0x7a   :  { %v61_v16 = vsel %vm19_vm0, %v59_v14, 0.0 }
  0x7b   :  { %150 = vpow2.f32 %v29_v15  ;;  %62 = vadd.xlane.f32.xlu0 %v61_v16 }
  0x7d   :  { %v52_v17 = vpop.permute.xlu1 %51 }
  0x7e   :  { %v26_v18 = vpop.xlane.xlu0 %25  ;;  %vm54_vm3 = vcmp.eq.s32.totalorder %v46_v8, %v52_v17 }
  0x7f   :  { %v28_v19 = vsub.f32 %v16_v4, %v26_v18  ;;  %v137_v20 = vsel %vm54_vm3, 1.0, %v187_v12 }
  0x80   :  { %v60_v21 = vmul.f32 %v137_v20, %v16_v4 }
  0x81   :  { %v151_v22 = vpop.eup %150  ;;  %v31_v23 = vmul.f32 1.442695, %v28_v19 }
  0x82   :  { %v33_v24 = vsel %vm19_vm0, %v151_v22, 0.0  ;;  %v64_v25 = vsel %vm23_vm1, %v60_v21, 0.0 }
  0x83   :  { %152 = vpow2.f32 %v31_v23  ;;  %34 = vadd.xlane.f32.xlu2 %v33_v24  ;;  %65 = vadd.xlane.f32.xlu1 %v64_v25 }
  0x84   :  { %96 = vadd.xlane.f32.xlu0 %v95_v32 }
  0x89   :  { %v153_v26 = vpop.eup %152 }
  0x8a   :  { %v36_v27 = vsel %vm23_vm1, %v153_v26, 0.0 }
  0x8b   :  { %37 = vadd.xlane.f32.xlu2 %v36_v27 }
  0xee   :  { %v63_v38 = vpop.xlane.xlu0 %62 }
  0xf6   :  { %v35_v33 = vpop.xlane.xlu2 %34  ;;  %v66_v43 = vpop.xlane.xlu1 %65 }
  0xf7   :  { %154 = vlog2.f32 %v35_v33  ;;  %v97_v50 = vpop.xlane.xlu0 %96 }
  0xf8   :  { %v98_v51 = vrot.slane %v97_v50, 4 }
  0xfa   :  { %v99_v52 = vadd.f32 %v98_v51, %v97_v50 }
  0xfc   :  { %v100_v53 = vrot.slane %v99_v52, 2 }
  0xfd   :  { %v155_v34 = vpop.eup %154 }
  0xfe   :  { %v40_v35 = vmul.f32 0.6931472, %v155_v34  ;;  %v38_v36 = vpop.xlane.xlu2 %37  ;;  %v101_v57 = vadd.f32 %v100_v53, %v99_v52 }
  0xff   :  { %156 = vlog2.f32 %v38_v36 }
 0x100   :  { %v43_v37 = vadd.f32 %v40_v35, %v22_v10  ;;  %v102_v60 = vrot.slane %v101_v57, 1 }
 0x102   :  { %v73_v41 = vsub.f32 %v43_v37, %v63_v38  ;;  %v103_v63 = vadd.f32 %v102_v60, %v101_v57 }
 0x104   :  { %v75_v45 = vmul.f32 %v138_v29, %v73_v41 }
 0x105   :  { %v157_v39 = vpop.eup %156 }
 0x106   :  { %v42_v40 = vmul.f32 0.6931472, %v157_v39  ;;  %v78_v47 = vsel %vm77_vm6, %v75_v45, 0.0 }
 0x108   :  { %v44_v42 = vadd.f32 %v42_v40, %v26_v18 }
 0x10a   :  { %v74_v44 = vsub.f32 %v44_v42, %v66_v43 }
 0x10c   :  { %v76_v46 = vmul.f32 %v139_v28, %v74_v44 }
 0x10e   :  { %v80_v48 = vsel %vm79_vm7, %v76_v46, 0.0 }
 0x10f   :  { %v81_v49 = vadd.f32 %v80_v48, %v78_v47 }
 0x111   :  { %82 = vadd.xlane.f32.xlu2 %v81_v49 }
 0x184   :  { %v83_v54 = vpop.xlane.xlu2 %82 }
 0x185   :  { %v84_v55 = vrot.slane %v83_v54, 4 }
 0x187   :  { %v85_v56 = vadd.f32 %v84_v55, %v83_v54 }
 0x189   :  { %v86_v58 = vrot.slane %v85_v56, 2 }
 0x18b   :  { %v87_v59 = vadd.f32 %v86_v58, %v85_v56 }
 0x18d   :  { %v88_v61 = vrot.slane %v87_v59, 1 }
 0x18f   :  { %v89_v62 = vadd.f32 %v88_v61, %v87_v59 }
 0x191   :  { %140 = vpush %v89_v62 }
 0x192   :  { %142 = vpush %v103_v63 }
 0x1c2   :  { %s141_s24 = spop %140 }
 0x1c3   :  { %92 = sst [smem:[#allocation2]] %s141_s24  ;;  %s143_s25 = spop %142 }
 0x1c4   :  { %106 = sst [smem:[#allocation4]] %s143_s25 }
 0x1c5   :  { %115 = dma.smem_to_hbm %s188_s26, 16, %s113_s20, [#allocation3]  }
 0x1c6   :  { %124 = dma.smem_to_hbm %s189_s27, 16, %s122_s23, [#allocation5]  }
 0x1c7   :  { %182 = dma.done.wait [#allocation3], 16  }
 0x1c8   :  { %183 = vsyncadd [#allocation3], 4294967280 }
 0x1c9   :  { %184 = dma.done.wait [#allocation5], 16  }
 0x1ca   :  { %185 = vsyncadd [#allocation5], 4294967280 }
 0x1cb   :  { %133 = sfence }
 0x1cc   :  { %134 = vsyncpa [#allocation3], 1 }
 0x1cd   :  { %135 = vsyncpa [#allocation5], 1 }

// kernel: hf_adapter_forward.72
= control target key start
LH: loop header
LB: loop body
LE: loop exit
PB: predicated region body
PF: predicated region fallthrough
CT: control target
= control target key end

     0   :  { %s755_s27 = smov 0   ;;  %s826_s0 = inlined_call_operand.vmem [shape: bf16[8,8,8], index: 0, kind: input, shape index: {}]   ;;  %s827_s1 = inlined_call_operand.vmem [shape: bf16[8,12,8], index: 1, kind: input, shape index: {}]   ;;  %s828_s2 = inlined_call_operand.vmem [shape: bf16[8,12,8], index: 2, kind: input, shape index: {}]   ;;  %s829_s3 = inlined_call_operand.vmem [shape: f32[8,8], index: 3, kind: input, shape index: {}]   ;;  %s830_s4 = inlined_call_operand.vmem [shape: f32[8,8], index: 4, kind: input, shape index: {}]   ;;  %s831_s5 = inlined_call_operand.vmem [shape: f32[12,8], index: 5, kind: input, shape index: {}]   ;;  %s832_s6 = inlined_call_operand.vmem [shape: f32[12,8], index: 6, kind: input, shape index: {}]   ;;  %s833_s7 = inlined_call_operand.vmem [shape: f32[8,1,1], index: 7, kind: input, shape index: {}]   ;;  %s834_s8 = inlined_call_operand.vmem [shape: bf16[8,8,8], index: 8, kind: output, shape index: {}]  }
   0x1 LB: > { %s641_s28 = sadd.s32 4294967295, %s705_s27   ;;  %p645_p0 = scmp.ge.s32.totalorder %s705_s27, 1  ;;  %s705_s27 = sphi %s755_s27, %s18_s27  }
   0x2   : > { %p289_p1 = scmp.lt.s32.totalorder %s705_s27, 9 }
   0x4   : > { %p290_p2 = pnand %p645_p0, %p289_p1 }
   0x5   : > { %p334_p3 = scmp.lt.s32.totalorder (!%p290_p2), %s641_s28, 7  ;;  %s707_s15 = smov (!%p290_p2), 8  }
   0x6   : > { %293 = sbr.rel (%p290_p2) target bundleno = 935 (0x3a7), region = 52  ;;  %s708_s16 = smov (!%p290_p2), 124  }
   0xb   : > { %s836_s28 = smov (!%p334_p3, %s641_s28), 7  ;;  %vm371_vm0 = vcmask 1047616   ;;  %v378_v27 = vlaneseq  ;;  %v366_v30 = vld [vmem:[%s831_s5] sm:$0xff]  ;;  %v367_v31 = vld [vmem:[%s831_s5 + $0x8] sm:$0xf]  ;;  %vm439_vm2 = vcmask 64512  }
   0xc   : > { %s660_s29 = sshll.u32 %s836_s28, 3  ;;  %s646_s11 = sshll.u32 %s836_s28, 2  ;;  %v368_v35 = vld [vmem:[%s832_s6] sm:$0xff]  ;;  %v369_v36 = vld [vmem:[%s832_s6 + $0x8] sm:$0xf]  ;;  %vm469_vm6 = vcmask 97280  }
   0xd   : > { %s342_s10 = scalar_lea.vmem %s827_s1, %s660_s29  ;;  %s337_s14 = scalar_lea.vmem %s826_s0, %s646_s11  ;;  %v379_v28 = vand.u32 127, %v378_v27  ;;  %v365_v49 = vld [vmem:[%s830_s4] sm:$0xff]  ;;  %v461_v60 = vshrl.u32 %v378_v27, 7  ;;  %vm535_vm7 = vcmask 1045504  }
   0xe   : > { %v358_v0 = vld [vmem:[%s342_s10] sm:$0xf]  ;;  %v359_v1 = vld [vmem:[%s342_s10 + $0x4] sm:$0x3]  ;;  %s350_s13 = scalar_lea.vmem %s833_s7, %s836_s28  ;;  %s354_s18 = scalar_lea.vmem %s834_s8, %s646_s11 }
   0xf   : > { %v360_v2 = vunpack.c.l.bf16 %v358_v0  ;;  %v361_v3 = vunpack.c.l.bf16 %v359_v1  ;;  %v356_v5 = vld [vmem:[%s337_s14] sm:$0xf]  ;;  %vm380_vm1 = vcmp.lt.s32.totalorder %v379_v28, 4  ;;  %vm462_vm3 = vcmp.lt.s32.totalorder %v379_v28, 8 }
  0x10   : > { %v357_v6 = vunpack.c.l.bf16 %v356_v5  ;;  %v364_v51 = vld [vmem:[%s829_s3] sm:$0xff]  ;;  %vm463_vm4 = vcmp.gt.s32.totalorder %v379_v28, %v461_v60 }
  0x11   : > { %v674_v4 = vpack.i.bf16 %v361_v3, %v360_v2  ;;  %v393_v37 = vmul.f32 %v366_v30, %v360_v2  ;;  %v394_v38 = vmul.f32 %v367_v31, %v361_v3  ;;  %vm464_vm5 = vmand %vm462_vm3, %vm463_vm4  ;;  %v690_v5 = vld [vmem:[%s350_s13] ss:$0 sm:$0xff] }
  0x12   : > { %v370_v56 = vmul.f32 %v364_v51, %v357_v6 }
  0x13   : > { %675 = vrot.lane.b32.xlu0 %v674_v4, %s707_s15 }
  0x1b   : > { %372 = vrot.lane.b32.xlu0 %v357_v6, %s707_s15 }
  0x85   : > { %v676_v7 = vpop.permute.xlu0 %675 }
  0x86   : > { %v678_v8 = vunpack.i.h.bf16 %v676_v7  ;;  %v677_v9 = vunpack.i.l.bf16 %v676_v7 }
  0x88   : > { %v397_v10 = vsel %vm371_vm0, %v677_v9, %v360_v2  ;;  %v400_v11 = vsel %vm371_vm0, %v678_v8, %v361_v3 }
  0x89   : > { %v679_v12 = vpack.i.bf16 %v400_v11, %v397_v10 }
  0x8b   : > { %680 = vrot.lane.b32.xlu1 %v679_v12, %s707_s15 }
  0x8d   : > { %v373_v13 = vpop.permute.xlu0 %372 }
  0x8e   : > { %v374_v14 = vsel %vm371_vm0, %v373_v13, %v357_v6 }
  0x93   : > { %375 = vrot.lane.b32.xlu1 %v374_v14, %s707_s15 }
  0xfd   : > { %v681_v15 = vpop.permute.xlu1 %680 }
  0xfe   : > { %v683_v16 = vunpack.i.h.bf16 %v681_v15  ;;  %v682_v17 = vunpack.i.l.bf16 %v681_v15 }
 0x100   : > { %v405_v18 = vsel %vm371_vm0, %v682_v17, %v360_v2  ;;  %v406_v19 = vsel %vm371_vm0, %v683_v16, %v361_v3 }
 0x101   : > { %v684_v20 = vpack.i.bf16 %v406_v19, %v405_v18  ;;  %v407_v21 = vsub.f32 0.0, %v405_v18  ;;  %v408_v25 = vsub.f32 0.0, %v406_v19 }
 0x103   : > { %411 = vrot.lane.b32.xlu2 %v407_v21, %s708_s16  ;;  %685 = vrot.lane.b32.xlu0 %v684_v20, %s708_s16 }
 0x105   : > { %v376_v22 = vpop.permute.xlu1 %375 }
 0x106   : > { %v377_v23 = vsel %vm371_vm0, %v376_v22, %v357_v6  ;;  %v709_v6 = vmov 0   ;;  %vm553_vm0 = vcmask 60416  }
 0x107   : > { %v381_v24 = vsub.f32 0.0, %v377_v23  ;;  %689 = vset.pattern.permute.xlu0 %v709_v6 }
 0x109   : > { %383 = vrot.lane.b32.xlu1 %v381_v24, %s708_s16 }
 0x10b   : > { %413 = vrot.lane.b32.xlu2 %v408_v25, %s708_s16 }
 0x113   : > { %387 = vrot.lane.b32.xlu2 %v377_v23, %s708_s16  ;;  %s347_s16 = scalar_lea.vmem %s828_s2, %s660_s29 }
 0x114   : > { %v655_v17 = vld [vmem:[%s347_s16] sm:$0xf]  ;;  %v662_v18 = vld [vmem:[%s347_s16] sm:$0x30] }
 0x115   : > { %v656_v19 = vor.u32 %v662_v18, %v655_v17 }
 0x117   : > { %v537_v20 = vsel %vm535_vm7, %v656_v19, 0 }
 0x118   : > { %546 = vmatpush.bf16.msra.mxu1 %v537_v20 }
 0x15d   : > { %v412_v26 = vpop.permute.xlu2 %411 }
 0x165   : > { %v414_v29 = vpop.permute.xlu2 %413 }
 0x16d   : > { %v388_v46 = vpop.permute.xlu2 %387 }
 0x175   : > { %v686_v32 = vpop.permute.xlu0 %685 }
 0x176   : > { %v688_v33 = vunpack.i.h.bf16 %v686_v32  ;;  %v687_v34 = vunpack.i.l.bf16 %v686_v32 }
 0x178   : > { %v425_v39 = vsel %vm380_vm1, %v412_v26, %v687_v34  ;;  %v426_v40 = vsel %vm380_vm1, %v414_v29, %v688_v33 }
 0x179   : > { %v427_v41 = vmul.f32 %v425_v39, %v368_v35  ;;  %v428_v42 = vmul.f32 %v426_v40, %v369_v36 }
 0x17b   : > { %v384_v43 = vpop.permute.xlu1 %383  ;;  %v429_v44 = vadd.f32 %v427_v41, %v393_v37  ;;  %v430_v45 = vadd.f32 %v428_v42, %v394_v38 }
 0x17c   : > { %v390_v50 = vsel %vm380_vm1, %v384_v43, %v388_v46 }
 0x17d   : > { %v432_v47 = vpack.c.bf16 %v429_v44, %v429_v44  ;;  %v433_v48 = vpack.c.bf16 %v430_v45, %v430_v45  ;;  %v391_v54 = vmul.f32 %v390_v50, %v365_v49 }
 0x17f   : > { %v436_v52 = vunpack.c.l.b16 %v432_v47  ;;  %v437_v53 = vunpack.c.l.b16 %v433_v48  ;;  %v392_v58 = vadd.f32 %v391_v54, %v370_v56 }
 0x181   : > { %v438_v55 = vpack.c.b16 %v437_v53, %v436_v52  ;;  %v431_v59 = vpack.c.bf16 %v392_v58, %v392_v58 }
 0x183   : > { %v444_v57 = vsel %vm439_vm2, %v438_v55, 0 }
 0x184   : > { %453 = vmatpush.bf16.xpose.msra.mxu0 %v444_v57 }
 0x18b   : > { %652 = vmatmul.msk.bf16.vlgmr.msra.gmra.mxu0 %vm439_vm2, %v431_v59 }
 0x208   : > { %v455_v61 = vpop.f32.mrf.mxu0 }
 0x209   : > { %v459_v62 = vmul.f32 0.35355338, %v455_v61 }
 0x20b   : > { %v465_v63 = vsel %vm464_vm5, -1e+30, %v459_v62 }
 0x20c   : > { %v468_v0 = vsel %vm462_vm3, -1e+30, %v465_v63  ;;  %v467_v1 = vsel %vm462_vm3, %v465_v63, -1e+30 }
 0x20d   : > { %v476_v2 = vsel %vm469_vm6, %v468_v0, -inf  ;;  %v470_v3 = vsel %vm469_vm6, %v467_v1, -inf }
 0x20e   : > { %477 = vmax.xlane.f32.xlu0 %v476_v2  ;;  %471 = vmax.xlane.f32.xlu1 %v470_v3 }
 0x210   : > { %v457_v4 = vpop.f32.mrf.mxu0 }
 0x222   : > { %521 = vperm.xlu0 %689, %v690_v5  }
 0x281   : > { %v478_v7 = vpop.xlane.xlu0 %477  ;;  %v472_v8 = vpop.xlane.xlu1 %471 }
 0x282   : > { %v479_v9 = vsub.f32 %v468_v0, %v478_v7  ;;  %v473_v11 = vsub.f32 %v467_v1, %v472_v8 }
 0x284   : > { %v480_v10 = vmul.f32 1.442695, %v479_v9  ;;  %v474_v12 = vmul.f32 1.442695, %v473_v11 }
 0x286   : > { %691 = vpow2.f32 %v480_v10 }
 0x287   : > { %693 = vpow2.f32 %v474_v12 }
 0x28c   : > { %v692_v13 = vpop.eup %691 }
 0x28d   : > { %v500_v14 = vsel %vm469_vm6, %v692_v13, 0.0  ;;  %v694_v15 = vpop.eup %693 }
 0x28e   : > { %501 = vadd.xlane.f32.xlu2 %v500_v14  ;;  %v482_v16 = vsel %vm469_vm6, %v694_v15, 0.0 }
 0x294   : > { %v522_v42 = vpop.permute.xlu0 %521 }
 0x296   : > { %483 = vadd.xlane.f32.xlu2 %v482_v16 }
 0x301   : > { %v502_v21 = vpop.xlane.xlu2 %501 }
 0x302   : > { %695 = vrcp.f32 %v502_v21  ;;  %v514_v27 = vand.u32 2147483648, %v502_v21  ;;  %vm508_vm9 = vweird.f32 %v502_v21  ;;  %v512_v29 = vand.u32 2147483647, %v502_v21 }
 0x304   : > { %v515_v33 = vor.u32 1.1754944e-38, %v514_v27  ;;  %vm513_vm11 = vcmp.eq.f32.partialorder %v512_v29, 8.507059e+37 }
 0x308   : > { %v696_v22 = vpop.eup %695 }
 0x309   : > { %v504_v23 = vmul.f32 %v696_v22, %v502_v21  ;;  %v484_v24 = vpop.xlane.xlu2 %483  ;;  %vm509_vm8 = vweird.f32 %v696_v22 }
 0x30a   : > { %697 = vrcp.f32 %v484_v24  ;;  %vm510_vm10 = vmor %vm508_vm9, %vm509_vm8  ;;  %v496_v35 = vand.u32 2147483648, %v484_v24  ;;  %v494_v38 = vand.u32 2147483647, %v484_v24  ;;  %vm490_vm13 = vweird.f32 %v484_v24 }
 0x30b   : > { %v505_v25 = vsub.f32 1.0, %v504_v23 }
 0x30c   : > { %v497_v41 = vor.u32 1.1754944e-38, %v496_v35  ;;  %vm495_vm15 = vcmp.eq.f32.partialorder %v494_v38, 8.507059e+37 }
 0x30d   : > { %v506_v26 = vmul.f32 %v696_v22, %v505_v25 }
 0x30f   : > { %v507_v28 = vadd.f32 %v696_v22, %v506_v26 }
 0x310   : > { %v698_v30 = vpop.eup %697 }
 0x311   : > { %v486_v31 = vmul.f32 %v698_v30, %v484_v24  ;;  %v511_v32 = vsel %vm510_vm10, %v696_v22, %v507_v28  ;;  %vm491_vm12 = vweird.f32 %v698_v30 }
 0x312   : > { %v516_v36 = vsel %vm513_vm11, %v515_v33, %v511_v32  ;;  %vm492_vm14 = vmor %vm490_vm13, %vm491_vm12 }
 0x313   : > { %v487_v34 = vsub.f32 1.0, %v486_v31  ;;  %v517_v40 = vmul.f32 %v692_v13, %v516_v36 }
 0x315   : > { %v488_v37 = vmul.f32 %v698_v30, %v487_v34  ;;  %v524_v46 = vmul.f32 %v522_v42, %v517_v40 }
 0x317   : > { %v489_v39 = vadd.f32 %v698_v30, %v488_v37 }
 0x319   : > { %v493_v43 = vsel %vm492_vm14, %v698_v30, %v489_v39 }
 0x31a   : > { %v498_v44 = vsel %vm495_vm15, %v497_v41, %v493_v43 }
 0x31b   : > { %v499_v45 = vmul.f32 %v694_v15, %v498_v44 }
 0x31d   : > { %v525_v47 = vadd.f32 %v524_v46, %v499_v45 }
 0x31f   : > { %v526_v48 = vpack.c.bf16 %v525_v47, %v525_v47 }
 0x321   : > { %657 = vmatmul.msk.bf16.vlgmr.msra.gmra.mxu1 %vm469_vm6, %v526_v48 }
 0x39e   : > { %v548_v49 = vpop.f32.mrf.mxu1 }
 0x39f   : > { %v552_v50 = vpack.c.bf16 %v548_v49, %v548_v49 }
 0x3a1   : > { %554 = vst.msk [vmem:[%s354_s18] sm:$0xf] %vm553_vm0, %v552_v50 }
 0x3a6   : > { %v550_v51 = vpop.f32.mrf.mxu1 }
 0x3a7 PF: > { %s18_s27 = sadd.s32 1, %s705_s27  }
 0x3a8   : > { %p15_p4 = scmp.ge.s32.totalorder %s18_s27, 10  }
 0x3aa   :  { %17 = sbr.rel (!%p15_p4) target bundleno = 1 (0x1), region = 91 }

</bundles_post_ra>
